<compile_context>
chip_gen: v6e
topology: v6e:2x2x1
jax: 0.10.0
libtpu: 0.0.40
codegen_flags: <defaults>
</compile_context>

<pallas_src>
import math
from functools import partial

import jax
import jax.numpy as jnp
from jax.experimental import pallas as pl
from jax.experimental.pallas import tpu as pltpu


# ----------------------------------------------------------------------------
# Math helpers (pure jnp -> usable inside kernels and in the reference).
# ----------------------------------------------------------------------------
def _layernorm(x, w, b, eps=1e-6):
    mu = jnp.mean(x, axis=-1, keepdims=True)
    xc = x - mu
    var = jnp.mean(xc * xc, axis=-1, keepdims=True)
    return xc * jax.lax.rsqrt(var + eps) * w + b


def _gelu(x):
    # exact (erf) GELU, matching torch.nn.GELU default; evaluated in fp32
    return 0.5 * x * (1.0 + jax.lax.erf(x * 0.7071067811865476))


def _mm(a, b):
    # bf16 operands, fp32 accumulation -- mirrors the in-kernel MXU path
    return jnp.matmul(a.astype(jnp.bfloat16), b.astype(jnp.bfloat16),
                      preferred_element_type=jnp.float32)


# ----------------------------------------------------------------------------
# Generation-aware knobs
# ----------------------------------------------------------------------------
def _num_batch_tiles(batch, seq):
    """Split the 'parallel' batch axis only on parts with 2 TensorCores (v7x).

    On single-TC v5e/v6e one tile means fewer grid steps and a larger-M
    channel matmul; the parallel axis buys nothing there."""
    kind = ""
    try:
        kind = jax.devices()[0].device_kind.lower()
    except Exception:
        pass
    n = 2 if "v7" in kind else 1
    if n > 1 and (batch % n != 0 or ((batch // n) * seq) % 8 != 0):
        n = 1
    return n


def _mixer_vmem_limit(rows, D, T, S, Cd, NCp, bt):
    """Scoped-VMEM request derived from actual block sizes (double-buffered
    pipeline blocks + activation scratch + live intermediates) with 2x
    headroom, capped at 32 MiB (<= half of a v7x TensorCore's 64 MiB)."""
    f32, bf16, dbl = 4, 2, 2
    act_in = dbl * rows * D * f32                       # stem activation block
    act_scr = rows * D * f32                            # carried activation
    layer_w = dbl * ((T * S + S * T) * bf16 + 2 * D * Cd * bf16
                     + (T + S + Cd + 5 * D) * f32)      # streamed per-layer weights
    head_w = dbl * (D * NCp * bf16 + (NCp + 2 * D) * f32)
    out_blk = dbl * bt * NCp * f32
    live = rows * Cd * f32 + T * bt * D * f32 + 3 * rows * D * f32
    need = act_in + act_scr + layer_w + head_w + out_blk + live
    return int(min(max(2 * need, 8 << 20), 32 << 20))


# ----------------------------------------------------------------------------
# Pallas kernels
# ----------------------------------------------------------------------------
def stem_kernel(x_ref, w_ref, b_ref, o_ref):
    """Patch-embedding 'conv' as a tiled matmul: o = x @ w + b (bf16 in, f32 acc)."""
    o_ref[...] = (
        jnp.dot(x_ref[...], w_ref[...], preferred_element_type=jnp.float32)
        + b_ref[...]
    )


def mixer_stack_kernel(z_ref,
                       n1w_ref, n1b_ref, tw1_ref, tb1_ref, tw2_ref, tb2_ref,
                       n2w_ref, n2b_ref, cw1_ref, cb1_ref, cw2_ref, cb2_ref,
                       fnw_ref, fnb_ref, hw_ref, hb_ref,
                       logits_ref, act_ref, *, bt, seq):
    """One MixerBlock per (batch-tile, layer) grid point, head fused at L-1.

    The activation is carried across the 'arbitrary' layer axis in a VMEM
    scratch (never written to HBM); per-layer weights stream in double-
    buffered via the layer grid index.  Activations are (bt*seq, D) fp32,
    batch-major (row = b*seq + s).  Matmul operands are bf16, fp32 MXU acc.
    """
    l = pl.program_id(1)
    n_layers = pl.num_programs(1)
    D = act_ref.shape[-1]

    # Layer 0: seed the VMEM carry from the stem activation (one tiny VMEM
    # copy per batch tile, not per layer; the input block is only DMA'd once
    # per tile since its index map ignores the layer axis).
    @pl.when(l == 0)
    def _seed():
        act_ref[...] = z_ref[...]

    z = act_ref[...]                                           # (bt*seq, D) f32

    # ---- token mixing:  x += (W2 @ gelu(W1 @ LN(x)_tm + b1) + b2)_bm ----
    xn = _layernorm(z, n1w_ref[0], n1b_ref[0]).astype(jnp.bfloat16)
    # batch-major (bt*seq, D) -> token-major (seq, bt*D) via static,
    # tile-aligned slices + lane-concat (no relayout), so each of the two
    # matmuls below is a single wide-N MXU op (N = bt*D) instead of bt
    # separate K=seq micro-matmuls.
    xn_tm = jnp.concatenate(
        [xn[b * seq:(b + 1) * seq, :] for b in range(bt)], axis=1)   # (seq, bt*D)
    h = jnp.dot(tw1_ref[0], xn_tm, preferred_element_type=jnp.float32)  # (T, bt*D)
    h = _gelu(h + tb1_ref[0]).astype(jnp.bfloat16)                   # tb1: (T, 1)
    u = (jnp.dot(tw2_ref[0], h, preferred_element_type=jnp.float32)
         + tb2_ref[0])                                               # (seq, bt*D)
    upd = jnp.concatenate(
        [u[:, b * D:(b + 1) * D] for b in range(bt)], axis=0)        # (bt*seq, D)
    z = z + upd

    # ---- channel mixing:  x += gelu(LN(x) @ Wc1 + c1) @ Wc2 + c2 ----
    # One (bt*seq, D) x (D, Cd) matmul -> large M keeps the MXU full.
    xn = _layernorm(z, n2w_ref[0], n2b_ref[0]).astype(jnp.bfloat16)
    hc = jnp.dot(xn, cw1_ref[0], preferred_element_type=jnp.float32) + cb1_ref[0]
    hc = _gelu(hc).astype(jnp.bfloat16)
    z = z + jnp.dot(hc, cw2_ref[0], preferred_element_type=jnp.float32) + cb2_ref[0]

    # Single full-block write of the carried activation (VMEM scratch only).
    @pl.when(l < n_layers - 1)
    def _carry():
        act_ref[...] = z

    # ---- fused head at the last layer: LN -> mean over tokens -> Linear ----
    @pl.when(l == n_layers - 1)
    def _head():
        zn = _layernorm(z, fnw_ref[...], fnb_ref[...])               # (bt*seq, D)
        pooled = jnp.mean(zn.reshape(bt, seq, D), axis=1)            # (bt, D) f32
        logits_ref[0] = (
            jnp.dot(pooled.astype(jnp.bfloat16), hw_ref[...],
                    preferred_element_type=jnp.float32)
            + hb_ref[...]
        )


# ----------------------------------------------------------------------------
# Pallas wrappers
# ----------------------------------------------------------------------------
def pallas_stem(x2d, w, b):
    M, P = x2d.shape
    D = w.shape[1]
    tm = next((c for c in (512, 256, 128) if M % c == 0), M)
    vmem = int(min(max(2 * (2 * tm * P * 2 + 2 * P * D * 2 + 3 * tm * D * 4 + D * 4),
                       8 << 20), 32 << 20))
    cost = pl.CostEstimate(flops=int(2 * M * P * D), transcendentals=0,
                           bytes_accessed=int(M * P * 2 + P * D * 2 + M * D * 4))
    return pl.pallas_call(
        stem_kernel,
        out_shape=jax.ShapeDtypeStruct((M, D), jnp.float32),
        grid=(M // tm,),
        in_specs=[pl.BlockSpec((tm, P), lambda i: (i, 0)),
                  pl.BlockSpec((P, D), lambda i: (0, 0)),
                  pl.BlockSpec((1, D), lambda i: (0, 0))],
        out_specs=pl.BlockSpec((tm, D), lambda i: (i, 0)),
        compiler_params=pltpu.CompilerParams(
            dimension_semantics=("parallel",),
            vmem_limit_bytes=vmem),
        cost_estimate=cost,
    )(x2d, w, b)


def pallas_mixer_stack(z2d, params, *, batch, seq, bt):
    M, D = z2d.shape
    L, T, S = params["tw1"].shape
    Cd = params["cw1"].shape[2]
    NCp = params["head_w"].shape[1]
    assert S == seq and batch % bt == 0 and M == batch * seq
    n_bt = batch // bt
    rows = bt * seq
    assert rows % 8 == 0, "batch-tile rows must be a multiple of 8"

    act_spec = pl.BlockSpec((rows, D), lambda i, l: (i, 0))

    def lspec(arr):     # per-layer weight slab, streamed along the layer axis
        return pl.BlockSpec((1,) + arr.shape[1:], lambda i, l: (l, 0, 0))

    def cspec(arr):     # layer-invariant (head) weights: resident for the grid
        return pl.BlockSpec(arr.shape, lambda i, l: (0, 0))

    layer_keys = ("n1w", "n1b", "tw1", "tb1", "tw2", "tb2",
                  "n2w", "n2b", "cw1", "cb1", "cw2", "cb2")
    larrs = [params[k] for k in layer_keys]
    harrs = [params[k] for k in ("norm_w", "norm_b", "head_w", "head_b")]

    flops = 4 * L * batch * seq * D * (T + Cd) + 2 * batch * D * NCp
    trans = L * batch * (T * D + seq * Cd)
    bytes_acc = (M * D * 4 + batch * NCp * 4
                 + n_bt * L * 2 * (2 * T * seq + 2 * D * Cd))
    cost = pl.CostEstimate(flops=int(flops), transcendentals=int(trans),
                           bytes_accessed=int(bytes_acc))

    # NOTE: if an xprof trace on v5e shows exposed per-layer weight DMA, add
    # pipeline_mode=pl.Buffered(3) on the cw1/cw2 BlockSpecs.
    logits = pl.pallas_call(
        partial(mixer_stack_kernel, bt=bt, seq=seq),
        out_shape=jax.ShapeDtypeStruct((n_bt, bt, NCp), jnp.float32),
        grid=(n_bt, L),
        in_specs=[act_spec] + [lspec(a) for a in larrs] + [cspec(a) for a in harrs],
        out_specs=pl.BlockSpec((1, bt, NCp), lambda i, l: (i, 0, 0)),
        scratch_shapes=[pltpu.VMEM((rows, D), jnp.float32)],
        compiler_params=pltpu.CompilerParams(
            dimension_semantics=("parallel", "arbitrary"),
            vmem_limit_bytes=_mixer_vmem_limit(rows, D, T, seq, Cd, NCp, bt)),
        cost_estimate=cost,
    )(z2d, *larrs, *harrs)
    return logits.reshape(batch, NCp)


# ----------------------------------------------------------------------------
# Glue: patch extraction (Conv2d with kernel == stride == patch) in plain JAX.
# Tokens are returned bf16 and lane-padded to a multiple of 128.
# ----------------------------------------------------------------------------
def patchify(x, patch, lane_pad=128):
    B, C, H, W = x.shape
    gh, gw = H // patch, W // patch
    x = x.reshape(B, C, gh, patch, gw, patch)
    x = x.transpose(0, 2, 4, 1, 3, 5).reshape(B, gh * gw, C * patch * patch)
    P = C * patch * patch
    Pp = ((P + lane_pad - 1) // lane_pad) * lane_pad
    if Pp != P:
        x = jnp.pad(x, ((0, 0), (0, 0), (0, Pp - P)))
    return x.astype(jnp.bfloat16)


def mlp_mixer_forward(x, params, cfg):
    p = cfg["patch_size"]
    B = x.shape[0]
    S = (cfg["img_size"] // p) ** 2
    NC = cfg["num_classes"]

    tokens = patchify(x, p).reshape(B * S, -1)                       # (B*S, Pp) bf16
    z = pallas_stem(tokens, params["stem_w"], params["stem_b"])      # (B*S, D)  f32

    bt = B // _num_batch_tiles(B, S)                                 # B on v5e/v6e
    logits = pallas_mixer_stack(z, params, batch=B, seq=S, bt=bt)    # (B, NCp)
    return logits[:, :NC]


# ----------------------------------------------------------------------------
# Pure-JAX reference (same math, no Pallas) for a correctness check.
# ----------------------------------------------------------------------------
def reference_forward(x, params, cfg):
    p = cfg["patch_size"]
    NC = cfg["num_classes"]
    tokens = patchify(x, p)                                          # (B, S, Pp)
    h = _mm(tokens, params["stem_w"]) + params["stem_b"]             # (B, S, D)
    L = params["tw1"].shape[0]
    for l in range(L):
        xn = _layernorm(h, params["n1w"][l], params["n1b"][l])
        xt = jnp.swapaxes(xn, 1, 2)                                  # (B, D, S)
        t = _gelu(_mm(xt, jnp.swapaxes(params["tw1"][l], 0, 1))
                  + params["tb1"][l][:, 0])                          # (B, D, T)
        t = _mm(t, jnp.swapaxes(params["tw2"][l], 0, 1)) + params["tb2"][l][:, 0]
        h = h + jnp.swapaxes(t, 1, 2)
        xn = _layernorm(h, params["n2w"][l], params["n2b"][l])
        c = _gelu(_mm(xn, params["cw1"][l]) + params["cb1"][l])
        c = _mm(c, params["cw2"][l]) + params["cb2"][l]
        h = h + c
    hn = _layernorm(h, params["norm_w"], params["norm_b"])
    pooled = jnp.mean(hn, axis=1)
    logits = _mm(pooled, params["head_w"]) + params["head_b"]
    return logits[:, :NC]


# ----------------------------------------------------------------------------
# Deterministic parameter init (shapes follow MlpMixer.__init__).
# Matmul weights are stored bf16 (MXU operands); biases / LN params fp32.
# ----------------------------------------------------------------------------
def init_params(key, cfg):
    D = cfg["embed_dim"]
    C = cfg["in_chans"]
    p = cfg["patch_size"]
    S = (cfg["img_size"] // p) ** 2
    T = int(cfg["mlp_ratio"][0] * D)
    Cd = int(cfg["mlp_ratio"][1] * D)
    L = cfg["num_blocks"]
    NC = cfg["num_classes"]
    NCp = ((NC + 127) // 128) * 128          # lane-dense padded head width
    P = C * p * p
    Pp = ((P + 127) // 128) * 128            # lane-dense padded patch width

    keys = jax.random.split(key, 2 + L)

    def dense(k, shape):                      # xavier-style deterministic init
        scale = math.sqrt(2.0 / (shape[0] + shape[1]))
        return (scale * jax.random.normal(k, shape, jnp.float32)).astype(jnp.bfloat16)

    def tiny(k, shape):                       # mlp biases: std=1e-6 normal
        return 1e-6 * jax.random.normal(k, shape, jnp.float32)

    stem_w = dense(keys[0], (P, D))
    if Pp != P:                               # zero rows match the zero-padded tokens
        stem_w = jnp.pad(stem_w, ((0, Pp - P), (0, 0)))

    # NOTE: PyTorch zero-fills the head; small random weights exercise the
    # full compute path instead.
    head_w = jnp.pad(dense(keys[1], (D, NC)), ((0, 0), (0, NCp - NC)))

    params = {
        "stem_w": stem_w,                              # conv as matmul (Pp, D)
        "stem_b": jnp.zeros((1, D), jnp.float32),
        "norm_w": jnp.ones((1, D), jnp.float32),
        "norm_b": jnp.zeros((1, D), jnp.float32),
        "head_w": head_w,
        "head_b": jnp.zeros((1, NCp), jnp.float32),
    }

    tw1l, tb1l, tw2l, tb2l = [], [], [], []
    cw1l, cb1l, cw2l, cb2l = [], [], [], []
    for l in range(L):
        kk = jax.random.split(keys[2 + l], 8)
        tw1l.append(dense(kk[0], (T, S)))     # mlp_tokens.fc1.weight (out, in)
        tb1l.append(tiny(kk[1], (T, 1)))
        tw2l.append(dense(kk[2], (S, T)))     # mlp_tokens.fc2.weight
        tb2l.append(tiny(kk[3], (S, 1)))
        cw1l.append(dense(kk[4], (D, Cd)))    # mlp_channels.fc1.weight^T
        cb1l.append(tiny(kk[5], (1, Cd)))
        cw2l.append(dense(kk[6], (Cd, D)))    # mlp_channels.fc2.weight^T
        cb2l.append(tiny(kk[7], (1, D)))

    params.update(
        n1w=jnp.ones((L, 1, D), jnp.float32), n1b=jnp.zeros((L, 1, D), jnp.float32),
        n2w=jnp.ones((L, 1, D), jnp.float32), n2b=jnp.zeros((L, 1, D), jnp.float32),
        tw1=jnp.stack(tw1l), tb1=jnp.stack(tb1l),
        tw2=jnp.stack(tw2l), tb2=jnp.stack(tb2l),
        cw1=jnp.stack(cw1l), cb1=jnp.stack(cb1l),
        cw2=jnp.stack(cw2l), cb2=jnp.stack(cb2l),
    )
    return params


# ----------------------------------------------------------------------------
if __name__ == "__main__":
    cfg = dict(
        num_classes=16,
        img_size=16,
        in_chans=3,
        patch_size=4,          # -> seq_len = (16/4)^2 = 16 patches
        num_blocks=2,
        embed_dim=128,         # lane-dense (multiple of 128)
        mlp_ratio=(0.5, 4.0),  # tokens_dim = 64, channels_dim = 512
    )
    B = 8                      # fills the 8-sublane tiles

    key = jax.random.PRNGKey(0)
    kx, kp = jax.random.split(key)
    x = jax.random.normal(kx, (B, cfg["in_chans"], cfg["img_size"], cfg["img_size"]),
                          jnp.float32)
    params = init_params(kp, cfg)

    fwd = jax.jit(partial(mlp_mixer_forward, cfg=cfg))
    out = jax.block_until_ready(fwd(x, params))

    ref = reference_forward(x, params, cfg)
    assert out.shape == (B, cfg["num_classes"])
    assert bool(jnp.all(jnp.isfinite(out)))
    # bf16 matmul operands (identical rounding points in kernel and reference);
    # remaining differences are f32 accumulation-order noise.
    assert bool(jnp.allclose(out, ref, atol=3e-2, rtol=3e-2)), (
        "mismatch vs reference: max abs err = %f"
        % float(jnp.max(jnp.abs(out - ref))))

    print("KERNEL_OK")
</pallas_src>

<mosaic_0001>
module attributes {stable_mosaic.version = 11 : i64} {
  func.func @stem_kernel(%arg0: i32, %arg1: memref<128x128xbf16, #tpu.memory_space<vmem>>, %arg2: memref<128x128xbf16, #tpu.memory_space<vmem>>, %arg3: memref<1x128xf32, #tpu.memory_space<vmem>>, %arg4: memref<128x128xf32, #tpu.memory_space<vmem>>) attributes {dimension_semantics = [#tpu.dimension_semantics<parallel>], iteration_bounds = array<i64: 1>, scalar_prefetch = 0 : i64, scratch_operands = 0 : i64, tpu.core_type = #tpu.core_type<tc>, window_params = [{transform_indices = @transform_0, window_bounds = array<i64: 128, 128>}, {pipeline_mode = #tpu.pipeline_mode<synchronous>, transform_indices = @transform_1, window_bounds = array<i64: 128, 128>}, {pipeline_mode = #tpu.pipeline_mode<synchronous>, transform_indices = @transform_2, window_bounds = array<i64: 1, 128>}, {transform_indices = @transform_3, window_bounds = array<i64: 128, 128>}]} {
    %c0 = arith.constant 0 : index
    %c0_0 = arith.constant 0 : index
    %0 = vector.load %arg1[%c0, %c0_0] : memref<128x128xbf16, #tpu.memory_space<vmem>>, vector<128x128xbf16>
    %c0_1 = arith.constant 0 : index
    %c0_2 = arith.constant 0 : index
    %1 = vector.load %arg2[%c0_1, %c0_2] : memref<128x128xbf16, #tpu.memory_space<vmem>>, vector<128x128xbf16>
    %cst = arith.constant dense<0.000000e+00> : vector<128x128xf32>
    %2 = tpu.matmul %0, %1, %cst {dimension_numbers = #tpu.dot_dimension_numbers<[1], [0], [0], [1], [0, 0, 1, 1], [], []>} : vector<128x128xbf16>, vector<128x128xbf16>, vector<128x128xf32> -> vector<128x128xf32>
    %c0_3 = arith.constant 0 : index
    %c0_4 = arith.constant 0 : index
    %3 = vector.load %arg3[%c0_3, %c0_4] : memref<1x128xf32, #tpu.memory_space<vmem>>, vector<1x128xf32>
    %4 = vector.broadcast %3 : vector<1x128xf32> to vector<128x128xf32>
    %5 = arith.addf %2, %4 : vector<128x128xf32>
    %c0_5 = arith.constant 0 : index
    %c0_6 = arith.constant 0 : index
    %6 = vector.load %arg4[%c0_5, %c0_6] : memref<128x128xf32, #tpu.memory_space<vmem>>, vector<128x128xf32>
    tpu.vector_store %arg4[%c0_5, %c0_6], %5 {strides = array<i32>} : memref<128x128xf32, #tpu.memory_space<vmem>>, vector<128x128xf32>,
    return
  }
  func.func @transform_0(%arg0: i32) -> (i32, i32) {
    %c0_i32 = arith.constant 0 : i32
    %c0_i32_0 = arith.constant 0 : i32
    return %arg0, %c0_i32 : i32, i32
  }
  func.func @transform_1(%arg0: i32) -> (i32, i32) {
    %c0_i32 = arith.constant 0 : i32
    %c0_i32_0 = arith.constant 0 : i32
    %c0_i32_1 = arith.constant 0 : i32
    return %c0_i32, %c0_i32_0 : i32, i32
  }
  func.func @transform_2(%arg0: i32) -> (i32, i32) {
    %c0_i32 = arith.constant 0 : i32
    %c0_i32_0 = arith.constant 0 : i32
    %c0_i32_1 = arith.constant 0 : i32
    return %c0_i32, %c0_i32_0 : i32, i32
  }
  func.func @transform_3(%arg0: i32) -> (i32, i32) {
    %c0_i32 = arith.constant 0 : i32
    %c0_i32_0 = arith.constant 0 : i32
    return %arg0, %c0_i32 : i32, i32
  }
}

module attributes {stable_mosaic.version = 11 : i64} {
  func.func @mixer_stack_kernel(%arg0: i32, %arg1: i32, %arg2: memref<128x128xf32, #tpu.memory_space<vmem>>, %arg3: memref<1x1x128xf32, #tpu.memory_space<vmem>>, %arg4: memref<1x1x128xf32, #tpu.memory_space<vmem>>, %arg5: memref<1x64x16xbf16, #tpu.memory_space<vmem>>, %arg6: memref<1x64x1xf32, #tpu.memory_space<vmem>>, %arg7: memref<1x16x64xbf16, #tpu.memory_space<vmem>>, %arg8: memref<1x16x1xf32, #tpu.memory_space<vmem>>, %arg9: memref<1x1x128xf32, #tpu.memory_space<vmem>>, %arg10: memref<1x1x128xf32, #tpu.memory_space<vmem>>, %arg11: memref<1x128x512xbf16, #tpu.memory_space<vmem>>, %arg12: memref<1x1x512xf32, #tpu.memory_space<vmem>>, %arg13: memref<1x512x128xbf16, #tpu.memory_space<vmem>>, %arg14: memref<1x1x128xf32, #tpu.memory_space<vmem>>, %arg15: memref<1x128xf32, #tpu.memory_space<vmem>>, %arg16: memref<1x128xf32, #tpu.memory_space<vmem>>, %arg17: memref<128x128xbf16, #tpu.memory_space<vmem>>, %arg18: memref<1x128xf32, #tpu.memory_space<vmem>>, %arg19: memref<1x8x128xf32, #tpu.memory_space<vmem>>, %arg20: memref<128x128xf32, #tpu.memory_space<vmem>>) attributes {dimension_semantics = [#tpu.dimension_semantics<parallel>, #tpu.dimension_semantics<arbitrary>], iteration_bounds = array<i64: 1, 2>, scalar_prefetch = 0 : i64, scratch_operands = 1 : i64, tpu.core_type = #tpu.core_type<tc>, window_params = [{transform_indices = @transform_0, window_bounds = array<i64: 128, 128>}, {transform_indices = @transform_1, window_bounds = array<i64: 1, 1, 128>}, {transform_indices = @transform_2, window_bounds = array<i64: 1, 1, 128>}, {transform_indices = @transform_3, window_bounds = array<i64: 1, 64, 16>}, {transform_indices = @transform_4, window_bounds = array<i64: 1, 64, 1>}, {transform_indices = @transform_5, window_bounds = array<i64: 1, 16, 64>}, {transform_indices = @transform_6, window_bounds = array<i64: 1, 16, 1>}, {transform_indices = @transform_7, window_bounds = array<i64: 1, 1, 128>}, {transform_indices = @transform_8, window_bounds = array<i64: 1, 1, 128>}, {transform_indices = @transform_9, window_bounds = array<i64: 1, 128, 512>}, {transform_indices = @transform_10, window_bounds = array<i64: 1, 1, 512>}, {transform_indices = @transform_11, window_bounds = array<i64: 1, 512, 128>}, {transform_indices = @transform_12, window_bounds = array<i64: 1, 1, 128>}, {pipeline_mode = #tpu.pipeline_mode<synchronous>, transform_indices = @transform_13, window_bounds = array<i64: 1, 128>}, {pipeline_mode = #tpu.pipeline_mode<synchronous>, transform_indices = @transform_14, window_bounds = array<i64: 1, 128>}, {pipeline_mode = #tpu.pipeline_mode<synchronous>, transform_indices = @transform_15, window_bounds = array<i64: 128, 128>}, {pipeline_mode = #tpu.pipeline_mode<synchronous>, transform_indices = @transform_16, window_bounds = array<i64: 1, 128>}, {transform_indices = @transform_17, window_bounds = array<i64: 1, 8, 128>}]} {
    %c0_i32 = arith.constant 0 : i32
    %0 = arith.cmpi eq, %arg1, %c0_i32 : i32
    %1 = arith.extui %0 : i1 to i32
    %c0_i32_0 = arith.constant 0 : i32
    %2 = arith.cmpi ne, %1, %c0_i32_0 : i32
    scf.if %2 {
      %c0_60 = arith.constant 0 : index
      %c0_61 = arith.constant 0 : index
      %126 = vector.load %arg2[%c0_60, %c0_61] : memref<128x128xf32, #tpu.memory_space<vmem>>, vector<128x128xf32>
      %c0_62 = arith.constant 0 : index
      %c0_63 = arith.constant 0 : index
      %127 = vector.load %arg20[%c0_62, %c0_63] : memref<128x128xf32, #tpu.memory_space<vmem>>, vector<128x128xf32>
      tpu.vector_store %arg20[%c0_62, %c0_63], %126 {strides = array<i32>} : memref<128x128xf32, #tpu.memory_space<vmem>>, vector<128x128xf32>,
    } else {
    }
    %c0 = arith.constant 0 : index
    %c0_1 = arith.constant 0 : index
    %3 = vector.load %arg20[%c0, %c0_1] : memref<128x128xf32, #tpu.memory_space<vmem>>, vector<128x128xf32>
    %c0_2 = arith.constant 0 : index
    %c0_3 = arith.constant 0 : index
    %c0_4 = arith.constant 0 : index
    %4 = vector.load %arg3[%c0_2, %c0_3, %c0_4] : memref<1x1x128xf32, #tpu.memory_space<vmem>>, vector<1x1x128xf32>
    %5 = vector.shape_cast %4 : vector<1x1x128xf32> to vector<1x128xf32>
    %c0_5 = arith.constant 0 : index
    %c0_6 = arith.constant 0 : index
    %c0_7 = arith.constant 0 : index
    %6 = vector.load %arg4[%c0_5, %c0_6, %c0_7] : memref<1x1x128xf32, #tpu.memory_space<vmem>>, vector<1x1x128xf32>
    %7 = vector.shape_cast %6 : vector<1x1x128xf32> to vector<1x128xf32>
    %cst = arith.constant dense<0.000000e+00> : vector<128xf32>
    %8 = vector.multi_reduction <add>, %3, %cst [1] : vector<128x128xf32> to vector<128xf32>
    %9 = vector.shape_cast %8 : vector<128xf32> to vector<128x1xf32>
    %cst_8 = arith.constant 1.280000e+02 : f32
    %10 = vector.broadcast %cst_8 : f32 to vector<128x1xf32>
    %11 = arith.divf %9, %10 : vector<128x1xf32>
    %12 = vector.broadcast %11 : vector<128x1xf32> to vector<128x128xf32>
    %13 = arith.subf %3, %12 : vector<128x128xf32>
    %14 = arith.mulf %13, %13 : vector<128x128xf32>
    %cst_9 = arith.constant dense<0.000000e+00> : vector<128xf32>
    %15 = vector.multi_reduction <add>, %14, %cst_9 [1] : vector<128x128xf32> to vector<128xf32>
    %16 = vector.shape_cast %15 : vector<128xf32> to vector<128x1xf32>
    %cst_10 = arith.constant 1.280000e+02 : f32
    %17 = vector.broadcast %cst_10 : f32 to vector<128x1xf32>
    %18 = arith.divf %16, %17 : vector<128x1xf32>
    %cst_11 = arith.constant 9.99999997E-7 : f32
    %19 = vector.broadcast %cst_11 : f32 to vector<128x1xf32>
    %20 = arith.addf %18, %19 : vector<128x1xf32>
    %21 = math.rsqrt %20 : vector<128x1xf32>
    %22 = vector.broadcast %21 : vector<128x1xf32> to vector<128x128xf32>
    %23 = arith.mulf %13, %22 : vector<128x128xf32>
    %24 = vector.broadcast %5 : vector<1x128xf32> to vector<128x128xf32>
    %25 = arith.mulf %23, %24 : vector<128x128xf32>
    %26 = vector.broadcast %7 : vector<1x128xf32> to vector<128x128xf32>
    %27 = arith.addf %25, %26 : vector<128x128xf32>
    %28 = arith.truncf %27 : vector<128x128xf32> to vector<128x128xbf16>
    %29 = vector.extract_strided_slice %28 {offsets = [0, 0], sizes = [16, 128], strides = [1, 1]} : vector<128x128xbf16> to vector<16x128xbf16>
    %30 = vector.extract_strided_slice %28 {offsets = [16, 0], sizes = [16, 128], strides = [1, 1]} : vector<128x128xbf16> to vector<16x128xbf16>
    %31 = vector.extract_strided_slice %28 {offsets = [32, 0], sizes = [16, 128], strides = [1, 1]} : vector<128x128xbf16> to vector<16x128xbf16>
    %32 = vector.extract_strided_slice %28 {offsets = [48, 0], sizes = [16, 128], strides = [1, 1]} : vector<128x128xbf16> to vector<16x128xbf16>
    %33 = vector.extract_strided_slice %28 {offsets = [64, 0], sizes = [16, 128], strides = [1, 1]} : vector<128x128xbf16> to vector<16x128xbf16>
    %34 = vector.extract_strided_slice %28 {offsets = [80, 0], sizes = [16, 128], strides = [1, 1]} : vector<128x128xbf16> to vector<16x128xbf16>
    %35 = vector.extract_strided_slice %28 {offsets = [96, 0], sizes = [16, 128], strides = [1, 1]} : vector<128x128xbf16> to vector<16x128xbf16>
    %36 = vector.extract_strided_slice %28 {offsets = [112, 0], sizes = [16, 128], strides = [1, 1]} : vector<128x128xbf16> to vector<16x128xbf16>
    %37 = tpu.concatenate %29, %30, %31, %32, %33, %34, %35, %36 in 1 : vector<16x128xbf16>, vector<16x128xbf16>, vector<16x128xbf16>, vector<16x128xbf16>, vector<16x128xbf16>, vector<16x128xbf16>, vector<16x128xbf16>, vector<16x128xbf16> -> vector<16x1024xbf16>
    %c0_12 = arith.constant 0 : index
    %c0_13 = arith.constant 0 : index
    %c0_14 = arith.constant 0 : index
    %38 = vector.load %arg5[%c0_12, %c0_13, %c0_14] : memref<1x64x16xbf16, #tpu.memory_space<vmem>>, vector<1x64x16xbf16>
    %39 = vector.shape_cast %38 : vector<1x64x16xbf16> to vector<64x16xbf16>
    %cst_15 = arith.constant dense<0.000000e+00> : vector<64x1024xf32>
    %40 = tpu.matmul %39, %37, %cst_15 {dimension_numbers = #tpu.dot_dimension_numbers<[1], [0], [0], [1], [0, 0, 1, 1], [], []>} : vector<64x16xbf16>, vector<16x1024xbf16>, vector<64x1024xf32> -> vector<64x1024xf32>
    %c0_16 = arith.constant 0 : index
    %c0_17 = arith.constant 0 : index
    %c0_18 = arith.constant 0 : index
    %41 = vector.load %arg6[%c0_16, %c0_17, %c0_18] : memref<1x64x1xf32, #tpu.memory_space<vmem>>, vector<1x64x1xf32>
    %42 = vector.shape_cast %41 : vector<1x64x1xf32> to vector<64x1xf32>
    %43 = vector.broadcast %42 : vector<64x1xf32> to vector<64x1024xf32>
    %44 = arith.addf %40, %43 : vector<64x1024xf32>
    %cst_19 = arith.constant 5.000000e-01 : f32
    %45 = vector.broadcast %cst_19 : f32 to vector<64x1024xf32>
    %46 = arith.mulf %45, %44 : vector<64x1024xf32>
    %cst_20 = arith.constant 0.707106769 : f32
    %47 = vector.broadcast %cst_20 : f32 to vector<64x1024xf32>
    %48 = arith.mulf %44, %47 : vector<64x1024xf32>
    %49 = math.erf %48 : vector<64x1024xf32>
    %cst_21 = arith.constant 1.000000e+00 : f32
    %50 = vector.broadcast %cst_21 : f32 to vector<64x1024xf32>
    %51 = arith.addf %50, %49 : vector<64x1024xf32>
    %52 = arith.mulf %46, %51 : vector<64x1024xf32>
    %53 = arith.truncf %52 : vector<64x1024xf32> to vector<64x1024xbf16>
    %c0_22 = arith.constant 0 : index
    %c0_23 = arith.constant 0 : index
    %c0_24 = arith.constant 0 : index
    %54 = vector.load %arg7[%c0_22, %c0_23, %c0_24] : memref<1x16x64xbf16, #tpu.memory_space<vmem>>, vector<1x16x64xbf16>
    %55 = vector.shape_cast %54 : vector<1x16x64xbf16> to vector<16x64xbf16>
    %cst_25 = arith.constant dense<0.000000e+00> : vector<16x1024xf32>
    %56 = tpu.matmul %55, %53, %cst_25 {dimension_numbers = #tpu.dot_dimension_numbers<[1], [0], [0], [1], [0, 0, 1, 1], [], []>} : vector<16x64xbf16>, vector<64x1024xbf16>, vector<16x1024xf32> -> vector<16x1024xf32>
    %c0_26 = arith.constant 0 : index
    %c0_27 = arith.constant 0 : index
    %c0_28 = arith.constant 0 : index
    %57 = vector.load %arg8[%c0_26, %c0_27, %c0_28] : memref<1x16x1xf32, #tpu.memory_space<vmem>>, vector<1x16x1xf32>
    %58 = vector.shape_cast %57 : vector<1x16x1xf32> to vector<16x1xf32>
    %59 = vector.broadcast %58 : vector<16x1xf32> to vector<16x1024xf32>
    %60 = arith.addf %56, %59 : vector<16x1024xf32>
    %61 = vector.extract_strided_slice %60 {offsets = [0, 0], sizes = [16, 128], strides = [1, 1]} : vector<16x1024xf32> to vector<16x128xf32>
    %62 = vector.extract_strided_slice %60 {offsets = [0, 128], sizes = [16, 128], strides = [1, 1]} : vector<16x1024xf32> to vector<16x128xf32>
    %63 = vector.extract_strided_slice %60 {offsets = [0, 256], sizes = [16, 128], strides = [1, 1]} : vector<16x1024xf32> to vector<16x128xf32>
    %64 = vector.extract_strided_slice %60 {offsets = [0, 384], sizes = [16, 128], strides = [1, 1]} : vector<16x1024xf32> to vector<16x128xf32>
    %65 = vector.extract_strided_slice %60 {offsets = [0, 512], sizes = [16, 128], strides = [1, 1]} : vector<16x1024xf32> to vector<16x128xf32>
    %66 = vector.extract_strided_slice %60 {offsets = [0, 640], sizes = [16, 128], strides = [1, 1]} : vector<16x1024xf32> to vector<16x128xf32>
    %67 = vector.extract_strided_slice %60 {offsets = [0, 768], sizes = [16, 128], strides = [1, 1]} : vector<16x1024xf32> to vector<16x128xf32>
    %68 = vector.extract_strided_slice %60 {offsets = [0, 896], sizes = [16, 128], strides = [1, 1]} : vector<16x1024xf32> to vector<16x128xf32>
    %69 = tpu.concatenate %61, %62, %63, %64, %65, %66, %67, %68 in 0 : vector<16x128xf32>, vector<16x128xf32>, vector<16x128xf32>, vector<16x128xf32>, vector<16x128xf32>, vector<16x128xf32>, vector<16x128xf32>, vector<16x128xf32> -> vector<128x128xf32>
    %70 = arith.addf %3, %69 : vector<128x128xf32>
    %c0_29 = arith.constant 0 : index
    %c0_30 = arith.constant 0 : index
    %c0_31 = arith.constant 0 : index
    %71 = vector.load %arg9[%c0_29, %c0_30, %c0_31] : memref<1x1x128xf32, #tpu.memory_space<vmem>>, vector<1x1x128xf32>
    %72 = vector.shape_cast %71 : vector<1x1x128xf32> to vector<1x128xf32>
    %c0_32 = arith.constant 0 : index
    %c0_33 = arith.constant 0 : index
    %c0_34 = arith.constant 0 : index
    %73 = vector.load %arg10[%c0_32, %c0_33, %c0_34] : memref<1x1x128xf32, #tpu.memory_space<vmem>>, vector<1x1x128xf32>
    %74 = vector.shape_cast %73 : vector<1x1x128xf32> to vector<1x128xf32>
    %cst_35 = arith.constant dense<0.000000e+00> : vector<128xf32>
    %75 = vector.multi_reduction <add>, %70, %cst_35 [1] : vector<128x128xf32> to vector<128xf32>
    %76 = vector.shape_cast %75 : vector<128xf32> to vector<128x1xf32>
    %cst_36 = arith.constant 1.280000e+02 : f32
    %77 = vector.broadcast %cst_36 : f32 to vector<128x1xf32>
    %78 = arith.divf %76, %77 : vector<128x1xf32>
    %79 = vector.broadcast %78 : vector<128x1xf32> to vector<128x128xf32>
    %80 = arith.subf %70, %79 : vector<128x128xf32>
    %81 = arith.mulf %80, %80 : vector<128x128xf32>
    %cst_37 = arith.constant dense<0.000000e+00> : vector<128xf32>
    %82 = vector.multi_reduction <add>, %81, %cst_37 [1] : vector<128x128xf32> to vector<128xf32>
    %83 = vector.shape_cast %82 : vector<128xf32> to vector<128x1xf32>
    %cst_38 = arith.constant 1.280000e+02 : f32
    %84 = vector.broadcast %cst_38 : f32 to vector<128x1xf32>
    %85 = arith.divf %83, %84 : vector<128x1xf32>
    %cst_39 = arith.constant 9.99999997E-7 : f32
    %86 = vector.broadcast %cst_39 : f32 to vector<128x1xf32>
    %87 = arith.addf %85, %86 : vector<128x1xf32>
    %88 = math.rsqrt %87 : vector<128x1xf32>
    %89 = vector.broadcast %88 : vector<128x1xf32> to vector<128x128xf32>
    %90 = arith.mulf %80, %89 : vector<128x128xf32>
    %91 = vector.broadcast %72 : vector<1x128xf32> to vector<128x128xf32>
    %92 = arith.mulf %90, %91 : vector<128x128xf32>
    %93 = vector.broadcast %74 : vector<1x128xf32> to vector<128x128xf32>
    %94 = arith.addf %92, %93 : vector<128x128xf32>
    %95 = arith.truncf %94 : vector<128x128xf32> to vector<128x128xbf16>
    %c0_40 = arith.constant 0 : index
    %c0_41 = arith.constant 0 : index
    %c0_42 = arith.constant 0 : index
    %96 = vector.load %arg11[%c0_40, %c0_41, %c0_42] : memref<1x128x512xbf16, #tpu.memory_space<vmem>>, vector<1x128x512xbf16>
    %97 = vector.shape_cast %96 : vector<1x128x512xbf16> to vector<128x512xbf16>
    %cst_43 = arith.constant dense<0.000000e+00> : vector<128x512xf32>
    %98 = tpu.matmul %95, %97, %cst_43 {dimension_numbers = #tpu.dot_dimension_numbers<[1], [0], [0], [1], [0, 0, 1, 1], [], []>} : vector<128x128xbf16>, vector<128x512xbf16>, vector<128x512xf32> -> vector<128x512xf32>
    %c0_44 = arith.constant 0 : index
    %c0_45 = arith.constant 0 : index
    %c0_46 = arith.constant 0 : index
    %99 = vector.load %arg12[%c0_44, %c0_45, %c0_46] : memref<1x1x512xf32, #tpu.memory_space<vmem>>, vector<1x1x512xf32>
    %100 = vector.shape_cast %99 : vector<1x1x512xf32> to vector<1x512xf32>
    %101 = vector.broadcast %100 : vector<1x512xf32> to vector<128x512xf32>
    %102 = arith.addf %98, %101 : vector<128x512xf32>
    %cst_47 = arith.constant 5.000000e-01 : f32
    %103 = vector.broadcast %cst_47 : f32 to vector<128x512xf32>
    %104 = arith.mulf %103, %102 : vector<128x512xf32>
    %cst_48 = arith.constant 0.707106769 : f32
    %105 = vector.broadcast %cst_48 : f32 to vector<128x512xf32>
    %106 = arith.mulf %102, %105 : vector<128x512xf32>
    %107 = math.erf %106 : vector<128x512xf32>
    %cst_49 = arith.constant 1.000000e+00 : f32
    %108 = vector.broadcast %cst_49 : f32 to vector<128x512xf32>
    %109 = arith.addf %108, %107 : vector<128x512xf32>
    %110 = arith.mulf %104, %109 : vector<128x512xf32>
    %111 = arith.truncf %110 : vector<128x512xf32> to vector<128x512xbf16>
    %c0_50 = arith.constant 0 : index
    %c0_51 = arith.constant 0 : index
    %c0_52 = arith.constant 0 : index
    %112 = vector.load %arg13[%c0_50, %c0_51, %c0_52] : memref<1x512x128xbf16, #tpu.memory_space<vmem>>, vector<1x512x128xbf16>
    %113 = vector.shape_cast %112 : vector<1x512x128xbf16> to vector<512x128xbf16>
    %cst_53 = arith.constant dense<0.000000e+00> : vector<128x128xf32>
    %114 = tpu.matmul %111, %113, %cst_53 {dimension_numbers = #tpu.dot_dimension_numbers<[1], [0], [0], [1], [0, 0, 1, 1], [], []>} : vector<128x512xbf16>, vector<512x128xbf16>, vector<128x128xf32> -> vector<128x128xf32>
    %115 = arith.addf %70, %114 : vector<128x128xf32>
    %c0_54 = arith.constant 0 : index
    %c0_55 = arith.constant 0 : index
    %c0_56 = arith.constant 0 : index
    %116 = vector.load %arg14[%c0_54, %c0_55, %c0_56] : memref<1x1x128xf32, #tpu.memory_space<vmem>>, vector<1x1x128xf32>
    %117 = vector.shape_cast %116 : vector<1x1x128xf32> to vector<1x128xf32>
    %118 = vector.broadcast %117 : vector<1x128xf32> to vector<128x128xf32>
    %119 = arith.addf %115, %118 : vector<128x128xf32>
    %c1_i32 = arith.constant 1 : i32
    %120 = arith.cmpi slt, %arg1, %c1_i32 : i32
    %121 = arith.extui %120 : i1 to i32
    %c0_i32_57 = arith.constant 0 : i32
    %122 = arith.cmpi ne, %121, %c0_i32_57 : i32
    scf.if %122 {
      %c0_60 = arith.constant 0 : index
      %c0_61 = arith.constant 0 : index
      %126 = vector.load %arg20[%c0_60, %c0_61] : memref<128x128xf32, #tpu.memory_space<vmem>>, vector<128x128xf32>
      tpu.vector_store %arg20[%c0_60, %c0_61], %119 {strides = array<i32>} : memref<128x128xf32, #tpu.memory_space<vmem>>, vector<128x128xf32>,
    } else {
    }
    %c1_i32_58 = arith.constant 1 : i32
    %123 = arith.cmpi eq, %arg1, %c1_i32_58 : i32
    %124 = arith.extui %123 : i1 to i32
    %c0_i32_59 = arith.constant 0 : i32
    %125 = arith.cmpi ne, %124, %c0_i32_59 : i32
    scf.if %125 {
      %c0_60 = arith.constant 0 : index
      %c0_61 = arith.constant 0 : index
      %126 = vector.load %arg15[%c0_60, %c0_61] : memref<1x128xf32, #tpu.memory_space<vmem>>, vector<1x128xf32>
      %c0_62 = arith.constant 0 : index
      %c0_63 = arith.constant 0 : index
      %127 = vector.load %arg16[%c0_62, %c0_63] : memref<1x128xf32, #tpu.memory_space<vmem>>, vector<1x128xf32>
      %cst_64 = arith.constant dense<0.000000e+00> : vector<128xf32>
      %128 = vector.multi_reduction <add>, %119, %cst_64 [1] : vector<128x128xf32> to vector<128xf32>
      %129 = vector.shape_cast %128 : vector<128xf32> to vector<128x1xf32>
      %cst_65 = arith.constant 1.280000e+02 : f32
      %130 = vector.broadcast %cst_65 : f32 to vector<128x1xf32>
      %131 = arith.divf %129, %130 : vector<128x1xf32>
      %132 = vector.broadcast %131 : vector<128x1xf32> to vector<128x128xf32>
      %133 = arith.subf %119, %132 : vector<128x128xf32>
      %134 = arith.mulf %133, %133 : vector<128x128xf32>
      %cst_66 = arith.constant dense<0.000000e+00> : vector<128xf32>
      %135 = vector.multi_reduction <add>, %134, %cst_66 [1] : vector<128x128xf32> to vector<128xf32>
      %136 = vector.shape_cast %135 : vector<128xf32> to vector<128x1xf32>
      %cst_67 = arith.constant 1.280000e+02 : f32
      %137 = vector.broadcast %cst_67 : f32 to vector<128x1xf32>
      %138 = arith.divf %136, %137 : vector<128x1xf32>
      %cst_68 = arith.constant 9.99999997E-7 : f32
      %139 = vector.broadcast %cst_68 : f32 to vector<128x1xf32>
      %140 = arith.addf %138, %139 : vector<128x1xf32>
      %141 = math.rsqrt %140 : vector<128x1xf32>
      %142 = vector.broadcast %141 : vector<128x1xf32> to vector<128x128xf32>
      %143 = arith.mulf %133, %142 : vector<128x128xf32>
      %144 = vector.broadcast %126 : vector<1x128xf32> to vector<128x128xf32>
      %145 = arith.mulf %143, %144 : vector<128x128xf32>
      %146 = vector.broadcast %127 : vector<1x128xf32> to vector<128x128xf32>
      %147 = arith.addf %145, %146 : vector<128x128xf32>
      %148 = vector.shape_cast %147 : vector<128x128xf32> to vector<8x16x128xf32>
      %cst_69 = arith.constant dense<0.000000e+00> : vector<8x128xf32>
      %149 = vector.multi_reduction <add>, %148, %cst_69 [1] : vector<8x16x128xf32> to vector<8x128xf32>
      %cst_70 = arith.constant 1.600000e+01 : f32
      %150 = vector.broadcast %cst_70 : f32 to vector<8x128xf32>
      %151 = arith.divf %149, %150 : vector<8x128xf32>
      %152 = arith.truncf %151 : vector<8x128xf32> to vector<8x128xbf16>
      %c0_71 = arith.constant 0 : index
      %c0_72 = arith.constant 0 : index
      %153 = vector.load %arg17[%c0_71, %c0_72] : memref<128x128xbf16, #tpu.memory_space<vmem>>, vector<128x128xbf16>
      %cst_73 = arith.constant dense<0.000000e+00> : vector<8x128xf32>
      %154 = tpu.matmul %152, %153, %cst_73 {dimension_numbers = #tpu.dot_dimension_numbers<[1], [0], [0], [1], [0, 0, 1, 1], [], []>} : vector<8x128xbf16>, vector<128x128xbf16>, vector<8x128xf32> -> vector<8x128xf32>
      %c0_74 = arith.constant 0 : index
      %c0_75 = arith.constant 0 : index
      %155 = vector.load %arg18[%c0_74, %c0_75] : memref<1x128xf32, #tpu.memory_space<vmem>>, vector<1x128xf32>
      %156 = vector.broadcast %155 : vector<1x128xf32> to vector<8x128xf32>
      %157 = arith.addf %154, %156 : vector<8x128xf32>
      %c0_76 = arith.constant 0 : index
      %c0_77 = arith.constant 0 : index
      %c0_78 = arith.constant 0 : index
      %158 = vector.load %arg19[%c0_76, %c0_77, %c0_78] : memref<1x8x128xf32, #tpu.memory_space<vmem>>, vector<1x8x128xf32>
      %159 = vector.shape_cast %158 : vector<1x8x128xf32> to vector<8x128xf32>
      %160 = vector.shape_cast %157 : vector<8x128xf32> to vector<1x8x128xf32>
      tpu.vector_store %arg19[%c0_76, %c0_77, %c0_78], %160 {strides = array<i32>} : memref<1x8x128xf32, #tpu.memory_space<vmem>>, vector<1x8x128xf32>,
    } else {
    }
    return
  }
  func.func @transform_0(%arg0: i32, %arg1: i32) -> (i32, i32) {
    %c0_i32 = arith.constant 0 : i32
    %c0_i32_0 = arith.constant 0 : i32
    return %arg0, %c0_i32 : i32, i32
  }
  func.func @transform_1(%arg0: i32, %arg1: i32) -> (i32, i32, i32) {
    %c0_i32 = arith.constant 0 : i32
    %c0_i32_0 = arith.constant 0 : i32
    %c0_i32_1 = arith.constant 0 : i32
    return %arg1, %c0_i32, %c0_i32_0 : i32, i32, i32
  }
  func.func @transform_2(%arg0: i32, %arg1: i32) -> (i32, i32, i32) {
    %c0_i32 = arith.constant 0 : i32
    %c0_i32_0 = arith.constant 0 : i32
    %c0_i32_1 = arith.constant 0 : i32
    return %arg1, %c0_i32, %c0_i32_0 : i32, i32, i32
  }
  func.func @transform_3(%arg0: i32, %arg1: i32) -> (i32, i32, i32) {
    %c0_i32 = arith.constant 0 : i32
    %c0_i32_0 = arith.constant 0 : i32
    %c0_i32_1 = arith.constant 0 : i32
    return %arg1, %c0_i32, %c0_i32_0 : i32, i32, i32
  }
  func.func @transform_4(%arg0: i32, %arg1: i32) -> (i32, i32, i32) {
    %c0_i32 = arith.constant 0 : i32
    %c0_i32_0 = arith.constant 0 : i32
    %c0_i32_1 = arith.constant 0 : i32
    return %arg1, %c0_i32, %c0_i32_0 : i32, i32, i32
  }
  func.func @transform_5(%arg0: i32, %arg1: i32) -> (i32, i32, i32) {
    %c0_i32 = arith.constant 0 : i32
    %c0_i32_0 = arith.constant 0 : i32
    %c0_i32_1 = arith.constant 0 : i32
    return %arg1, %c0_i32, %c0_i32_0 : i32, i32, i32
  }
  func.func @transform_6(%arg0: i32, %arg1: i32) -> (i32, i32, i32) {
    %c0_i32 = arith.constant 0 : i32
    %c0_i32_0 = arith.constant 0 : i32
    %c0_i32_1 = arith.constant 0 : i32
    return %arg1, %c0_i32, %c0_i32_0 : i32, i32, i32
  }
  func.func @transform_7(%arg0: i32, %arg1: i32) -> (i32, i32, i32) {
    %c0_i32 = arith.constant 0 : i32
    %c0_i32_0 = arith.constant 0 : i32
    %c0_i32_1 = arith.constant 0 : i32
    return %arg1, %c0_i32, %c0_i32_0 : i32, i32, i32
  }
  func.func @transform_8(%arg0: i32, %arg1: i32) -> (i32, i32, i32) {
    %c0_i32 = arith.constant 0 : i32
    %c0_i32_0 = arith.constant 0 : i32
    %c0_i32_1 = arith.constant 0 : i32
    return %arg1, %c0_i32, %c0_i32_0 : i32, i32, i32
  }
  func.func @transform_9(%arg0: i32, %arg1: i32) -> (i32, i32, i32) {
    %c0_i32 = arith.constant 0 : i32
    %c0_i32_0 = arith.constant 0 : i32
    %c0_i32_1 = arith.constant 0 : i32
    return %arg1, %c0_i32, %c0_i32_0 : i32, i32, i32
  }
  func.func @transform_10(%arg0: i32, %arg1: i32) -> (i32, i32, i32) {
    %c0_i32 = arith.constant 0 : i32
    %c0_i32_0 = arith.constant 0 : i32
    %c0_i32_1 = arith.constant 0 : i32
    return %arg1, %c0_i32, %c0_i32_0 : i32, i32, i32
  }
  func.func @transform_11(%arg0: i32, %arg1: i32) -> (i32, i32, i32) {
    %c0_i32 = arith.constant 0 : i32
    %c0_i32_0 = arith.constant 0 : i32
    %c0_i32_1 = arith.constant 0 : i32
    return %arg1, %c0_i32, %c0_i32_0 : i32, i32, i32
  }
  func.func @transform_12(%arg0: i32, %arg1: i32) -> (i32, i32, i32) {
    %c0_i32 = arith.constant 0 : i32
    %c0_i32_0 = arith.constant 0 : i32
    %c0_i32_1 = arith.constant 0 : i32
    return %arg1, %c0_i32, %c0_i32_0 : i32, i32, i32
  }
  func.func @transform_13(%arg0: i32, %arg1: i32) -> (i32, i32) {
    %c0_i32 = arith.constant 0 : i32
    %c0_i32_0 = arith.constant 0 : i32
    %c0_i32_1 = arith.constant 0 : i32
    return %c0_i32, %c0_i32_0 : i32, i32
  }
  func.func @transform_14(%arg0: i32, %arg1: i32) -> (i32, i32) {
    %c0_i32 = arith.constant 0 : i32
    %c0_i32_0 = arith.constant 0 : i32
    %c0_i32_1 = arith.constant 0 : i32
    return %c0_i32, %c0_i32_0 : i32, i32
  }
  func.func @transform_15(%arg0: i32, %arg1: i32) -> (i32, i32) {
    %c0_i32 = arith.constant 0 : i32
    %c0_i32_0 = arith.constant 0 : i32
    %c0_i32_1 = arith.constant 0 : i32
    return %c0_i32, %c0_i32_0 : i32, i32
  }
  func.func @transform_16(%arg0: i32, %arg1: i32) -> (i32, i32) {
    %c0_i32 = arith.constant 0 : i32
    %c0_i32_0 = arith.constant 0 : i32
    %c0_i32_1 = arith.constant 0 : i32
    return %c0_i32, %c0_i32_0 : i32, i32
  }
  func.func @transform_17(%arg0: i32, %arg1: i32) -> (i32, i32, i32) {
    %c0_i32 = arith.constant 0 : i32
    %c0_i32_0 = arith.constant 0 : i32
    %c0_i32_1 = arith.constant 0 : i32
    return %arg0, %c0_i32, %c0_i32_0 : i32, i32, i32
  }
}

</mosaic_0001>

<bundles_post_ra>
// kernel: mlp_mixer_forward.2
= control target key start
LH: loop header
LB: loop body
LE: loop exit
PB: predicated region body
PF: predicated region fallthrough
CT: control target
= control target key end

     0   :  { %s483_s1 = inlined_call_operand.vmem [shape: bf16[128,128], index: 1, kind: input, shape index: {}]   ;;  %s484_s0 = inlined_call_operand.vmem [shape: bf16[128,128], index: 0, kind: input, shape index: {}]   ;;  %s485_s2 = inlined_call_operand.vmem [shape: f32[1,128], index: 2, kind: input, shape index: {}]   ;;  %s486_s3 = inlined_call_operand.vmem [shape: f32[128,128], index: 3, kind: output, shape index: {}]  }
   0x1   :  { %v348_v0 = vld [vmem:[%s483_s1 + $0x38] sm:$0xff]   ;;  %v349_v1 = vld [vmem:[%s483_s1 + $0x30] sm:$0xff]   ;;  %v350_v2 = vld [vmem:[%s483_s1 + $0x28] sm:$0xff]  }
   0x2   :  { %300 = vmatprep.subr.bf16.mxu0 %v348_v0  ;;  %332 = vmatprep.subr.bf16.mxu1 %v348_v0  ;;  %v351_v3 = vld [vmem:[%s483_s1 + $0x20] sm:$0xff]   ;;  %v352_v6 = vld [vmem:[%s483_s1 + $0x18] sm:$0xff]   ;;  %v353_v7 = vld [vmem:[%s483_s1 + $0x10] sm:$0xff]  }
   0x3   :  { %301 = vmatpush3.bf16.msra.mxu0 %v348_v0  ;;  %340 = vmatpush3.bf16.msra.mxu1 %v348_v0  ;;  %v356_v4 = vld [vmem:[%s484_s0] sm:$0xff]   ;;  %v354_v8 = vld [vmem:[%s483_s1 + $0x8] sm:$0xff]   ;;  %v360_v12 = vld [vmem:[%s484_s0 + $0x10] sm:$0xff]  }
   0x4   :  { %302 = vmatprep.subr.bf16.mxu0 %v349_v1  ;;  %333 = vmatprep.subr.bf16.mxu1 %v349_v1  ;;  %v357_v5 = vld [vmem:[%s484_s0 + $0x20] sm:$0xff]   ;;  %v358_v10 = vld [vmem:[%s484_s0 + $0x8] sm:$0xff]   ;;  %v361_v13 = vld [vmem:[%s484_s0 + $0x30] sm:$0xff]  }
   0x5   :  { %316 = vmatprep.mubr.bf16.mxu0 %v356_v4  ;;  %324 = vmatprep.mubr.bf16.mxu1 %v357_v5  ;;  %v355_v9 = vld [vmem:[%s483_s1] sm:$0xff]   ;;  %v359_v11 = vld [vmem:[%s484_s0 + $0x28] sm:$0xff]   ;;  %v362_v14 = vld [vmem:[%s484_s0 + $0x18] sm:$0xff]  }
   0x6   :  { %v363_v15 = vld [vmem:[%s484_s0 + $0x38] sm:$0xff]   ;;  %v267_v16 = vld [vmem:[%s485_s2] ss:$0 sm:$0xff] }
   0x7   :  { %303 = vmatpush3.bf16.msra.mxu0 %v349_v1  ;;  %341 = vmatpush3.bf16.msra.mxu1 %v349_v1 }
   0x8   :  { %304 = vmatprep.subr.bf16.mxu0 %v350_v2  ;;  %334 = vmatprep.subr.bf16.mxu1 %v350_v2 }
   0xb   :  { %305 = vmatpush3.bf16.msra.mxu0 %v350_v2  ;;  %342 = vmatpush3.bf16.msra.mxu1 %v350_v2 }
   0xc   :  { %306 = vmatprep.subr.bf16.mxu0 %v351_v3  ;;  %335 = vmatprep.subr.bf16.mxu1 %v351_v3 }
   0xf   :  { %307 = vmatpush3.bf16.msra.mxu0 %v351_v3  ;;  %343 = vmatpush3.bf16.msra.mxu1 %v351_v3 }
  0x10   :  { %308 = vmatprep.subr.bf16.mxu0 %v352_v6  ;;  %336 = vmatprep.subr.bf16.mxu1 %v352_v6 }
  0x13   :  { %309 = vmatpush3.bf16.msra.mxu0 %v352_v6  ;;  %344 = vmatpush3.bf16.msra.mxu1 %v352_v6 }
  0x14   :  { %310 = vmatprep.subr.bf16.mxu0 %v353_v7  ;;  %337 = vmatprep.subr.bf16.mxu1 %v353_v7 }
  0x17   :  { %311 = vmatpush3.bf16.msra.mxu0 %v353_v7  ;;  %345 = vmatpush3.bf16.msra.mxu1 %v353_v7 }
  0x18   :  { %312 = vmatprep.subr.bf16.mxu0 %v354_v8  ;;  %338 = vmatprep.subr.bf16.mxu1 %v354_v8 }
  0x1b   :  { %313 = vmatpush3.bf16.msra.mxu0 %v354_v8  ;;  %346 = vmatpush3.bf16.msra.mxu1 %v354_v8 }
  0x1c   :  { %314 = vmatprep.subr.bf16.mxu0 %v355_v9  ;;  %339 = vmatprep.subr.bf16.mxu1 %v355_v9 }
  0x1f   :  { %315 = vmatpush3.bf16.msra.mxu0 %v355_v9  ;;  %347 = vmatpush3.bf16.msra.mxu1 %v355_v9 }
  0x22   :  { %317 = vmatmul.mubr.bf16.vlgmr.msra.gmra.mxu0 %v358_v10  ;;  %325 = vmatmul.mubr.bf16.vlgmr.msra.gmra.mxu1 %v359_v11 }
  0x23   :  { %320 = vmatprep.mubr.bf16.mxu0 %v360_v12  ;;  %328 = vmatprep.mubr.bf16.mxu1 %v361_v13 }
  0x2a   :  { %321 = vmatmul.mubr.bf16.gmra.mxu0 %v362_v14  ;;  %329 = vmatmul.mubr.bf16.gmra.mxu1 %v363_v15 }
  0xe2   :  { %v318_v17 = vpop.f32.mrf.mxu0  ;;  %v326_v18 = vpop.f32.mrf.mxu1 }
  0xe3   :  { %v193_v19 = vadd.f32 %v318_v17, %v267_v16  ;;  %v225_v20 = vadd.f32 %v326_v18, %v267_v16 }
  0xe4   :  { %v184_v21 = vpop.f32.mrf.mxu0  ;;  %v216_v22 = vpop.f32.mrf.mxu1 }
  0xe5   :  { %249 = vst [vmem:[%s486_s3 + $0x10] sm:$0xff] %v193_v19  ;;  %257 = vst [vmem:[%s486_s3 + $0x50] sm:$0xff] %v225_v20  ;;  %v185_v23 = vadd.f32 %v267_v16, %v184_v21  ;;  %v217_v24 = vadd.f32 %v267_v16, %v216_v22 }
  0xe6   :  { %v319_v25 = vpop.f32.mrf.mxu0  ;;  %v327_v26 = vpop.f32.mrf.mxu1 }
  0xe7   :  { %247 = vst [vmem:[%s486_s3] sm:$0xff] %v185_v23  ;;  %255 = vst [vmem:[%s486_s3 + $0x40] sm:$0xff] %v217_v24  ;;  %v196_v27 = vadd.f32 %v319_v25, %v267_v16  ;;  %v228_v28 = vadd.f32 %v327_v26, %v267_v16 }
  0xe8   :  { %v187_v29 = vpop.f32.mrf.mxu0  ;;  %v219_v30 = vpop.f32.mrf.mxu1 }
  0xe9   :  { %250 = vst [vmem:[%s486_s3 + $0x18] sm:$0xff] %v196_v27  ;;  %258 = vst [vmem:[%s486_s3 + $0x58] sm:$0xff] %v228_v28  ;;  %v188_v31 = vadd.f32 %v267_v16, %v187_v29  ;;  %v220_v32 = vadd.f32 %v267_v16, %v219_v30 }
  0xea   :  { %v322_v33 = vpop.f32.mrf.mxu0  ;;  %v330_v34 = vpop.f32.mrf.mxu1 }
  0xeb   :  { %248 = vst [vmem:[%s486_s3 + $0x8] sm:$0xff] %v188_v31  ;;  %256 = vst [vmem:[%s486_s3 + $0x48] sm:$0xff] %v220_v32  ;;  %v209_v35 = vadd.f32 %v322_v33, %v267_v16  ;;  %v241_v36 = vadd.f32 %v330_v34, %v267_v16 }
  0xec   :  { %v200_v37 = vpop.f32.mrf.mxu0  ;;  %v232_v38 = vpop.f32.mrf.mxu1 }
  0xed   :  { %253 = vst [vmem:[%s486_s3 + $0x30] sm:$0xff] %v209_v35  ;;  %261 = vst [vmem:[%s486_s3 + $0x70] sm:$0xff] %v241_v36  ;;  %v201_v39 = vadd.f32 %v267_v16, %v200_v37  ;;  %v233_v40 = vadd.f32 %v267_v16, %v232_v38 }
  0xee   :  { %v323_v41 = vpop.f32.mrf.mxu0  ;;  %v331_v42 = vpop.f32.mrf.mxu1 }
  0xef   :  { %251 = vst [vmem:[%s486_s3 + $0x20] sm:$0xff] %v201_v39  ;;  %259 = vst [vmem:[%s486_s3 + $0x60] sm:$0xff] %v233_v40  ;;  %v212_v43 = vadd.f32 %v323_v41, %v267_v16  ;;  %v244_v44 = vadd.f32 %v331_v42, %v267_v16 }
  0xf0   :  { %v203_v45 = vpop.f32.mrf.mxu0  ;;  %v235_v46 = vpop.f32.mrf.mxu1 }
  0xf1   :  { %254 = vst [vmem:[%s486_s3 + $0x38] sm:$0xff] %v212_v43  ;;  %262 = vst [vmem:[%s486_s3 + $0x78] sm:$0xff] %v244_v44  ;;  %v204_v47 = vadd.f32 %v267_v16, %v203_v45  ;;  %v236_v48 = vadd.f32 %v267_v16, %v235_v46 }
  0xf3   :  { %252 = vst [vmem:[%s486_s3 + $0x28] sm:$0xff] %v204_v47  ;;  %260 = vst [vmem:[%s486_s3 + $0x68] sm:$0xff] %v236_v48 }

// kernel: mlp_mixer_forward.3
= control target key start
LH: loop header
LB: loop body
LE: loop exit
PB: predicated region body
PF: predicated region fallthrough
CT: control target
= control target key end

     0   :  { %s7136_s0 = inlined_call_operand.vmem [shape: f32[128,128], index: 0, kind: input, shape index: {}]   ;;  %s7137_s1 = inlined_call_operand.vmem [shape: f32[2,1,128], index: 1, kind: input, shape index: {}]   ;;  %s7138_s2 = inlined_call_operand.vmem [shape: f32[2,1,128], index: 2, kind: input, shape index: {}]   ;;  %s7139_s3 = inlined_call_operand.vmem [shape: bf16[2,64,16], index: 3, kind: input, shape index: {}]   ;;  %s7140_s4 = inlined_call_operand.vmem [shape: f32[2,64,1], index: 4, kind: input, shape index: {}]   ;;  %s7141_s5 = inlined_call_operand.vmem [shape: bf16[2,16,64], index: 5, kind: input, shape index: {}]   ;;  %s7142_s6 = inlined_call_operand.vmem [shape: f32[2,16,1], index: 6, kind: input, shape index: {}]   ;;  %s7143_s7 = inlined_call_operand.vmem [shape: f32[2,1,128], index: 7, kind: input, shape index: {}]   ;;  %s7144_s8 = inlined_call_operand.vmem [shape: f32[2,1,128], index: 8, kind: input, shape index: {}]   ;;  %s7145_s9 = inlined_call_operand.vmem [shape: bf16[2,128,512], index: 9, kind: input, shape index: {}]   ;;  %s7146_s10 = inlined_call_operand.vmem [shape: f32[2,1,512], index: 10, kind: input, shape index: {}]   ;;  %s7147_s11 = inlined_call_operand.vmem [shape: bf16[2,512,128], index: 11, kind: input, shape index: {}]   ;;  %s7148_s12 = inlined_call_operand.vmem [shape: f32[2,1,128], index: 12, kind: input, shape index: {}]   ;;  %s7149_s13 = inlined_call_operand.vmem [shape: f32[1,128], index: 13, kind: input, shape index: {}]   ;;  %s7150_s14 = inlined_call_operand.vmem [shape: f32[1,128], index: 14, kind: input, shape index: {}]   ;;  %s7151_s15 = inlined_call_operand.vmem [shape: bf16[128,128], index: 15, kind: input, shape index: {}]   ;;  %s7152_s16 = inlined_call_operand.vmem [shape: f32[1,128], index: 16, kind: input, shape index: {}]   ;;  %s7153_s17 = inlined_call_operand.hbm [shape: f32[1,8,128], index: 17, kind: output, shape index: {}]  }
   0x1   :  { %7183 = sst [smem:[#allocation30_spill]] %s7136_s0 }
   0x2   :  { %7184 = sst [smem:[#allocation31_spill]] %s7137_s1 }
   0x3   :  { %7185 = sst [smem:[#allocation32_spill]] %s7139_s3 }
   0x4   :  { %7186 = sst [smem:[#allocation33_spill]] %s7140_s4 }
   0x5   :  { %7187 = sst [smem:[#allocation34_spill]] %s7149_s13 }
   0x6   :  { %7188 = sst [smem:[#allocation35_spill]] %s7150_s14 }
   0x7   :  { %7189 = sst [smem:[#allocation36_spill]] %s7151_s15 }
   0x8   :  { %7190 = sst [smem:[#allocation37_spill]] %s7152_s16 }
   0x9   :  { %7191 = sst [smem:[#allocation38_spill]] %s7153_s17 }
   0xa   :  { %22 = vsyncpa [#allocation4], 0  ;;  %s5090_s24 = smov 0   ;;  %s5092_s25 = smov 0  }
   0xb   :  { %s5094_s26 = smov 0  }
   0xc LB: > { %7192 = sst [smem:[#allocation6_spill]] %s4990_s25  ;;  %s37_s28 = sadd.s32 1, %s4990_s25  ;;  %s4994_s26 = sphi %s5094_s26, %s28_s26   ;;  %s4990_s25 = sphi %s5092_s25, %s7292_s25   ;;  %s4986_s24 = sphi %s5090_s24, %s7291_s24  }
   0xd   : > { %7193 = sst [smem:[#allocation7_spill]] %s4994_s26  ;;  %p38_p0 = scmp.ge.s32.totalorder %s37_s28, 2 }
   0xe   : > { %p4158_p1 = scmp.ge.s32.totalorder %s4994_s26, 1  ;;  %p610_p2 = scmp.lt.s32.totalorder %s4994_s26, 3 }
   0xf   : > { %s7294_s28 = smov (%p38_p0, %s37_s28), 0 }
  0x10   : > { %7194 = sst [smem:[#allocation8_spill]] %s7294_s28  ;;  %p611_p3 = pnand %p4158_p1, %p610_p2 }
  0x12   : > { %614 = sbr.rel (%p611_p3) target bundleno = 2284 (0x8ec), region = 88 }
  0x17   : > { %p712_p4 = scmp.lt.s32.totalorder %s4986_s24, 1  ;;  %s7196_s3 = sld [smem:[#allocation32_spill]] }
  0x18   : > { %s7197_s4 = sld [smem:[#allocation33_spill]]  ;;  %p4172_p5 = scmp.ne.s32.totalorder %s4986_s24, 0 }
  0x19   : > { %s5113_s29 = scalar_select %p712_p4, %s4986_s24, 1 }
  0x1b   : > { %s4284_s22 = sshll.u32 %s5113_s29, 5  ;;  %s4285_s23 = sshll.u32 %s5113_s29, 6 }
  0x1c   : > { %s4286_s26 = sshll.u32 %s5113_s29, 3  ;;  %s4287_s16 = sshll.u32 %s5113_s29, 4 }
  0x1d   : > { %s5128_s0 = scalar_lea.vmem %s7196_s3, %s4284_s22  ;;  %s5140_s1 = scalar_lea.vmem %s7141_s5, %s4286_s26 }
  0x1e   : > { %s5133_s17 = scalar_lea.vmem %s7197_s4, %s4285_s23  ;;  %s5145_s14 = scalar_lea.vmem %s7142_s6, %s4287_s16 }
  0x1f   : > { %s4288_s30 = sshll.u32 %s5113_s29, 8  ;;  %s4169_s4 = sshll.u32 %s5113_s29, 2 }
  0x20   : > { %s5160_s26 = scalar_lea.vmem %s7145_s9, %s4288_s30  ;;  %s5165_s16 = scalar_lea.vmem %s7146_s10, %s4169_s4 }
  0x21   : > { %s5170_s27 = scalar_lea.vmem %s7147_s11, %s4288_s30  ;;  %s760_s25 = scalar_lea.vmem %s7148_s12, %s5113_s29 }
  0x22   : > { %765 = sbr.rel (%p4172_p5) target bundleno = 49 (0x31), region = 92  ;;  %s7198_s23 = sld [smem:[#allocation30_spill]] (!%p4172_p5) }
  0x28   : > { %v766_v0 = vld [vmem:[%s7198_s23] sm:$0xff]  ;;  %v767_v1 = vld [vmem:[%s7198_s23 + $0x8] sm:$0xff]  ;;  %v768_v2 = vld [vmem:[%s7198_s23 + $0x10] sm:$0xff] }
  0x29   : > { %782 = vst [vmem:[#allocation2 + $0x30] sm:$0xff] %v766_v0  ;;  %783 = vst [vmem:[#allocation2] sm:$0xff] %v767_v1  ;;  %v769_v3 = vld [vmem:[%s7198_s23 + $0x18] sm:$0xff]  ;;  %v770_v4 = vld [vmem:[%s7198_s23 + $0x20] sm:$0xff] }
  0x2a   : > { %784 = vst [vmem:[#allocation2 + $0x58] sm:$0xff] %v768_v2  ;;  %v771_v5 = vld [vmem:[%s7198_s23 + $0x28] sm:$0xff]  ;;  %785 = vst [vmem:[#allocation2 + $0x18] sm:$0xff] %v769_v3  ;;  %v772_v6 = vld [vmem:[%s7198_s23 + $0x30] sm:$0xff] }
  0x2b   : > { %786 = vst [vmem:[#allocation2 + $0x50] sm:$0xff] %v770_v4  ;;  %787 = vst [vmem:[#allocation2 + $0x68] sm:$0xff] %v771_v5  ;;  %v773_v7 = vld [vmem:[%s7198_s23 + $0x38] sm:$0xff]  ;;  %v774_v8 = vld [vmem:[%s7198_s23 + $0x40] sm:$0xff] }
  0x2c   : > { %788 = vst [vmem:[#allocation2 + $0x8] sm:$0xff] %v772_v6  ;;  %789 = vst [vmem:[#allocation2 + $0x48] sm:$0xff] %v773_v7  ;;  %v775_v9 = vld [vmem:[%s7198_s23 + $0x48] sm:$0xff]  ;;  %v776_v10 = vld [vmem:[%s7198_s23 + $0x50] sm:$0xff] }
  0x2d   : > { %790 = vst [vmem:[#allocation2 + $0x40] sm:$0xff] %v774_v8  ;;  %v777_v11 = vld [vmem:[%s7198_s23 + $0x58] sm:$0xff]  ;;  %791 = vst [vmem:[#allocation2 + $0x20] sm:$0xff] %v775_v9  ;;  %v778_v12 = vld [vmem:[%s7198_s23 + $0x60] sm:$0xff] }
  0x2e   : > { %792 = vst [vmem:[#allocation2 + $0x10] sm:$0xff] %v776_v10  ;;  %793 = vst [vmem:[#allocation2 + $0x38] sm:$0xff] %v777_v11  ;;  %v779_v13 = vld [vmem:[%s7198_s23 + $0x68] sm:$0xff]  ;;  %v780_v14 = vld [vmem:[%s7198_s23 + $0x70] sm:$0xff] }
  0x2f   : > { %794 = vst [vmem:[#allocation2 + $0x60] sm:$0xff] %v778_v12  ;;  %795 = vst [vmem:[#allocation2 + $0x70] sm:$0xff] %v779_v13  ;;  %v781_v15 = vld [vmem:[%s7198_s23 + $0x78] sm:$0xff] }
  0x30   : > { %796 = vst [vmem:[#allocation2 + $0x78] sm:$0xff] %v780_v14  ;;  %797 = vst [vmem:[#allocation2 + $0x28] sm:$0xff] %v781_v15 }
  0x31 PF: > { %v800_v16 = vld [vmem:[#allocation2 + $0x58] sm:$0xff]  ;;  %v798_v17 = vld [vmem:[#allocation2 + $0x30] sm:$0xff]  ;;  %v799_v19 = vld [vmem:[#allocation2] sm:$0xff]  ;;  %s7199_s3 = sld [smem:[#allocation31_spill]]  ;;  %s7201_s19 = scalar_lea.vmem %s7138_s2, %s5113_s29  ;;  %vm1121_vm0 = vcmask 130048   ;;  %vm1797_vm1 = vcmask 523264  }
  0x32   : > { %820 = vadd.xlane.f32.xlu0 %v800_v16  ;;  %816 = vadd.xlane.f32.xlu1 %v798_v17  ;;  %v801_v18 = vld [vmem:[#allocation2 + $0x18] sm:$0xff]  ;;  %v802_v22 = vld [vmem:[#allocation2 + $0x50] sm:$0xff]  ;;  %v803_v23 = vld [vmem:[#allocation2 + $0x68] sm:$0xff]  ;;  %s7268_s30 = scalar_lea.vmem %s7144_s8, %s5113_s29  ;;  %p4267_p6 = scmp.ge.s32.totalorder %s4986_s24, 1 }
  0x33   : > { %v804_v20 = vld [vmem:[#allocation2 + $0x8] sm:$0xff] }
  0x34   : > { %v805_v21 = vld [vmem:[#allocation2 + $0x48] sm:$0xff]  ;;  %v5225_v26 = vld [vmem:[#allocation2 + $0x40] sm:$0xff] }
  0x35   : > { %v808_v24 = vld [vmem:[#allocation2 + $0x10] sm:$0xff]  ;;  %v809_v25 = vld [vmem:[#allocation2 + $0x38] sm:$0xff]  ;;  %v5227_v27 = vld [vmem:[#allocation2 + $0x20] sm:$0xff] }
  0x36   : > { %822 = vadd.xlane.f32.xlu0 %v801_v18  ;;  %818 = vadd.xlane.f32.xlu1 %v799_v19  ;;  %v5235_v30 = vld [vmem:[#allocation2 + $0x60] sm:$0xff]  ;;  %v5237_v31 = vld [vmem:[#allocation2 + $0x70] sm:$0xff] }
  0x37   : > { %v5229_v28 = vld [vmem:[#allocation2 + $0x78] sm:$0xff]  ;;  %v5231_v29 = vld [vmem:[#allocation2 + $0x28] sm:$0xff]  ;;  %s7200_s13 = scalar_lea.vmem %s7199_s3, %s5113_s29 }
  0x3a   : > { %828 = vadd.xlane.f32.xlu0 %v804_v20  ;;  %830 = vadd.xlane.f32.xlu1 %v805_v21 }
  0x3e   : > { %824 = vadd.xlane.f32.xlu0 %v802_v22  ;;  %826 = vadd.xlane.f32.xlu1 %v803_v23 }
  0x42   : > { %836 = vadd.xlane.f32.xlu0 %v808_v24  ;;  %838 = vadd.xlane.f32.xlu1 %v809_v25 }
  0x46   : > { %832 = vadd.xlane.f32.xlu0 %v5225_v26  ;;  %834 = vadd.xlane.f32.xlu1 %v5227_v27 }
  0x4a   : > { %844 = vadd.xlane.f32.xlu0 %v5229_v28  ;;  %846 = vadd.xlane.f32.xlu1 %v5231_v29 }
  0x4e   : > { %840 = vadd.xlane.f32.xlu0 %v5235_v30  ;;  %842 = vadd.xlane.f32.xlu1 %v5237_v31 }
  0xbb   : > { %v821_v32 = vpop.xlane.xlu0 %820  ;;  %v817_v33 = vpop.xlane.xlu1 %816 }
  0xbc   : > { %v851_v34 = vmul.f32 0.0078125, %v821_v32  ;;  %v849_v35 = vmul.f32 0.0078125, %v817_v33  ;;  %v7158_v33 = vmov 0  }
  0xbd   : > { %1166 = vmatprep.mubr.bf16.mxu0 %v7158_v33  ;;  %1239 = vmatprep.mubr.bf16.mxu1 %v7158_v33 }
  0xbe   : > { %v5243_v36 = vsub.f32 %v800_v16, %v851_v34  ;;  %v5245_v37 = vsub.f32 %v798_v17, %v849_v35  ;;  %4482 = vset.pattern.permute.xlu1 %v7158_v33  ;;  %4481 = vset.pattern.permute.xlu0 %v7158_v33  ;;  %v1057_v34 = vld [vmem:[%s5133_s17 + $0x20] sm:$0xff]  ;;  %v1058_v35 = vld [vmem:[%s5133_s17 + $0x28] sm:$0xff] }
  0xbf   : > { %v823_v38 = vpop.xlane.xlu0 %822  ;;  %v819_v39 = vpop.xlane.xlu1 %818 }
  0xc0   : > { %v852_v40 = vmul.f32 0.0078125, %v823_v38  ;;  %v883_v41 = vmul.f32 %v5243_v36, %v5243_v36  ;;  %v850_v42 = vmul.f32 0.0078125, %v819_v39  ;;  %v881_v45 = vmul.f32 %v5245_v37, %v5245_v37  ;;  %v1055_v38 = vld [vmem:[%s5133_s17 + $0x10] sm:$0xff]  ;;  %v1056_v39 = vld [vmem:[%s5133_s17 + $0x18] sm:$0xff] }
  0xc2   : > { %v5249_v43 = vsub.f32 %v801_v18, %v852_v40  ;;  %901 = vadd.xlane.f32.xlu0 %v883_v41  ;;  %v5251_v44 = vsub.f32 %v799_v19, %v850_v42  ;;  %v1059_v40 = vld [vmem:[%s5133_s17 + $0x30] sm:$0xff]  ;;  %v1053_v41 = vld [vmem:[%s5133_s17] sm:$0xff]  ;;  %v1781_v42 = vld [vmem:[%s5145_s14 + $0x8] sm:$0xff] }
  0xc3   : > { %v829_v46 = vpop.xlane.xlu0 %828  ;;  %v831_v47 = vpop.xlane.xlu1 %830 }
  0xc4   : > { %v855_v48 = vmul.f32 0.0078125, %v829_v46  ;;  %v884_v49 = vmul.f32 %v5249_v43, %v5249_v43  ;;  %v856_v50 = vmul.f32 0.0078125, %v831_v47  ;;  %v882_v53 = vmul.f32 %v5251_v44, %v5251_v44  ;;  %v1780_v46 = vld [vmem:[%s5145_s14] sm:$0xff] }
  0xc6   : > { %v5257_v51 = vsub.f32 %v804_v20, %v855_v48  ;;  %903 = vadd.xlane.f32.xlu1 %v884_v49  ;;  %897 = vadd.xlane.f32.xlu0 %v881_v45  ;;  %v5259_v52 = vsub.f32 %v805_v21, %v856_v50  ;;  %v1054_v45 = vld [vmem:[%s5133_s17 + $0x8] sm:$0xff] }
  0xc7   : > { %v825_v54 = vpop.xlane.xlu0 %824  ;;  %v827_v55 = vpop.xlane.xlu1 %826 }
  0xc8   : > { %v853_v56 = vmul.f32 0.0078125, %v825_v54  ;;  %v887_v57 = vmul.f32 %v5257_v51, %v5257_v51  ;;  %v854_v58 = vmul.f32 0.0078125, %v827_v55  ;;  %v888_v61 = vmul.f32 %v5259_v52, %v5259_v52 }
  0xca   : > { %v5265_v59 = vsub.f32 %v802_v22, %v853_v56  ;;  %909 = vadd.xlane.f32.xlu0 %v887_v57  ;;  %899 = vadd.xlane.f32.xlu1 %v882_v53  ;;  %v5267_v60 = vsub.f32 %v803_v23, %v854_v58 }
  0xcb   : > { %v837_v62 = vpop.xlane.xlu0 %836  ;;  %v839_v63 = vpop.xlane.xlu1 %838 }
  0xcc   : > { %v859_v0 = vmul.f32 0.0078125, %v837_v62  ;;  %v885_v1 = vmul.f32 %v5265_v59, %v5265_v59  ;;  %v860_v2 = vmul.f32 0.0078125, %v839_v63  ;;  %v886_v5 = vmul.f32 %v5267_v60, %v5267_v60 }
  0xce   : > { %v5273_v3 = vsub.f32 %v808_v24, %v859_v0  ;;  %905 = vadd.xlane.f32.xlu0 %v885_v1  ;;  %911 = vadd.xlane.f32.xlu1 %v888_v61  ;;  %v5275_v4 = vsub.f32 %v809_v25, %v860_v2 }
  0xcf   : > { %v833_v6 = vpop.xlane.xlu0 %832  ;;  %v835_v7 = vpop.xlane.xlu1 %834 }
  0xd0   : > { %v857_v8 = vmul.f32 0.0078125, %v833_v6  ;;  %v891_v9 = vmul.f32 %v5273_v3, %v5273_v3  ;;  %v858_v10 = vmul.f32 0.0078125, %v835_v7  ;;  %v892_v13 = vmul.f32 %v5275_v4, %v5275_v4 }
  0xd2   : > { %v5282_v11 = vsub.f32 %v5225_v26, %v857_v8  ;;  %917 = vadd.xlane.f32.xlu0 %v891_v9  ;;  %907 = vadd.xlane.f32.xlu1 %v886_v5  ;;  %v5285_v12 = vsub.f32 %v5227_v27, %v858_v10 }
  0xd3   : > { %v845_v14 = vpop.xlane.xlu0 %844  ;;  %v847_v15 = vpop.xlane.xlu1 %846 }
  0xd4   : > { %v863_v16 = vmul.f32 0.0078125, %v845_v14  ;;  %v889_v17 = vmul.f32 %v5282_v11, %v5282_v11  ;;  %v864_v18 = vmul.f32 0.0078125, %v847_v15  ;;  %v890_v21 = vmul.f32 %v5285_v12, %v5285_v12 }
  0xd6   : > { %v5292_v19 = vsub.f32 %v5229_v28, %v863_v16  ;;  %913 = vadd.xlane.f32.xlu0 %v889_v17  ;;  %919 = vadd.xlane.f32.xlu1 %v892_v13  ;;  %v5295_v20 = vsub.f32 %v5231_v29, %v864_v18 }
  0xd7   : > { %v841_v22 = vpop.xlane.xlu0 %840  ;;  %v843_v23 = vpop.xlane.xlu1 %842 }
  0xd8   : > { %v861_v24 = vmul.f32 0.0078125, %v841_v22  ;;  %v895_v25 = vmul.f32 %v5292_v19, %v5292_v19  ;;  %v862_v26 = vmul.f32 0.0078125, %v843_v23  ;;  %v896_v29 = vmul.f32 %v5295_v20, %v5295_v20 }
  0xda   : > { %v5302_v27 = vsub.f32 %v5235_v30, %v861_v24  ;;  %925 = vadd.xlane.f32.xlu0 %v895_v25  ;;  %915 = vadd.xlane.f32.xlu1 %v890_v21  ;;  %v5305_v28 = vsub.f32 %v5237_v31, %v862_v26  ;;  %v1060_v31 = vld [vmem:[%s5133_s17 + $0x38] sm:$0xff]  ;;  %v5333_v24 = vld [vmem:[%s7200_s13] ss:$0 sm:$0xff] }
  0xdc   : > { %v893_v32 = vmul.f32 %v5302_v27, %v5302_v27  ;;  %v894_v30 = vmul.f32 %v5305_v28, %v5305_v28 }
  0xde   : > { %921 = vadd.xlane.f32.xlu0 %v893_v32  ;;  %927 = vadd.xlane.f32.xlu1 %v896_v29 }
  0xe2   : > { %923 = vadd.xlane.f32.xlu1 %v894_v30 }
  0xf3   : > { %1098 = vperm.xlu1 %4482, %v1060_v31  }
  0xf4   : > { %1093 = vperm.xlu0 %4481, %v1059_v40  }
  0xf7   : > { %1083 = vperm.xlu1 %4482, %v1057_v34  }
  0xf8   : > { %1789 = vperm.xlu0 %4481, %v1781_v42  }
  0xfb   : > { %1088 = vperm.xlu1 %4482, %v1058_v35  }
  0xff   : > { %1073 = vperm.xlu1 %4482, %v1055_v38   ;;  %v5341_v38 = vld [vmem:[%s7201_s19] ss:$0 sm:$0xff] }
 0x103   : > { %1078 = vperm.xlu1 %4482, %v1056_v39  }
 0x107   : > { %1063 = vperm.xlu1 %4482, %v1053_v41  }
 0x10b   : > { %1068 = vperm.xlu1 %4482, %v1054_v45  }
 0x10f   : > { %1784 = vperm.xlu1 %4482, %v1780_v46  }
 0x14b   : > { %v902_v47 = vpop.xlane.xlu0 %901 }
 0x14c   : > { %v931_v48 = vmul.f32 0.0078125, %v902_v47 }
 0x14e   : > { %v947_v49 = vadd.f32 1e-06, %v931_v48 }
 0x14f   : > { %v898_v50 = vpop.xlane.xlu0 %897  ;;  %v904_v53 = vpop.xlane.xlu1 %903 }
 0x150   : > { %4568 = vrsqrt.f32 %v947_v49  ;;  %v929_v54 = vmul.f32 0.0078125, %v898_v50  ;;  %v932_v55 = vmul.f32 0.0078125, %v904_v53 }
 0x152   : > { %v945_v56 = vadd.f32 1e-06, %v929_v54  ;;  %v948_v57 = vadd.f32 1e-06, %v932_v55 }
 0x153   : > { %v910_v58 = vpop.xlane.xlu0 %909  ;;  %v900_v61 = vpop.xlane.xlu1 %899 }
 0x154   : > { %4570 = vrsqrt.f32 %v945_v56  ;;  %v935_v62 = vmul.f32 0.0078125, %v910_v58  ;;  %v930_v63 = vmul.f32 0.0078125, %v900_v61 }
 0x155   : > { %4572 = vrsqrt.f32 %v948_v57 }
 0x156   : > { %v951_v0 = vadd.f32 1e-06, %v935_v62  ;;  %v946_v1 = vadd.f32 1e-06, %v930_v63 }
 0x157   : > { %v906_v2 = vpop.xlane.xlu0 %905  ;;  %v912_v5 = vpop.xlane.xlu1 %911 }
 0x158   : > { %4574 = vrsqrt.f32 %v951_v0  ;;  %v933_v6 = vmul.f32 0.0078125, %v906_v2  ;;  %v936_v7 = vmul.f32 0.0078125, %v912_v5 }
 0x159   : > { %4576 = vrsqrt.f32 %v946_v1 }
 0x15a   : > { %v949_v8 = vadd.f32 1e-06, %v933_v6  ;;  %v952_v9 = vadd.f32 1e-06, %v936_v7 }
 0x15b   : > { %v918_v10 = vpop.xlane.xlu0 %917  ;;  %v908_v13 = vpop.xlane.xlu1 %907 }
 0x15c   : > { %4578 = vrsqrt.f32 %v949_v8  ;;  %v939_v14 = vmul.f32 0.0078125, %v918_v10  ;;  %v934_v15 = vmul.f32 0.0078125, %v908_v13 }
 0x15d   : > { %v4569_v16 = vpop.eup %4568  ;;  %4580 = vrsqrt.f32 %v952_v9 }
 0x15e   : > { %v955_v17 = vadd.f32 1e-06, %v939_v14  ;;  %v950_v18 = vadd.f32 1e-06, %v934_v15  ;;  %v979_v21 = vmul.f32 %v4569_v16, %v5243_v36 }
 0x15f   : > { %v914_v22 = vpop.xlane.xlu0 %913  ;;  %v920_v23 = vpop.xlane.xlu1 %919 }
 0x160   : > { %4582 = vrsqrt.f32 %v955_v17  ;;  %v937_v25 = vmul.f32 0.0078125, %v914_v22  ;;  %v940_v26 = vmul.f32 0.0078125, %v920_v23  ;;  %v1001_v34 = vmul.f32 %v5333_v24, %v979_v21 }
 0x161   : > { %v4571_v29 = vpop.eup %4570  ;;  %4584 = vrsqrt.f32 %v950_v18 }
 0x162   : > { %v4573_v32 = vpop.eup %4572  ;;  %v953_v30 = vadd.f32 1e-06, %v937_v25  ;;  %v956_v31 = vadd.f32 1e-06, %v940_v26  ;;  %v977_v40 = vmul.f32 %v4571_v29, %v5245_v37  ;;  %v1023_v50 = vadd.f32 %v5341_v38, %v1001_v34 }
 0x163   : > { %v926_v35 = vpop.xlane.xlu0 %925  ;;  %v916_v36 = vpop.xlane.xlu1 %915  ;;  %v980_v39 = vmul.f32 %v4573_v32, %v5249_v43 }
 0x164   : > { %4586 = vrsqrt.f32 %v953_v30  ;;  %v943_v41 = vmul.f32 0.0078125, %v926_v35  ;;  %v938_v42 = vmul.f32 0.0078125, %v916_v36  ;;  %v999_v37 = vmul.f32 %v5333_v24, %v977_v40  ;;  %v4484_v40 = vld [vmem:[%s5128_s0 + $0x8] sm:$0xff]  }
 0x165   : > { %v4575_v45 = vpop.eup %4574  ;;  %4588 = vrsqrt.f32 %v956_v31  ;;  %v1002_v46 = vmul.f32 %v5333_v24, %v980_v39 }
 0x166   : > { %v4577_v47 = vpop.eup %4576  ;;  %v959_v48 = vadd.f32 1e-06, %v943_v41  ;;  %v954_v49 = vadd.f32 1e-06, %v938_v42  ;;  %v983_v56 = vmul.f32 %v4575_v45, %v5257_v51  ;;  %v1021_v6 = vadd.f32 %v5341_v38, %v999_v37 }
 0x167   : > { %v922_v53 = vpop.xlane.xlu0 %921  ;;  %v928_v54 = vpop.xlane.xlu1 %927  ;;  %v1024_v55 = vadd.f32 %v5341_v38, %v1002_v46  ;;  %v978_v43 = vmul.f32 %v4577_v47, %v5251_v44 }
 0x168   : > { %4590 = vrsqrt.f32 %v959_v48  ;;  %v941_v57 = vmul.f32 0.0078125, %v922_v53  ;;  %v944_v58 = vmul.f32 0.0078125, %v928_v54  ;;  %v1005_v8 = vmul.f32 %v5333_v24, %v983_v56  ;;  %v4485_v56 = vld [vmem:[%s5128_s0 + $0x10] sm:$0xff]  }
 0x169   : > { %v4579_v61 = vpop.eup %4578  ;;  %4592 = vrsqrt.f32 %v954_v49  ;;  %v1038_v62 = vpack.c.bf16 %v1024_v55, %v1023_v50  ;;  %v1000_v63 = vmul.f32 %v5333_v24, %v978_v43 }
 0x16a   : > { %v4581_v0 = vpop.eup %4580  ;;  %v957_v1 = vadd.f32 1e-06, %v941_v57  ;;  %v960_v2 = vadd.f32 1e-06, %v944_v58  ;;  %v981_v5 = vmul.f32 %v4579_v61, %v5265_v59  ;;  %v5359_v59 = vld [vmem:[%s5128_s0] sm:$0xff]   ;;  %v1027_v18 = vadd.f32 %v5341_v38, %v1005_v8 }
 0x16b   : > { %1148 = vmatprep.subr.bf16.mxu0 %v1038_v62  ;;  %v924_v44 = vpop.xlane.xlu1 %923  ;;  %v1022_v51 = vadd.f32 %v5341_v38, %v1000_v63  ;;  %v984_v7 = vmul.f32 %v4581_v0, %v5259_v52 }
 0x16c   : > { %4594 = vrsqrt.f32 %v957_v1  ;;  %v942_v9 = vmul.f32 0.0078125, %v924_v44  ;;  %v1003_v17 = vmul.f32 %v5333_v24, %v981_v5  ;;  %v4486_v1 = vld [vmem:[%s5128_s0 + $0x18] sm:$0xff]  }
 0x16d   : > { %v4583_v10 = vpop.eup %4582  ;;  %4596 = vrsqrt.f32 %v960_v2  ;;  %v1037_v13 = vpack.c.bf16 %v1022_v51, %v1021_v6  ;;  %v1006_v14 = vmul.f32 %v5333_v24, %v984_v7 }
 0x16e   : > { %v4585_v15 = vpop.eup %4584  ;;  %v958_v16 = vadd.f32 1e-06, %v942_v9  ;;  %v987_v22 = vmul.f32 %v4583_v10, %v5273_v3  ;;  %v1025_v32 = vadd.f32 %v5341_v38, %v1003_v17 }
 0x16f   : > { %1149 = vmatpush1.bf16.msra.mxu0 %v1037_v13  ;;  %v1028_v52 = vadd.f32 %v5341_v38, %v1006_v14  ;;  %v982_v21 = vmul.f32 %v4585_v15, %v5267_v60 }
 0x170   : > { %4598 = vrsqrt.f32 %v958_v16  ;;  %v1009_v3 = vmul.f32 %v5333_v24, %v987_v22 }
 0x171   : > { %v4587_v23 = vpop.eup %4586  ;;  %v1040_v25 = vpack.c.bf16 %v1028_v52, %v1027_v18  ;;  %v1004_v26 = vmul.f32 %v5333_v24, %v982_v21 }
 0x172   : > { %v4589_v29 = vpop.eup %4588  ;;  %4179 = vmatmul.mubr.msk.bf16.vlgmr.msra.gmra.mxu0 %vm1121_vm0, %v5359_v59  ;;  %v985_v30 = vmul.f32 %v4587_v23, %v5282_v11  ;;  %v1031_v11 = vadd.f32 %v5341_v38, %v1009_v3 }
 0x173   : > { %1221 = vmatprep.subr.bf16.mxu1 %v1040_v25  ;;  %v1026_v31 = vadd.f32 %v5341_v38, %v1004_v26  ;;  %1176 = vmatprep.mubr.bf16.mxu0 %v7158_v33  ;;  %v988_v60 = vmul.f32 %v4589_v29, %v5275_v4 }
 0x174   : > { %v1007_v41 = vmul.f32 %v5333_v24, %v985_v30 }
 0x175   : > { %v4591_v34 = vpop.eup %4590  ;;  %v1039_v35 = vpack.c.bf16 %v1026_v31, %v1025_v32  ;;  %v1010_v36 = vmul.f32 %v5333_v24, %v988_v60 }
 0x176   : > { %v4593_v39 = vpop.eup %4592  ;;  %v991_v46 = vmul.f32 %v4591_v34, %v5292_v19  ;;  %v1029_v50 = vadd.f32 %v5341_v38, %v1007_v41 }
 0x177   : > { %1222 = vmatpush1.bf16.msra.mxu1 %v1039_v35  ;;  %v1032_v42 = vadd.f32 %v5341_v38, %v1010_v36  ;;  %v986_v45 = vmul.f32 %v4593_v39, %v5285_v12 }
 0x178   : > { %v1013_v54 = vmul.f32 %v5333_v24, %v991_v46 }
 0x179   : > { %v4595_v4 = vpop.eup %4594  ;;  %v1042_v47 = vpack.c.bf16 %v1032_v42, %v1031_v11  ;;  %v1008_v48 = vmul.f32 %v5333_v24, %v986_v45 }
 0x17a   : > { %v4597_v49 = vpop.eup %4596  ;;  %4180 = vmatmul.mubr.msk.bf16.gmra.mxu0 %vm1121_vm0, %v4484_v40  ;;  %4183 = vmatmul.mubr.msk.bf16.vlgmr.msra.gmra.mxu1 %vm1121_vm0, %v5359_v59  ;;  %v989_v53 = vmul.f32 %v4595_v4, %v5302_v27  ;;  %v1035_v58 = vadd.f32 %v5341_v38, %v1013_v54 }
 0x17b   : > { %1294 = vmatprep.subr.bf16.mxu0 %v1042_v47  ;;  %v1030_v12 = vadd.f32 %v5341_v38, %v1008_v48  ;;  %1186 = vmatprep.mubr.bf16.mxu0 %v7158_v33  ;;  %v992_v19 = vmul.f32 %v4597_v49, %v5295_v20 }
 0x17c   : > { %1249 = vmatprep.mubr.bf16.mxu1 %v7158_v33  ;;  %v1011_v27 = vmul.f32 %v5333_v24, %v989_v53 }
 0x17d   : > { %v4599_v55 = vpop.eup %4598  ;;  %v1041_v43 = vpack.c.bf16 %v1030_v12, %v1029_v50  ;;  %v1014_v37 = vmul.f32 %v5333_v24, %v992_v19 }
 0x17e   : > { %v990_v57 = vmul.f32 %v4599_v55, %v5305_v28  ;;  %v1033_v63 = vadd.f32 %v5341_v38, %v1011_v27 }
 0x17f   : > { %1295 = vmatpush1.bf16.msra.mxu0 %v1041_v43  ;;  %v1036_v61 = vadd.f32 %v5341_v38, %v1014_v37 }
 0x180   : > { %v1012_v20 = vmul.f32 %v5333_v24, %v990_v57  ;;  %v5431_v24 = vpop.permute.xlu1 %1098 }
 0x181   : > { %v1044_v62 = vpack.c.bf16 %v1036_v61, %v1035_v58 }
 0x182   : > { %4181 = vmatmul.mubr.msk.bf16.gmra.mxu0 %vm1121_vm0, %v4485_v56  ;;  %4184 = vmatmul.mubr.msk.bf16.gmra.mxu1 %vm1121_vm0, %v4484_v40  ;;  %v1034_v0 = vadd.f32 %v5341_v38, %v1012_v20 }
 0x183   : > { %1367 = vmatprep.subr.bf16.mxu1 %v1044_v62  ;;  %1196 = vmatprep.mubr.bf16.mxu0 %v7158_v33 }
 0x184   : > { %v1043_v28 = vpack.c.bf16 %v1034_v0, %v1033_v63  ;;  %1259 = vmatprep.mubr.bf16.mxu1 %v7158_v33  ;;  %v5433_v38 = vpop.permute.xlu1 %1083 }
 0x185   : > { %7202 = vst [vmem:[#allocation9_spill] sm:$0xff] %v5433_v38 }
 0x186   : > { %1368 = vmatpush1.bf16.msra.mxu1 %v1043_v28 }
 0x188   : > { %v5435_v2 = vpop.permute.xlu1 %1088 }
 0x18a   : > { %4182 = vmatmul.mubr.msk.bf16.gmra.mxu0 %vm1121_vm0, %v4486_v1  ;;  %4185 = vmatmul.mubr.msk.bf16.gmra.mxu1 %vm1121_vm0, %v4485_v56 }
 0x18b   : > { %1269 = vmatprep.mubr.bf16.mxu1 %v7158_v33  ;;  %1312 = vmatprep.mubr.bf16.mxu0 %v7158_v33 }
 0x18c   : > { %v5437_v44 = vpop.permute.xlu1 %1073 }
 0x190   : > { %v5439_v8 = vpop.permute.xlu1 %1078 }
 0x191   : > { %7203 = vst [vmem:[#allocation10_spill] sm:$0xff] %v5439_v8 }
 0x192   : > { %4186 = vmatmul.mubr.msk.bf16.gmra.mxu1 %vm1121_vm0, %v4486_v1  ;;  %4187 = vmatmul.mubr.msk.bf16.vlgmr.msra.gmra.mxu0 %vm1121_vm0, %v5359_v59 }
 0x193   : > { %1322 = vmatprep.mubr.bf16.mxu0 %v7158_v33  ;;  %1385 = vmatprep.mubr.bf16.mxu1 %v7158_v33 }
 0x19a   : > { %4188 = vmatmul.mubr.msk.bf16.gmra.mxu0 %vm1121_vm0, %v4484_v40  ;;  %4191 = vmatmul.mubr.msk.bf16.vlgmr.msra.gmra.mxu1 %vm1121_vm0, %v5359_v59  ;;  %v5441_v59 = vpop.permute.xlu1 %1063 }
 0x19b   : > { %1332 = vmatprep.mubr.bf16.mxu0 %v7158_v33  ;;  %1395 = vmatprep.mubr.bf16.mxu1 %v7158_v33 }
 0x19e   : > { %v5446_v26 = vpop.permute.xlu1 %1068 }
 0x1a2   : > { %4189 = vmatmul.mubr.msk.bf16.gmra.mxu0 %vm1121_vm0, %v4485_v56  ;;  %4192 = vmatmul.mubr.msk.bf16.gmra.mxu1 %vm1121_vm0, %v4484_v40 }
 0x1a3   : > { %1342 = vmatprep.mubr.bf16.mxu0 %v7158_v33  ;;  %1405 = vmatprep.mubr.bf16.mxu1 %v7158_v33 }
 0x1aa   : > { %4190 = vmatmul.mubr.msk.bf16.gmra.mxu0 %vm1121_vm0, %v4486_v1  ;;  %4193 = vmatmul.mubr.msk.bf16.gmra.mxu1 %vm1121_vm0, %v4485_v56 }
 0x1ab   : > { %1415 = vmatprep.mubr.bf16.mxu1 %v7158_v33  ;;  %1833 = vmatprep.mubr.bf16.mxu0 %v7158_v33 }
 0x1b2   : > { %4194 = vmatmul.mubr.msk.bf16.gmra.mxu1 %vm1121_vm0, %v4486_v1 }
 0x1b3   : > { %1876 = vmatprep.mubr.bf16.mxu1 %v7158_v33 }
 0x232   : > { %v1168_v5 = vpop.f32.mrf.mxu0 }
 0x233   : > { %v5449_v30 = vadd.f32 %v1168_v5, %v5441_v59 }
 0x234   : > { %v1170_v6 = vpop.f32.mrf.mxu0 }
 0x235   : > { %v5444_v25 = vadd.f32 %v1170_v6, %v5441_v59  ;;  %v1490_v11 = vmul.f32 0.70710677, %v5449_v30 }
 0x236   : > { %v1172_v51 = vpop.f32.mrf.mxu0 }
 0x237   : > { %v5459_v34 = vadd.f32 %v1172_v51, %v5446_v26  ;;  %v1491_v35 = vmul.f32 0.70710677, %v5444_v25 }
 0x238   : > { %v1174_v7 = vpop.f32.mrf.mxu0 }
 0x239   : > { %v5452_v31 = vadd.f32 %v1174_v7, %v5446_v26  ;;  %v1498_v48 = vmul.f32 0.70710677, %v5459_v34  ;;  %4600 = verf.f32 %v1491_v35 }
 0x23a   : > { %v1178_v9 = vpop.f32.mrf.mxu0  ;;  %v1241_v10 = vpop.f32.mrf.mxu1  ;;  %4602 = verf.f32 %v1490_v11 }
 0x23b   : > { %v5463_v36 = vadd.f32 %v1178_v9, %v5437_v44  ;;  %v5466_v39 = vadd.f32 %v1241_v10, %v5441_v59  ;;  %v1499_v42 = vmul.f32 0.70710677, %v5452_v31  ;;  %v1435_v35 = vmul.f32 0.5, %v5452_v31 }
 0x23c   : > { %v1180_v13 = vpop.f32.mrf.mxu0  ;;  %v1243_v14 = vpop.f32.mrf.mxu1 }
 0x23d   : > { %v5475_v45 = vadd.f32 %v1180_v13, %v5437_v44  ;;  %v5478_v46 = vadd.f32 %v1243_v14, %v5441_v59  ;;  %v1506_v49 = vmul.f32 0.70710677, %v5463_v36  ;;  %v1492_v53 = vmul.f32 0.70710677, %v5466_v39 }
 0x23e   : > { %v1182_v15 = vpop.f32.mrf.mxu0  ;;  %v1245_v16 = vpop.f32.mrf.mxu1  ;;  %4604 = verf.f32 %v1499_v42 }
 0x23f   : > { %v5487_v50 = vadd.f32 %v1182_v15, %v5439_v8  ;;  %v5491_v12 = vadd.f32 %v1245_v16, %v5446_v26  ;;  %v1507_v55 = vmul.f32 0.70710677, %v5475_v45  ;;  %v1493_v37 = vmul.f32 0.70710677, %v5478_v46  ;;  %v5558_v42 = vpop.permute.xlu0 %1093 }
 0x240   : > { %v1184_v17 = vpop.f32.mrf.mxu0  ;;  %v1247_v18 = vpop.f32.mrf.mxu1  ;;  %4606 = verf.f32 %v1498_v48 }
 0x241   : > { %v5499_v43 = vadd.f32 %v1184_v17, %v5439_v8  ;;  %v5503_v56 = vadd.f32 %v1247_v18, %v5446_v26  ;;  %4608 = verf.f32 %v1506_v49  ;;  %v1514_v58 = vmul.f32 0.70710677, %v5487_v50 }
 0x242   : > { %v1188_v52 = vpop.f32.mrf.mxu0  ;;  %v1251_v21 = vpop.f32.mrf.mxu1  ;;  %4610 = verf.f32 %v1492_v53  ;;  %v1500_v20 = vmul.f32 0.70710677, %v5491_v12  ;;  %v5568_v53 = vmul.f32 0.5, %v5463_v36 }
 0x243   : > { %v5511_v61 = vadd.f32 %v1188_v52, %v5433_v38  ;;  %v5515_v62 = vadd.f32 %v1251_v21, %v5437_v44  ;;  %4612 = verf.f32 %v1507_v55  ;;  %v1515_v28 = vmul.f32 0.70710677, %v5499_v43 }
 0x244   : > { %v1190_v22 = vpop.f32.mrf.mxu0  ;;  %v1253_v23 = vpop.f32.mrf.mxu1  ;;  %4614 = verf.f32 %v1493_v37  ;;  %v1501_v5 = vmul.f32 0.70710677, %v5503_v56  ;;  %v1427_v21 = vmul.f32 0.5, %v5444_v25  ;;  %v5563_v25 = vmul.f32 0.5, %v5459_v34 }
 0x245   : > { %v5523_v1 = vadd.f32 %v1190_v22, %v5433_v38  ;;  %v5527_v6 = vadd.f32 %v1253_v23, %v5437_v44  ;;  %4616 = verf.f32 %v1514_v58  ;;  %v1522_v9 = vmul.f32 0.70710677, %v5511_v61 }
 0x246   : > { %v1192_v29 = vpop.f32.mrf.mxu0  ;;  %v1255_v32 = vpop.f32.mrf.mxu1  ;;  %4618 = verf.f32 %v1500_v20  ;;  %v1508_v13 = vmul.f32 0.70710677, %v5515_v62  ;;  %7206 = vst [vmem:[#allocation13_spill] sm:$0xff] %v5563_v25  ;;  %v5576_v37 = vmul.f32 0.5, %v5475_v45  ;;  %v5579_v58 = vmul.f32 0.5, %v5478_v46 }
 0x247   : > { %v5535_v10 = vadd.f32 %v1192_v29, %v5435_v2  ;;  %v5539_v14 = vadd.f32 %v1255_v32, %v5439_v8  ;;  %4620 = verf.f32 %v1515_v28  ;;  %v1523_v17 = vmul.f32 0.70710677, %v5523_v1  ;;  %v4601_v32 = vpop.eup %4600 }
 0x248   : > { %v5454_v60 = vpop.f32.mrf.mxu0  ;;  %v5456_v3 = vpop.f32.mrf.mxu1  ;;  %4622 = verf.f32 %v1501_v5  ;;  %v1509_v18 = vmul.f32 0.70710677, %v5527_v6  ;;  %v5554_v29 = vmul.f32 0.5, %v5449_v30  ;;  %v5571_v30 = vmul.f32 0.5, %v5466_v39 }
 0x249   : > { %4624 = verf.f32 %v1522_v9  ;;  %v1530_v22 = vmul.f32 0.70710677, %v5535_v10  ;;  %v1516_v11 = vmul.f32 0.70710677, %v5539_v14  ;;  %v5565_v49 = vpop.eup %4602  ;;  %v1195_v31 = vadd.f32 %v5454_v60, %v5435_v2 }
 0x24a   : > { %v5468_v40 = vpop.f32.mrf.mxu0  ;;  %v5470_v41 = vpop.f32.mrf.mxu1  ;;  %7204 = vst [vmem:[#allocation11_spill] sm:$0xff] %v5554_v29  ;;  %4626 = verf.f32 %v1508_v13  ;;  %7207 = vst [vmem:[#allocation14_spill] sm:$0xff] %v5565_v49  ;;  %v1258_v34 = vadd.f32 %v5456_v3, %v5439_v8  ;;  %v1619_v39 = vadd.f32 1.0, %v4601_v32  ;;  %v5588_v28 = vmul.f32 0.5, %v5487_v50 }
 0x24b   : > { %4628 = verf.f32 %v1523_v17  ;;  %v4605_v55 = vpop.eup %4604  ;;  %v1199_v60 = vadd.f32 %v5468_v40, %v5558_v42  ;;  %v5595_v5 = vmul.f32 0.5, %v5491_v12  ;;  %v5598_v3 = vmul.f32 0.5, %v5499_v43 }
 0x24c   : > { %v5480_v4 = vpop.f32.mrf.mxu0  ;;  %v5482_v47 = vpop.f32.mrf.mxu1  ;;  %4630 = verf.f32 %v1509_v18  ;;  %v1262_v9 = vadd.f32 %v5470_v41, %v5433_v38  ;;  %v1627_v50 = vadd.f32 1.0, %v4605_v55  ;;  %v5603_v17 = vmul.f32 0.5, %v5503_v56 }
 0x24d   : > { %v5585_v20 = vpop.eup %4606  ;;  %4632 = verf.f32 %v1530_v22  ;;  %v1531_v18 = vmul.f32 0.70710677, %v1195_v31  ;;  %v1201_v40 = vadd.f32 %v5480_v4, %v5558_v42  ;;  %v5608_v12 = vmul.f32 0.5, %v5511_v61 }
 0x24e   : > { %v5493_v19 = vpop.f32.mrf.mxu0  ;;  %v5495_v54 = vpop.f32.mrf.mxu1  ;;  %7209 = vst [vmem:[#allocation16_spill] sm:$0xff] %v5585_v20  ;;  %4634 = verf.f32 %v1516_v11  ;;  %v5611_v43 = vmul.f32 0.5, %v5515_v62  ;;  %v1517_v32 = vmul.f32 0.70710677, %v1258_v34  ;;  %v1264_v41 = vadd.f32 %v5482_v47, %v5433_v38 }
 0x24f   : > { %v4609_v46 = vpop.eup %4608  ;;  %v5617_v56 = vmul.f32 %v1619_v39, %v1427_v21  ;;  %v5620_v33 = vmul.f32 0.5, %v5523_v1  ;;  %v1538_v4 = vmul.f32 0.70710677, %v1199_v60  ;;  %v1203_v61 = vadd.f32 %v5493_v19, %v5431_v24 }
 0x250   : > { %v5505_v57 = vpop.f32.mrf.mxu0  ;;  %v5507_v27 = vpop.f32.mrf.mxu1  ;;  %v5627_v29 = vmul.f32 0.5, %v5527_v6  ;;  %v5630_v47 = vmul.f32 0.5, %v5535_v10  ;;  %v1524_v20 = vmul.f32 0.70710677, %v1262_v9  ;;  %v5636_v39 = vmul.f32 %v1627_v50, %v1435_v35 }
 0x251   : > { %v4611_v13 = vpop.eup %4610  ;;  %7211 = vst [vmem:[#allocation18_spill] sm:$0xff] %v5617_v56  ;;  %v5634_v21 = vadd.f32 %v5505_v57, %v5431_v24  ;;  %v5639_v49 = vmul.f32 0.5, %v5539_v14  ;;  %4636 = verf.f32 %v1531_v18  ;;  %v1539_v19 = vmul.f32 0.70710677, %v1201_v40 }
 0x252   : > { %v5517_v63 = vpop.f32.mrf.mxu1  ;;  %v5519_v0 = vpop.f32.mrf.mxu0  ;;  %7213 = vst [vmem:[#allocation20_spill] sm:$0xff] %v5636_v39  ;;  %v1634_v38 = vadd.f32 1.0, %v4609_v46  ;;  %v1620_v6 = vadd.f32 1.0, %v4611_v13  ;;  %4638 = verf.f32 %v1517_v32  ;;  %v1546_v57 = vmul.f32 0.70710677, %v1203_v61 }
 0x253   : > { %v4613_v22 = vpop.eup %4612  ;;  %4640 = verf.f32 %v1538_v4  ;;  %v5645_v14 = vmul.f32 0.5, %v1195_v31  ;;  %v1547_v18 = vmul.f32 0.70710677, %v5634_v21  ;;  %v5648_v32 = vmul.f32 0.5, %v1258_v34 }
 0x254   : > { %v5529_v51 = vpop.f32.mrf.mxu1  ;;  %v5531_v7 = vpop.f32.mrf.mxu0  ;;  %v1635_v8 = vadd.f32 1.0, %v4613_v22  ;;  %4642 = verf.f32 %v1524_v20  ;;  %v1266_v22 = vadd.f32 %v5495_v54, %v5435_v2  ;;  %v5653_v4 = vmul.f32 %v1634_v38, %v5568_v53 }
 0x255   : > { %v4615_v55 = vpop.eup %4614  ;;  %4644 = verf.f32 %v1539_v19  ;;  %v5655_v39 = vmul.f32 0.5, %v1199_v60 }
 0x256   : > { %v5541_v15 = vpop.f32.mrf.mxu1  ;;  %v5543_v16 = vpop.f32.mrf.mxu0  ;;  %v5665_v34 = vmul.f32 %v1635_v8, %v5576_v37  ;;  %v5680_v8 = vmul.f32 0.5, %v1264_v41  ;;  %v1532_v37 = vmul.f32 0.70710677, %v1266_v22 }
 0x257   : > { %v4617_v62 = vpop.eup %4616 }
 0x258   : > { %v5547_v52 = vpop.f32.mrf.mxu1  ;;  %v5551_v23 = vpop.f32.mrf.mxu0  ;;  %v1642_v50 = vadd.f32 1.0, %v4617_v62  ;;  %v5657_v62 = vmul.f32 0.5, %v1262_v9  ;;  %v5675_v9 = vmul.f32 0.5, %v1201_v40 }
 0x259   : > { %v4619_v1 = vpop.eup %4618 }
 0x25a   : > { %v5560_v48 = vpop.f32.mrf.mxu1  ;;  %v5592_v45 = vpop.f32.mrf.mxu0  ;;  %v1628_v13 = vadd.f32 1.0, %v4619_v1  ;;  %v5662_v1 = vmul.f32 %v1620_v6, %v5571_v30  ;;  %v5673_v60 = vmul.f32 %v1642_v50, %v5588_v28  ;;  %v5690_v28 = vadd.f32 %v5541_v15, %v5431_v24 }
 0x25b   : > { %7205 = vst [vmem:[#allocation12_spill] sm:$0xff] %v5560_v48  ;;  %v4621_v56 = vpop.eup %4620  ;;  %v1525_v48 = vmul.f32 0.70710677, %v1264_v41  ;;  %v5696_v41 = vadd.f32 %v5547_v52, %v5431_v24  ;;  %v1268_v15 = vadd.f32 %v5507_v27, %v5435_v2 }
 0x25c   : > { %v5583_v36 = vpop.f32.mrf.mxu1  ;;  %v5624_v25 = vpop.f32.mrf.mxu0  ;;  %7214 = vst [vmem:[#allocation21_spill] sm:$0xff] %v5662_v1  ;;  %v5678_v30 = vmul.f32 %v1628_v13, %v5595_v5  ;;  %v1548_v27 = vmul.f32 0.70710677, %v5690_v28 }
 0x25d   : > { %7208 = vst [vmem:[#allocation15_spill] sm:$0xff] %v5583_v36  ;;  %7212 = vst [vmem:[#allocation19_spill] sm:$0xff] %v5624_v25  ;;  %v1621_v36 = vadd.f32 1.0, %v4615_v55  ;;  %4646 = verf.f32 %v1525_v48  ;;  %v1643_v48 = vadd.f32 1.0, %v4621_v56 }
 0x25e   : > { %v5615_v11 = vpop.f32.mrf.mxu1  ;;  %v5643_v25 = vpop.f32.mrf.mxu0  ;;  %4648 = verf.f32 %v1546_v57  ;;  %7216 = vst [vmem:[#allocation23_spill] sm:$0xff] %v5678_v30  ;;  %v5686_v57 = vmul.f32 0.5, %v1203_v61  ;;  %v5744_v30 = vmul.f32 0.5, %v1268_v15 }
 0x25f   : > { %7210 = vst [vmem:[#allocation17_spill] sm:$0xff] %v5615_v11  ;;  %v4623_v11 = vpop.eup %4622  ;;  %v5668_v54 = vmul.f32 %v1621_v36, %v5579_v58  ;;  %4650 = verf.f32 %v1547_v18  ;;  %v5684_v58 = vadd.f32 %v5529_v51, %v5558_v42  ;;  %v5739_v51 = vmul.f32 0.5, %v1266_v22 }
 0x260   : > { %v5641_v10 = vpop.f32.mrf.mxu1  ;;  %v4625_v35 = vpop.eup %4624  ;;  %v1629_v36 = vadd.f32 1.0, %v4623_v11  ;;  %4652 = verf.f32 %v1532_v37 }
 0x261   : > { %v4627_v46 = vpop.eup %4626  ;;  %7215 = vst [vmem:[#allocation22_spill] sm:$0xff] %v5668_v54  ;;  %v5670_v38 = vpop.f32.mrf.mxu0  ;;  %v1650_v6 = vadd.f32 1.0, %v4625_v35  ;;  %v1541_v52 = vmul.f32 0.70710677, %v5684_v58 }
 0x262   : > { %v4629_v55 = vpop.eup %4628  ;;  %v5659_v31 = vpop.f32.mrf.mxu1  ;;  %v1636_v56 = vadd.f32 1.0, %v4627_v46  ;;  %v5707_v46 = vmul.f32 %v1643_v48, %v5598_v3 }
 0x263   : > { %v4631_v20 = vpop.eup %4630  ;;  %v1651_v5 = vadd.f32 1.0, %v4629_v55  ;;  %v5698_v18 = vpop.f32.mrf.mxu0  ;;  %v5711_v55 = vmul.f32 %v1629_v36, %v5603_v17  ;;  %4654 = verf.f32 %v1541_v52 }
 0x264   : > { %v4633_v53 = vpop.eup %4632  ;;  %v5692_v40 = vpop.f32.mrf.mxu1  ;;  %v1637_v11 = vadd.f32 1.0, %v4631_v20  ;;  %v1272_v20 = vadd.f32 %v5517_v63, %v5558_v42  ;;  %v5722_v3 = vmul.f32 %v1636_v56, %v5611_v43  ;;  %v1533_v43 = vmul.f32 0.70710677, %v1268_v15 }
 0x265   : > { %v4635_v19 = vpop.eup %4634  ;;  %v1658_v50 = vadd.f32 1.0, %v4633_v53  ;;  %7217 = vst [vmem:[#allocation24_spill] sm:$0xff] %v5711_v55  ;;  %v5714_v53 = vmul.f32 %v1650_v6, %v5608_v12  ;;  %v5725_v48 = vmul.f32 %v1651_v5, %v5620_v33  ;;  %v1549_v12 = vmul.f32 0.70710677, %v5696_v41  ;;  %v5731_v37 = vpop.f32.mrf.mxu0 }
 0x266   : > { %v1644_v61 = vadd.f32 1.0, %v4635_v19  ;;  %v4637_v13 = vpop.eup %4636  ;;  %v5719_v19 = vpop.f32.mrf.mxu1  ;;  %7218 = vst [vmem:[#allocation25_spill] sm:$0xff] %v5722_v3  ;;  %v5734_v63 = vmul.f32 %v1637_v11, %v5627_v29  ;;  %v1483_v5 = vmul.f32 0.5, %v5634_v21  ;;  %v1540_v29 = vmul.f32 0.70710677, %v1272_v20  ;;  %v7231_v3 = vld [vmem:[#allocation9_spill] sm:$0xff] }
 0x267   : > { %v4639_v35 = vpop.eup %4638  ;;  %v5728_v17 = vmul.f32 %v1658_v50, %v5630_v47  ;;  %v1659_v33 = vadd.f32 1.0, %v4637_v13  ;;  %v1315_v47 = vadd.f32 %v5519_v0, %v5441_v59  ;;  %4656 = verf.f32 %v1548_v27  ;;  %v5752_v13 = vpop.f32.mrf.mxu0 }
 0x268   : > { %v4641_v36 = vpop.eup %4640  ;;  %v5737_v6 = vmul.f32 %v1644_v61, %v5639_v49  ;;  %v1645_v1 = vadd.f32 1.0, %v4639_v35  ;;  %v5746_v11 = vpop.f32.mrf.mxu1  ;;  %v1317_v21 = vadd.f32 %v5531_v7, %v5441_v59  ;;  %4658 = verf.f32 %v1549_v12 }
 0x269   : > { %v4643_v56 = vpop.eup %4642  ;;  %v1666_v61 = vadd.f32 1.0, %v4641_v36  ;;  %4660 = verf.f32 %v1533_v43  ;;  %v5756_v52 = vmul.f32 0.5, %v1272_v20  ;;  %v5759_v55 = vmul.f32 %v1659_v33, %v5645_v14 }
 0x26a   : > { %7219 = vst [vmem:[#allocation26_spill] sm:$0xff] %v5737_v6  ;;  %v4645_v50 = vpop.eup %4644  ;;  %v1652_v35 = vadd.f32 1.0, %v4643_v56  ;;  %v5761_v22 = vmul.f32 0.5, %v1315_v47  ;;  %v1494_v36 = vmul.f32 0.70710677, %v1315_v47  ;;  %v1319_v7 = vadd.f32 %v5543_v16, %v5446_v26  ;;  %v5771_v20 = vpop.f32.mrf.mxu1 }
 0x26b   : > { %v4647_v49 = vpop.eup %4646  ;;  %v5766_v12 = vmul.f32 %v1645_v1, %v5648_v32  ;;  %v1667_v54 = vadd.f32 1.0, %v4645_v50  ;;  %4662 = verf.f32 %v1540_v29  ;;  %v5769_v56 = vmul.f32 0.5, %v5684_v58  ;;  %v1340_v16 = vpop.f32.mrf.mxu0 }
 0x26c   : > { %v4649_v0 = vpop.eup %4648  ;;  %7220 = vst [vmem:[#allocation27_spill] sm:$0xff] %v5761_v22  ;;  %v5774_v43 = vmul.f32 %v1666_v61, %v5655_v39  ;;  %v1495_v33 = vmul.f32 0.70710677, %v1317_v21  ;;  %v5778_v47 = vadd.f32 %v5551_v23, %v5446_v26  ;;  %v5781_v32 = vmul.f32 %v1652_v35, %v5657_v62  ;;  %v7222_v61 = vld [vmem:[#allocation19_spill] sm:$0xff] }
 0x26d   : > { %v4651_v27 = vpop.eup %4650  ;;  %v1674_v14 = vadd.f32 1.0, %v4649_v0  ;;  %v1653_v1 = vadd.f32 1.0, %v4647_v49  ;;  %v5785_v58 = vadd.f32 %v5592_v45, %v5437_v44  ;;  %4664 = verf.f32 %v1494_v36  ;;  %v7225_v35 = vld [vmem:[#allocation15_spill] sm:$0xff] }
 0x26e   : > { %v1675_v50 = vadd.f32 1.0, %v4651_v27  ;;  %v5787_v29 = vmul.f32 0.5, %v1317_v21  ;;  %v1502_v39 = vmul.f32 0.70710677, %v1319_v7  ;;  %v5791_v0 = vadd.f32 %v7222_v61, %v5437_v44  ;;  %v4653_v23 = vpop.eup %4652  ;;  %v5803_v27 = vpop.f32.mrf.mxu1  ;;  %v7227_v61 = vld [vmem:[#allocation10_spill] sm:$0xff] }
 0x26f   : > { %v1731_v15 = vmul.f32 %v1667_v54, %v5675_v9  ;;  %v5795_v62 = vmul.f32 0.5, %v5690_v28  ;;  %v5797_v49 = vmul.f32 0.5, %v1319_v7  ;;  %v5801_v45 = vadd.f32 %v7225_v35, %v5441_v59  ;;  %v1344_v54 = vpop.f32.mrf.mxu0  ;;  %v7228_v35 = vld [vmem:[#allocation17_spill] sm:$0xff] }
 0x270   : > { %7221 = vst [vmem:[#allocation28_spill] sm:$0xff] %v5787_v29  ;;  %7223 = vst [vmem:[#allocation19_spill] sm:$0xff] %v5791_v0  ;;  %v1738_v21 = vmul.f32 %v1674_v14, %v5686_v57  ;;  %4666 = verf.f32 %v1495_v33  ;;  %v1503_v36 = vmul.f32 0.70710677, %v5778_v47  ;;  %v5809_v29 = vadd.f32 %v5643_v25, %v7227_v61  ;;  %v4655_v25 = vpop.eup %4654 }
 0x271   : > { %7224 = vst [vmem:[#allocation29_spill] sm:$0xff] %v5797_v49  ;;  %7226 = vst [vmem:[#allocation15_spill] sm:$0xff] %v5801_v45  ;;  %v5812_v9 = vmul.f32 %v1653_v1, %v5680_v8  ;;  %v1739_v28 = vmul.f32 %v1675_v50, %v1483_v5  ;;  %v1510_v7 = vmul.f32 0.70710677, %v5785_v58  ;;  %v5817_v22 = vadd.f32 %v7228_v35, %v5446_v26  ;;  %v7230_v8 = vld [vmem:[#allocation12_spill] sm:$0xff] }
 0x272   : > { %v1660_v49 = vadd.f32 1.0, %v4653_v23  ;;  %4668 = verf.f32 %v1502_v39  ;;  %v1511_v57 = vmul.f32 0.70710677, %v5791_v0  ;;  %v5822_v14 = vadd.f32 %v5670_v38, %v7227_v61  ;;  %v5834_v39 = vpop.f32.mrf.mxu1 }
 0x273   : > { %7229 = vst [vmem:[#allocation10_spill] sm:$0xff] %v5817_v22  ;;  %v1485_v33 = vmul.f32 0.5, %v5696_v41  ;;  %v5827_v5 = vadd.f32 %v7230_v8, %v5441_v59  ;;  %v1497_v1 = vmul.f32 0.70710677, %v5801_v45  ;;  %v5832_v50 = vadd.f32 %v5641_v10, %v5446_v26  ;;  %v1346_v59 = vpop.f32.mrf.mxu0 }
 0x274   : > { %v4657_v23 = vpop.eup %4656  ;;  %v1770_v35 = vpack.c.bf16 %v1738_v21, %v5774_v43  ;;  %4670 = verf.f32 %v1503_v36  ;;  %v1518_v38 = vmul.f32 0.70710677, %v5809_v29  ;;  %v5840_v41 = vadd.f32 %v5698_v18, %v7231_v3 }
 0x275   : > { %v4659_v8 = vpop.eup %4658  ;;  %4672 = verf.f32 %v1510_v7  ;;  %v1504_v45 = vmul.f32 0.70710677, %v5817_v22  ;;  %v5844_v26 = vadd.f32 %v1340_v16, %v5435_v2  ;;  %v1771_v10 = vpack.c.bf16 %v1739_v28, %v1731_v15  ;;  %v1413_v7 = vpop.f32.mrf.mxu1 }
 0x276   : > { %v4661_v6 = vpop.eup %4660  ;;  %v5847_v0 = vmul.f32 %v1660_v49, %v5739_v51  ;;  %4674 = verf.f32 %v1511_v57  ;;  %v1519_v43 = vmul.f32 0.70710677, %v5822_v14  ;;  %v5851_v21 = vadd.f32 %v1344_v54, %v5558_v42  ;;  %v1348_v49 = vpop.f32.mrf.mxu0 }
 0x277   : > { %v1669_v18 = vadd.f32 1.0, %v4655_v25  ;;  %4676 = verf.f32 %v1497_v1  ;;  %v1505_v36 = vmul.f32 0.70710677, %v5832_v50  ;;  %1809 = vmatprep.subr.bf16.mxu0 %v1771_v10  ;;  %v1763_v16 = vpack.c.bf16 %v5759_v55, %v5725_v48 }
 0x278   : > { %v4663_v15 = vpop.eup %4662  ;;  %v1676_v28 = vadd.f32 1.0, %v4657_v23  ;;  %v1677_v22 = vadd.f32 1.0, %v4659_v8  ;;  %4678 = verf.f32 %v1518_v38  ;;  %v1526_v51 = vmul.f32 0.70710677, %v5840_v41  ;;  %1810 = vmatpush1.bf16.msra.mxu0 %v1770_v35  ;;  %v1417_v38 = vpop.f32.mrf.mxu1 }
 0x279   : > { %4680 = verf.f32 %v1504_v45  ;;  %v5859_v54 = vadd.f32 %v5731_v37, %v7231_v3  ;;  %v1535_v57 = vmul.f32 0.70710677, %v5844_v26  ;;  %1811 = vmatprep.subr.bf16.mxu0 %v1763_v16  ;;  %v5863_v25 = vadd.f32 %v1346_v59, %v5558_v42  ;;  %v1350_v10 = vpop.f32.mrf.mxu0 }
 0x27a   : > { %v1661_v55 = vadd.f32 1.0, %v4661_v6  ;;  %4682 = verf.f32 %v1519_v43  ;;  %v5867_v48 = vadd.f32 %v5752_v13, %v5435_v2  ;;  %v1542_v1 = vmul.f32 0.70710677, %v5851_v21  ;;  %v5870_v23 = vpop.eup %4664 }
 0x27b   : > { %v1668_v45 = vadd.f32 1.0, %v4663_v15  ;;  %v1733_v37 = vmul.f32 %v1669_v18, %v5769_v56  ;;  %4684 = verf.f32 %v1505_v36  ;;  %v1543_v35 = vmul.f32 0.70710677, %v5863_v25 }
 0x27c   : > { %v1741_v8 = vmul.f32 %v1677_v22, %v1485_v33  ;;  %4686 = verf.f32 %v1526_v51  ;;  %v5876_v6 = vadd.f32 %v5659_v31, %v5437_v44  ;;  %v5879_v13 = vadd.f32 %v1348_v49, %v5431_v24 }
 0x27d   : > { %v7232_v59 = vpack.c.bf16 %v5728_v17, %v5714_v53  ;;  %v5884_v43 = vpop.eup %4666  ;;  %v1740_v56 = vmul.f32 %v1676_v28, %v5795_v62  ;;  %v1527_v18 = vmul.f32 0.70710677, %v5859_v54  ;;  %4688 = verf.f32 %v1535_v57 }
 0x27e   : > { %v1755_v22 = vpack.c.bf16 %v5707_v46, %v5665_v34  ;;  %v5892_v31 = vadd.f32 %v5692_v40, %v5437_v44  ;;  %v1534_v33 = vmul.f32 0.70710677, %v5867_v48  ;;  %4690 = verf.f32 %v1542_v1  ;;  %v1419_v44 = vpop.f32.mrf.mxu1  ;;  %v7234_v1 = vld [vmem:[#allocation18_spill] sm:$0xff] }
 0x27f   : > { %1812 = vmatpush1.bf16.msra.mxu0 %v7232_v59  ;;  %v1550_v53 = vmul.f32 0.70710677, %v5879_v13  ;;  %v5896_v17 = vpop.eup %4668  ;;  %v1732_v36 = vmul.f32 %v1668_v45, %v5756_v52  ;;  %v5901_v62 = vadd.f32 %v5746_v11, %v7227_v61  ;;  %4692 = verf.f32 %v1543_v35  ;;  %v7235_v45 = vld [vmem:[#allocation20_spill] sm:$0xff] }
 0x280   : > { %1813 = vmatprep.subr.bf16.mxu0 %v1755_v22  ;;  %v5904_v34 = vadd.f32 %v1350_v10, %v5431_v24  ;;  %v1725_v40 = vmul.f32 %v1661_v55, %v5744_v30  ;;  %v5908_v46 = vadd.f32 %v1413_v7, %v5435_v2  ;;  %v1773_v16 = vpack.c.bf16 %v1741_v8, %v1733_v37  ;;  %v1421_v37 = vpop.f32.mrf.mxu1 }
 0x281   : > { %4694 = verf.f32 %v1550_v53  ;;  %v7233_v52 = vpack.c.bf16 %v5673_v60, %v5653_v4  ;;  %v5913_v15 = vpop.eup %4670  ;;  %v1772_v11 = vpack.c.bf16 %v1740_v56, %v1732_v36  ;;  %v1512_v28 = vmul.f32 0.70710677, %v5876_v6  ;;  %v7237_v36 = vld [vmem:[#allocation16_spill] sm:$0xff] }
 0x282   : > { %4696 = verf.f32 %v1527_v18  ;;  %v1551_v51 = vmul.f32 0.70710677, %v5904_v34  ;;  %v5917_v49 = vpop.eup %4672  ;;  %v5920_v30 = vmul.f32 0.5, %v5778_v47  ;;  %v5923_v7 = vmul.f32 0.5, %v5785_v58  ;;  %1852 = vmatprep.subr.bf16.mxu1 %v1773_v16 }
 0x283   : > { %1814 = vmatpush1.bf16.msra.mxu0 %v7233_v52  ;;  %v1513_v57 = vmul.f32 0.70710677, %v5892_v31  ;;  %4698 = verf.f32 %v1534_v33  ;;  %v5926_v4 = vpop.eup %4674  ;;  %v1521_v60 = vmul.f32 0.70710677, %v5901_v62  ;;  %v5930_v55 = vadd.f32 %v1417_v38, %v5558_v42  ;;  %1853 = vmatpush1.bf16.msra.mxu1 %v1772_v11  ;;  %v7236_v33 = vld [vmem:[#allocation14_spill] sm:$0xff] }
 0x284   : > { %4700 = verf.f32 %v1551_v51  ;;  %v1747_v47 = vpack.c.bf16 %v7235_v45, %v7234_v1  ;;  %v5934_v35 = vpop.eup %4676  ;;  %v5938_v58 = vadd.f32 %v5803_v27, %v7231_v3  ;;  %v5942_v8 = vadd.f32 %v5834_v39, %v5435_v2 }
 0x285   : > { %v1537_v59 = vmul.f32 0.70710677, %v5908_v46  ;;  %v1765_v38 = vpack.c.bf16 %v1725_v40, %v5812_v9  ;;  %v5946_v10 = vpop.eup %4678  ;;  %v1764_v56 = vpack.c.bf16 %v5847_v0, %v5781_v32  ;;  %v5951_v18 = vmul.f32 0.70710677, %v5827_v5 }
 0x286   : > { %4702 = verf.f32 %v1512_v28  ;;  %v1544_v27 = vmul.f32 0.70710677, %v5930_v55  ;;  %1815 = vmatprep.subr.bf16.mxu0 %v1747_v47  ;;  %v5954_v22 = vpop.eup %4680  ;;  %v5958_v2 = vadd.f32 %v5719_v19, %v7227_v61  ;;  %v5961_v9 = vadd.f32 %v1419_v44, %v5558_v42  ;;  %v1423_v19 = vpop.f32.mrf.mxu1  ;;  %v7239_v28 = vld [vmem:[#allocation13_spill] sm:$0xff] }
 0x287   : > { %4704 = verf.f32 %v1513_v57  ;;  %1854 = vmatprep.subr.bf16.mxu1 %v1765_v38  ;;  %v5964_v32 = vadd.f32 %v1421_v37, %v5431_v24  ;;  %v5966_v0 = vpop.eup %4682  ;;  %v5970_v39 = vadd.f32 %v5771_v20, %v7231_v3  ;;  %v1618_v53 = vadd.f32 1.0, %v7236_v33  ;;  %v7238_v20 = vld [vmem:[#allocation11_spill] sm:$0xff] }
 0x288   : > { %4706 = verf.f32 %v1521_v60  ;;  %v1626_v40 = vadd.f32 1.0, %v7237_v36  ;;  %1855 = vmatpush1.bf16.msra.mxu1 %v1764_v56  ;;  %v5974_v61 = vpop.eup %4684  ;;  %v1529_v42 = vmul.f32 0.70710677, %v5938_v58  ;;  %v1536_v44 = vmul.f32 0.70710677, %v5942_v8  ;;  %v7240_v37 = vld [vmem:[#allocation19_spill] sm:$0xff] }
 0x289   : > { %4708 = verf.f32 %v1537_v59  ;;  %v1545_v16 = vmul.f32 0.70710677, %v5961_v9  ;;  %v5979_v52 = vpop.eup %4686  ;;  %v1552_v3 = vmul.f32 0.70710677, %v5964_v32  ;;  %v1682_v11 = vmul.f32 %v1618_v53, %v7238_v20  ;;  %v5997_v53 = vld [vmem:[%s5140_s1] sm:$0xff]   ;;  %v7244_v20 = vld [vmem:[#allocation25_spill] sm:$0xff] }
 0x28a   : > { %4710 = verf.f32 %v1544_v27  ;;  %v1690_v51 = vmul.f32 %v1626_v40, %v7239_v28  ;;  %v4689_v57 = vpop.eup %4688  ;;  %v1630_v60 = vadd.f32 1.0, %v5896_v17  ;;  %v1757_v1 = vpack.c.bf16 %v5766_v12, %v5734_v63  ;;  %v7241_v63 = vld [vmem:[#allocation22_spill] sm:$0xff] }
 0x28b   : > { %4712 = verf.f32 %v1545_v16  ;;  %v5988_v45 = vadd.f32 %v1423_v19, %v5431_v24  ;;  %v4691_v47 = vpop.eup %4690  ;;  %v5991_v59 = vmul.f32 0.5, %v7240_v37  ;;  %v1528_v38 = vmul.f32 0.70710677, %v5970_v39  ;;  %v7242_v24 = vld [vmem:[#allocation24_spill] sm:$0xff] }
 0x28c   : > { %4714 = verf.f32 %v1552_v3  ;;  %v1746_v56 = vpack.c.bf16 %v1690_v51, %v1682_v11  ;;  %v4693_v27 = vpop.eup %4692  ;;  %v1520_v33 = vmul.f32 0.70710677, %v5958_v2  ;;  %1856 = vmatprep.subr.bf16.mxu1 %v1757_v1  ;;  %v1749_v12 = vpack.c.bf16 %v7242_v24, %v7241_v63  ;;  %v7243_v3 = vld [vmem:[#allocation26_spill] sm:$0xff]  ;;  %v7246_v51 = vld [vmem:[#allocation29_spill] sm:$0xff] }
 0x28d   : > { %4716 = verf.f32 %v1529_v42  ;;  %v1553_v17 = vmul.f32 0.70710677, %v5988_v45  ;;  %v1622_v40 = vadd.f32 1.0, %v5870_v23  ;;  %v1454_v19 = vmul.f32 0.5, %v5809_v29 }
 0x28e   : > { %v4695_v36 = vpop.eup %4694  ;;  %v1455_v16 = vmul.f32 0.5, %v5822_v14  ;;  %4718 = verf.f32 %v1536_v44  ;;  %1816 = vmatpush1.bf16.msra.mxu0 %v1746_v56  ;;  %v7245_v42 = vpack.c.bf16 %v7243_v3, %v7244_v20  ;;  %v1623_v28 = vadd.f32 1.0, %v5884_v43 }
 0x28f   : > { %v4697_v11 = vpop.eup %4696  ;;  %v6009_v1 = vmul.f32 %v1630_v60, %v7246_v51  ;;  %v1678_v37 = vadd.f32 1.0, %v4695_v36  ;;  %4720 = verf.f32 %v1553_v17  ;;  %v1463_v29 = vmul.f32 0.5, %v5859_v54  ;;  %v7247_v54 = vld [vmem:[#allocation23_spill] sm:$0xff] }
 0x290   : > { %1857 = vmatpush1.bf16.msra.mxu1 %v7245_v42  ;;  %v4699_v23 = vpop.eup %4698  ;;  %v1663_v63 = vadd.f32 1.0, %v4689_v57  ;;  %4722 = verf.f32 %v1528_v38  ;;  %v1671_v14 = vadd.f32 1.0, %v4693_v27  ;;  %v1471_v56 = vmul.f32 0.5, %v5844_v26  ;;  %v7248_v57 = vld [vmem:[#allocation21_spill] sm:$0xff] }
 0x291   : > { %1858 = vmatprep.subr.bf16.mxu1 %v1749_v12  ;;  %v4701_v44 = vpop.eup %4700  ;;  %4724 = verf.f32 %v1520_v33  ;;  %v1670_v24 = vadd.f32 1.0, %v4691_v47  ;;  %v1486_v3 = vmul.f32 0.5, %v5879_v13  ;;  %4196 = vmatmul.mubr.msk.bf16.vlgmr.msra.gmra.mxu0 %vm1797_vm1, %v5997_v53  ;;  %v1655_v43 = vadd.f32 1.0, %v4697_v11 }
 0x292   : > { %v1479_v60 = vmul.f32 0.5, %v5863_v25  ;;  %v1487_v17 = vmul.f32 0.5, %v5904_v34  ;;  %v1679_v12 = vadd.f32 1.0, %v4701_v44  ;;  %v7249_v38 = vpack.c.bf16 %v7247_v54, %v7248_v57 }
 0x293   : > { %v7250_v27 = vmov 0   ;;  %v6022_v33 = vpop.eup %4702  ;;  %v1646_v26 = vadd.f32 1.0, %v5946_v10  ;;  %v1662_v13 = vadd.f32 1.0, %v4699_v23  ;;  %v1478_v47 = vmul.f32 0.5, %v5851_v21 }
 0x294   : > { %1859 = vmatpush1.bf16.msra.mxu1 %v7249_v38  ;;  %1919 = vmatprep.mubr.bf16.mxu0 %v7250_v27  ;;  %v1742_v36 = vmul.f32 %v1678_v37, %v1486_v3  ;;  %v6026_v20 = vpop.eup %4704  ;;  %v1647_v25 = vadd.f32 1.0, %v5966_v0  ;;  %v1727_v34 = vmul.f32 %v1663_v63, %v1471_v56  ;;  %v1735_v42 = vmul.f32 %v1671_v14, %v1479_v60 }
 0x295   : > { %v1743_v11 = vmul.f32 %v1679_v12, %v1487_v17  ;;  %v4707_v51 = vpop.eup %4706  ;;  %v1638_v44 = vadd.f32 1.0, %v5917_v49  ;;  %v1654_v54 = vadd.f32 1.0, %v5979_v52  ;;  %v1470_v57 = vmul.f32 0.5, %v5867_v48 }
 0x296   : > { %v1734_v38 = vmul.f32 %v1670_v24, %v1478_v47  ;;  %v4709_v21 = vpop.eup %4708  ;;  %v1631_v10 = vadd.f32 1.0, %v5913_v15  ;;  %v1639_v37 = vadd.f32 1.0, %v5926_v4  ;;  %v1719_v0 = vmul.f32 %v1655_v43, %v1463_v29  ;;  %v7251_v24 = vld [vmem:[#allocation27_spill] sm:$0xff]  ;;  %v7252_v29 = vld [vmem:[#allocation28_spill] sm:$0xff] }
 0x297   : > { %4197 = vmatmul.mubr.msk.bf16.vlgmr.msra.gmra.mxu1 %vm1797_vm1, %v5997_v53  ;;  %v1775_v23 = vpack.c.bf16 %v1743_v11, %v1735_v42  ;;  %v4711_v63 = vpop.eup %4710  ;;  %v1710_v14 = vmul.f32 %v1646_v26, %v1454_v19  ;;  %v1462_v49 = vmul.f32 0.5, %v5840_v41  ;;  %v1726_v52 = vmul.f32 %v1662_v13, %v1470_v57 }
 0x298   : > { %1962 = vmatprep.mubr.bf16.mxu1 %v7250_v27  ;;  %v1774_v56 = vpack.c.bf16 %v1742_v36, %v1734_v38  ;;  %v4713_v48 = vpop.eup %4712  ;;  %v6039_v3 = vmul.f32 %v1622_v40, %v7251_v24  ;;  %4726 = verf.f32 %v5951_v18  ;;  %v1711_v60 = vmul.f32 %v1647_v25, %v1455_v16 }
 0x299   : > { %1895 = vmatprep.subr.bf16.mxu0 %v1775_v23  ;;  %v1767_v15 = vpack.c.bf16 %v1727_v34, %v1719_v0  ;;  %v4715_v4 = vpop.eup %4714  ;;  %v1687_v43 = vmul.f32 %v1623_v28, %v7252_v29  ;;  %v1702_v17 = vmul.f32 %v1638_v44, %v5923_v7  ;;  %v1718_v12 = vmul.f32 %v1654_v54, %v1462_v49 }
 0x29a   : > { %1896 = vmatpush1.bf16.msra.mxu0 %v1774_v56  ;;  %v4717_v19 = vpop.eup %4716  ;;  %v1750_v41 = vpack.c.bf16 %v6009_v1, %v6039_v3  ;;  %v1695_v26 = vmul.f32 %v1631_v10, %v5920_v30  ;;  %v1703_v40 = vmul.f32 %v1639_v37, %v5991_v59  ;;  %v1680_v13 = vadd.f32 1.0, %v4715_v4 }
 0x29b   : > { %1897 = vmatprep.subr.bf16.mxu0 %v1767_v15  ;;  %v4719_v18 = vpop.eup %4718  ;;  %v1758_v16 = vpack.c.bf16 %v1710_v14, %v1702_v17  ;;  %v1766_v47 = vpack.c.bf16 %v1726_v52, %v1718_v12  ;;  %v1665_v36 = vadd.f32 1.0, %v4709_v21  ;;  %v1673_v25 = vadd.f32 1.0, %v4713_v48 }
 0x29c   : > { %v4721_v28 = vpop.eup %4720  ;;  %v1473_v7 = vmul.f32 0.5, %v5908_v46  ;;  %v1672_v34 = vadd.f32 1.0, %v4711_v63  ;;  %v1488_v42 = vmul.f32 0.5, %v5964_v32  ;;  %v1759_v11 = vpack.c.bf16 %v1711_v60, %v1703_v40 }
 0x29d   : > { %v4723_v44 = vpop.eup %4722  ;;  %v1657_v1 = vadd.f32 1.0, %v4717_v19  ;;  %v1481_v30 = vmul.f32 0.5, %v5961_v9  ;;  %v1489_v59 = vmul.f32 0.5, %v5988_v45  ;;  %v1681_v54 = vadd.f32 1.0, %v4721_v28  ;;  %v6075_v28 = vpop.permute.xlu1 %1784 }
 0x29e   : > { %1898 = vmatpush1.bf16.msra.mxu0 %v1766_v47  ;;  %v4725_v57 = vpop.eup %4724  ;;  %v1465_v38 = vmul.f32 0.5, %v5938_v58  ;;  %v1664_v21 = vadd.f32 1.0, %v4719_v18  ;;  %v1480_v10 = vmul.f32 0.5, %v5930_v55  ;;  %v1744_v37 = vmul.f32 %v1680_v13, %v1488_v42  ;;  %v7254_v18 = vld [vmem:[#allocation10_spill] sm:$0xff] }
 0x29f   : > { %1899 = vmatprep.subr.bf16.mxu0 %v1759_v11  ;;  %v1649_v46 = vadd.f32 1.0, %v4707_v51  ;;  %v1729_v0 = vmul.f32 %v1665_v36, %v1473_v7  ;;  %v1737_v32 = vmul.f32 %v1673_v25, %v1481_v30  ;;  %v1745_v23 = vmul.f32 %v1681_v54, %v1489_v59  ;;  %v4888_v11 = vld [vmem:[#allocation2 + $0x30] sm:$0xff] }
 0x2a0   : > { %v1656_v63 = vadd.f32 1.0, %v4723_v44  ;;  %v1472_v14 = vmul.f32 0.5, %v5942_v8  ;;  %v1736_v9 = vmul.f32 %v1672_v34, %v1480_v10  ;;  %v1751_v49 = vpack.c.bf16 %v1695_v26, %v1687_v43  ;;  %v7253_v26 = vld [vmem:[#allocation15_spill] sm:$0xff] }
 0x2a1   : > { %v1641_v45 = vadd.f32 1.0, %v6026_v20  ;;  %v1457_v52 = vmul.f32 0.5, %v5901_v62  ;;  %v1721_v56 = vmul.f32 %v1657_v1, %v1465_v38  ;;  %v1777_v58 = vpack.c.bf16 %v1745_v23, %v1737_v32  ;;  %v4889_v38 = vld [vmem:[#allocation2] sm:$0xff] }
 0x2a2   : > { %1900 = vmatpush1.bf16.msra.mxu0 %v1758_v16  ;;  %v1648_v48 = vadd.f32 1.0, %v4725_v57  ;;  %v1464_v55 = vmul.f32 0.5, %v5970_v39  ;;  %v1728_v24 = vmul.f32 %v1664_v21, %v1472_v14  ;;  %v1776_v51 = vpack.c.bf16 %v1744_v37, %v1736_v9 }
 0x2a3   : > { %1901 = vmatprep.subr.bf16.mxu0 %v1751_v49  ;;  %v1633_v3 = vadd.f32 1.0, %v5974_v61  ;;  %v1449_v60 = vmul.f32 0.5, %v5892_v31  ;;  %v1713_v8 = vmul.f32 %v1649_v46, %v1457_v52  ;;  %1938 = vmatprep.subr.bf16.mxu1 %v1777_v58  ;;  %v1769_v15 = vpack.c.bf16 %v1729_v0, %v1721_v56  ;;  %v4890_v46 = vld [vmem:[#allocation2 + $0x18] sm:$0xff]  ;;  %v4892_v49 = vld [vmem:[#allocation2 + $0x68] sm:$0xff]  ;;  %v4893_v56 = vld [vmem:[#allocation2 + $0x50] sm:$0xff] }
 0x2a4   : > { %v1640_v20 = vadd.f32 1.0, %v6022_v33  ;;  %v1456_v62 = vmul.f32 0.5, %v5958_v2  ;;  %v1720_v4 = vmul.f32 %v1656_v63, %v1464_v55  ;;  %1939 = vmatpush1.bf16.msra.mxu1 %v1776_v51  ;;  %v1625_v43 = vadd.f32 1.0, %v5934_v35  ;;  %v4891_v63 = vld [vmem:[#allocation2 + $0x58] sm:$0xff]  ;;  %v4894_v55 = vld [vmem:[#allocation2 + $0x48] sm:$0xff] }
 0x2a5   : > { %v4727_v29 = vpop.eup %4726  ;;  %v1441_v39 = vmul.f32 0.5, %v5832_v50  ;;  %v1705_v17 = vmul.f32 %v1641_v45, %v1449_v60  ;;  %1940 = vmatprep.subr.bf16.mxu1 %v1769_v15  ;;  %v1632_v61 = vadd.f32 1.0, %v5954_v22  ;;  %v1448_v31 = vmul.f32 0.5, %v5876_v6  ;;  %v4895_v51 = vld [vmem:[#allocation2 + $0x8] sm:$0xff] }
 0x2a6   : > { %1902 = vmatpush1.bf16.msra.mxu0 %v1750_v41  ;;  %v1712_v12 = vmul.f32 %v1648_v48, %v1456_v62  ;;  %v1768_v19 = vpack.c.bf16 %v1728_v24, %v1720_v4  ;;  %v1433_v33 = vmul.f32 0.5, %v7253_v26  ;;  %v1624_v13 = vadd.f32 1.0, %v4727_v29  ;;  %v4899_v26 = vld [vmem:[#allocation2 + $0x38] sm:$0xff] }
 0x2a7   : > { %v1697_v40 = vmul.f32 %v1633_v3, %v1441_v39  ;;  %v1761_v2 = vpack.c.bf16 %v1713_v8, %v1705_v17  ;;  %v1440_v16 = vmul.f32 0.5, %v7254_v18  ;;  %v1704_v47 = vmul.f32 %v1640_v20, %v1448_v31  ;;  %v4896_v20 = vld [vmem:[#allocation2 + $0x40] sm:$0xff]  ;;  %v4897_v17 = vld [vmem:[#allocation2 + $0x10] sm:$0xff] }
 0x2a8   : > { %1941 = vmatpush1.bf16.msra.mxu1 %v1768_v19  ;;  %v1689_v50 = vmul.f32 %v1625_v43, %v1433_v33  ;;  %v1432_v6 = vmul.f32 0.5, %v5827_v5  ;;  %v6078_v5 = vpop.permute.xlu0 %1789  ;;  %v4898_v31 = vld [vmem:[#allocation2 + $0x20] sm:$0xff] }
 0x2a9   : > { %4198 = vmatmul.mubr.msk.bf16.vlgmr.msra.gmra.mxu0 %vm1797_vm1, %v5997_v53  ;;  %1942 = vmatprep.subr.bf16.mxu1 %v1761_v2  ;;  %v1696_v35 = vmul.f32 %v1632_v61, %v1440_v16  ;;  %v1760_v22 = vpack.c.bf16 %v1712_v12, %v1704_v47  ;;  %v4900_v18 = vld [vmem:[#allocation2 + $0x60] sm:$0xff] }
 0x2aa   : > { %2465 = vmatprep.mubr.bf16.mxu0 %v7250_v27  ;;  %v1753_v41 = vpack.c.bf16 %v1697_v40, %v1689_v50  ;;  %v1688_v36 = vmul.f32 %v1624_v13, %v1432_v6 }
 0x2ac   : > { %1943 = vmatpush1.bf16.msra.mxu1 %v1760_v22  ;;  %v1752_v25 = vpack.c.bf16 %v1696_v35, %v1688_v36  ;;  %v4901_v22 = vld [vmem:[#allocation2 + $0x78] sm:$0xff]  ;;  %v4902_v36 = vld [vmem:[#allocation2 + $0x70] sm:$0xff] }
 0x2ad   : > { %1944 = vmatprep.subr.bf16.mxu1 %v1753_v41 }
 0x2b0   : > { %1945 = vmatpush1.bf16.msra.mxu1 %v1752_v25 }
 0x2b3   : > { %4199 = vmatmul.mubr.msk.bf16.vlgmr.msra.gmra.mxu1 %vm1797_vm1, %v5997_v53 }
 0x2b4   : > { %2578 = vmatprep.mubr.bf16.mxu1 %v7250_v27 }
 0x351   : > { %v1835_v7 = vpop.f32.mrf.mxu0 }
 0x352   : > { %v1836_v34 = vadd.f32 %v1835_v7, %v6075_v28 }
 0x353   : > { %v1837_v42 = vpop.f32.mrf.mxu0 }
 0x354   : > { %v6080_v44 = vadd.f32 %v4888_v11, %v1836_v34  ;;  %v1838_v57 = vadd.f32 %v1837_v42, %v6075_v28  ;;  %v4488_v42 = vld [vmem:[%s5160_s26 + $0xe0] ss:$16 sps:$4 sm:$0xff]   ;;  %v4490_v11 = vld [vmem:[%s5160_s26 + $0xe4] ss:$16 sps:$4 sm:$0xff]  }
 0x355   : > { %v1839_v1 = vpop.f32.mrf.mxu0  ;;  %2433 = vmatprep.subr.bf16.mxu0 %v4490_v11 }
 0x356   : > { %v1840_v59 = vadd.f32 %v1839_v1, %v6078_v5  ;;  %1991 = vadd.xlane.f32.xlu1 %v6080_v44  ;;  %v6092_v14 = vadd.f32 %v4891_v63, %v1838_v57  ;;  %v4491_v1 = vld [vmem:[%s5160_s26 + $0xe8] ss:$16 sps:$4 sm:$0xff]   ;;  %2434 = vmatpush1.bf16.msra.mxu0 %v4488_v42 }
 0x357   : > { %v1878_v30 = vpop.f32.mrf.mxu1  ;;  %v1841_v53 = vpop.f32.mrf.mxu0 }
 0x358   : > { %v6085_v21 = vadd.f32 %v4889_v38, %v1840_v59  ;;  %v1842_v10 = vadd.f32 %v1841_v53, %v6078_v5  ;;  %v1879_v9 = vadd.f32 %v1878_v30, %v6075_v28  ;;  %v4493_v30 = vld [vmem:[%s5160_s26 + $0xec] ss:$16 sps:$4 sm:$0xff]  }
 0x359   : > { %v1880_v54 = vpop.f32.mrf.mxu1  ;;  %2546 = vmatprep.subr.bf16.mxu1 %v4493_v30 }
 0x35a   : > { %v6088_v0 = vadd.f32 %v4890_v46, %v1842_v10  ;;  %1993 = vadd.xlane.f32.xlu0 %v6085_v21  ;;  %v6100_v58 = vadd.f32 %v4893_v56, %v1879_v9  ;;  %v1881_v48 = vadd.f32 %v1880_v54, %v6075_v28  ;;  %2547 = vmatpush1.bf16.msra.mxu1 %v4491_v1 }
 0x35b   : > { %v1882_v37 = vpop.f32.mrf.mxu1 }
 0x35c   : > { %v1883_v32 = vadd.f32 %v1882_v37, %v6078_v5  ;;  %1997 = vadd.xlane.f32.xlu1 %v6088_v0  ;;  %7256 = vst [vmem:[#allocation12_spill] sm:$0xff] %v6100_v58  ;;  %v6107_v3 = vadd.f32 %v4895_v51, %v1881_v48 }
 0x35d   : > { %v1884_v23 = vpop.f32.mrf.mxu1 }
 0x35e   : > { %v6096_v45 = vadd.f32 %v4892_v49, %v1883_v32  ;;  %1995 = vadd.xlane.f32.xlu0 %v6092_v14  ;;  %v1885_v52 = vadd.f32 %v1884_v23, %v6078_v5  ;;  %7258 = vst [vmem:[#allocation18_spill] sm:$0xff] %v6107_v3 }
 0x360   : > { %7255 = vst [vmem:[#allocation17_spill] sm:$0xff] %v6096_v45  ;;  %2001 = vadd.xlane.f32.xlu1 %v6096_v45  ;;  %v6104_v24 = vadd.f32 %v4894_v55, %v1885_v52 }
 0x362   : > { %7257 = vst [vmem:[#allocation9_spill] sm:$0xff] %v6104_v24  ;;  %1999 = vadd.xlane.f32.xlu0 %v6100_v58 }
 0x364   : > { %2005 = vadd.xlane.f32.xlu1 %v6104_v24 }
 0x366   : > { %2003 = vadd.xlane.f32.xlu0 %v6107_v3 }
 0x369   : > { %v1921_v60 = vpop.f32.mrf.mxu0 }
 0x36a   : > { %v1922_v8 = vadd.f32 %v1921_v60, %v6075_v28 }
 0x36b   : > { %v1923_v15 = vpop.f32.mrf.mxu0 }
 0x36c   : > { %v6112_v62 = vadd.f32 %v4896_v20, %v1922_v8  ;;  %v1924_v4 = vadd.f32 %v1923_v15, %v6075_v28 }
 0x36d   : > { %v1925_v29 = vpop.f32.mrf.mxu0 }
 0x36e   : > { %7259 = vst [vmem:[#allocation20_spill] sm:$0xff] %v6112_v62  ;;  %v1926_v43 = vadd.f32 %v1925_v29, %v6078_v5  ;;  %2007 = vadd.xlane.f32.xlu0 %v6112_v62  ;;  %v6117_v61 = vadd.f32 %v4897_v17, %v1924_v4 }
 0x36f   : > { %v1927_v39 = vpop.f32.mrf.mxu0 }
 0x370   : > { %7260 = vst [vmem:[#allocation14_spill] sm:$0xff] %v6117_v61  ;;  %v6119_v12 = vadd.f32 %v4898_v31, %v1926_v43  ;;  %v1928_v19 = vadd.f32 %v1927_v39, %v6078_v5 }
 0x372   : > { %7261 = vst [vmem:[#allocation16_spill] sm:$0xff] %v6119_v12  ;;  %2011 = vadd.xlane.f32.xlu0 %v6117_v61  ;;  %2009 = vadd.xlane.f32.xlu1 %v6119_v12  ;;  %v6124_v33 = vadd.f32 %v4899_v26, %v1928_v19 }
 0x373   : > { %v1964_v40 = vpop.f32.mrf.mxu1 }
 0x374   : > { %7262 = vst [vmem:[#allocation11_spill] sm:$0xff] %v6124_v33  ;;  %v1965_v2 = vadd.f32 %v1964_v40, %v6075_v28 }
 0x375   : > { %v1966_v13 = vpop.f32.mrf.mxu1 }
 0x376   : > { %2013 = vadd.xlane.f32.xlu1 %v6124_v33  ;;  %v6128_v16 = vadd.f32 %v4900_v18, %v1965_v2  ;;  %v1967_v47 = vadd.f32 %v1966_v13, %v6075_v28  ;;  %v4903_v28 = vld [vmem:[#allocation2 + $0x28] sm:$0xff]  ;;  %v4494_v2 = vld [vmem:[%s5160_s26 + $0xc0] ss:$16 sps:$4 sm:$0xff]   ;;  %v4496_v13 = vld [vmem:[%s5160_s26 + $0xc4] ss:$16 sps:$4 sm:$0xff]  }
 0x377   : > { %v1968_v50 = vpop.f32.mrf.mxu1  ;;  %v4497_v18 = vld [vmem:[%s5160_s26 + $0xc8] ss:$16 sps:$4 sm:$0xff]   ;;  %2435 = vmatprep.subr.bf16.mxu0 %v4496_v13 }
 0x378   : > { %7263 = vst [vmem:[#allocation13_spill] sm:$0xff] %v6128_v16  ;;  %v1969_v6 = vadd.f32 %v1968_v50, %v6078_v5  ;;  %2015 = vadd.xlane.f32.xlu0 %v6128_v16  ;;  %v6133_v41 = vadd.f32 %v4901_v22, %v1967_v47  ;;  %v4499_v47 = vld [vmem:[%s5160_s26 + $0xcc] ss:$16 sps:$4 sm:$0xff]   ;;  %2436 = vmatpush1.bf16.msra.mxu0 %v4494_v2  ;;  %v4502_v22 = vld [vmem:[%s5160_s26 + $0xa4] ss:$16 sps:$4 sm:$0xff]  }
 0x379   : > { %v1970_v35 = vpop.f32.mrf.mxu1  ;;  %2548 = vmatprep.subr.bf16.mxu1 %v4499_v47  ;;  %2437 = vmatprep.subr.bf16.mxu0 %v4502_v22  ;;  %v4521_v47 = vld [vmem:[%s5160_s26 + $0x48] ss:$16 sps:$4 sm:$0xff]  }
 0x37a   : > { %7264 = vst [vmem:[#allocation19_spill] sm:$0xff] %v6133_v41  ;;  %v6135_v25 = vadd.f32 %v4902_v36, %v1969_v6  ;;  %v1971_v7 = vadd.f32 %v1970_v35, %v6078_v5  ;;  %2549 = vmatpush1.bf16.msra.mxu1 %v4497_v18  ;;  %v4500_v35 = vld [vmem:[%s5160_s26 + $0xa0] ss:$16 sps:$4 sm:$0xff]   ;;  %v4503_v36 = vld [vmem:[%s5160_s26 + $0xa8] ss:$16 sps:$4 sm:$0xff]  }
 0x37c   : > { %7265 = vst [vmem:[#allocation22_spill] sm:$0xff] %v6135_v25  ;;  %2019 = vadd.xlane.f32.xlu0 %v6133_v41  ;;  %2017 = vadd.xlane.f32.xlu1 %v6135_v25  ;;  %v6140_v34 = vadd.f32 %v4903_v28, %v1971_v7  ;;  %v4505_v28 = vld [vmem:[%s5160_s26 + $0xac] ss:$16 sps:$4 sm:$0xff]  }
 0x37d   : > { %2550 = vmatprep.subr.bf16.mxu1 %v4505_v28  ;;  %2438 = vmatpush1.bf16.msra.mxu0 %v4500_v35  ;;  %v4529_v35 = vld [vmem:[%s5160_s26 + $0x2c] ss:$16 sps:$4 sm:$0xff]  }
 0x37e   : > { %7266 = vst [vmem:[#allocation24_spill] sm:$0xff] %v6140_v34  ;;  %2551 = vmatpush1.bf16.msra.mxu1 %v4503_v36 }
 0x380   : > { %2021 = vadd.xlane.f32.xlu1 %v6140_v34 }
 0x3df   : > { %v1992_v59 = vpop.xlane.xlu1 %1991 }
 0x3e0   : > { %v2023_v53 = vmul.f32 0.0078125, %v1992_v59 }
 0x3e2   : > { %v6148_v5 = vsub.f32 %v6080_v44, %v2023_v53 }
 0x3e3   : > { %v1994_v54 = vpop.xlane.xlu0 %1993 }
 0x3e4   : > { %v2024_v57 = vmul.f32 0.0078125, %v1994_v54  ;;  %v2055_v38 = vmul.f32 %v6148_v5, %v6148_v5 }
 0x3e5   : > { %v1998_v10 = vpop.xlane.xlu1 %1997 }
 0x3e6   : > { %v6153_v37 = vsub.f32 %v6085_v21, %v2024_v57  ;;  %v2026_v46 = vmul.f32 0.0078125, %v1998_v10  ;;  %2071 = vadd.xlane.f32.xlu0 %v2055_v38  ;;  %v4506_v57 = vld [vmem:[%s5160_s26 + $0x80] ss:$16 sps:$4 sm:$0xff]   ;;  %v4508_v38 = vld [vmem:[%s5160_s26 + $0x84] ss:$16 sps:$4 sm:$0xff]  }
 0x3e7   : > { %v1996_v32 = vpop.xlane.xlu0 %1995  ;;  %2439 = vmatprep.subr.bf16.mxu0 %v4508_v38  ;;  %v4535_v38 = vld [vmem:[%s5160_s26 + $0xc] ss:$16 sps:$4 sm:$0xff]  }
 0x3e8   : > { %v6156_v23 = vsub.f32 %v6088_v0, %v2026_v46  ;;  %v2025_v63 = vmul.f32 0.0078125, %v1996_v32  ;;  %v2056_v9 = vmul.f32 %v6153_v37, %v6153_v37  ;;  %v4509_v46 = vld [vmem:[%s5160_s26 + $0x88] ss:$16 sps:$4 sm:$0xff]   ;;  %v4511_v32 = vld [vmem:[%s5160_s26 + $0x8c] ss:$16 sps:$4 sm:$0xff]   ;;  %2440 = vmatpush1.bf16.msra.mxu0 %v4506_v57 }
 0x3e9   : > { %v2002_v49 = vpop.xlane.xlu1 %2001  ;;  %2552 = vmatprep.subr.bf16.mxu1 %v4511_v32  ;;  %v4532_v57 = vld [vmem:[%s5160_s26 + $0x4] ss:$16 sps:$4 sm:$0xff]  }
 0x3ea   : > { %v6161_v52 = vsub.f32 %v6092_v14, %v2025_v63  ;;  %2073 = vadd.xlane.f32.xlu1 %v2056_v9  ;;  %v2028_v56 = vmul.f32 0.0078125, %v2002_v49  ;;  %v2058_v8 = vmul.f32 %v6156_v23, %v6156_v23  ;;  %2553 = vmatpush1.bf16.msra.mxu1 %v4509_v46  ;;  %v4530_v46 = vld [vmem:[%s5160_s26] ss:$16 sps:$4 sm:$0xff]  }
 0x3eb   : > { %v2000_v48 = vpop.xlane.xlu0 %1999 }
 0x3ec   : > { %v2027_v55 = vmul.f32 0.0078125, %v2000_v48  ;;  %v6164_v51 = vsub.f32 %v6096_v45, %v2028_v56  ;;  %v2057_v60 = vmul.f32 %v6161_v52, %v6161_v52 }
 0x3ed   : > { %v2006_v15 = vpop.xlane.xlu1 %2005 }
 0x3ee   : > { %v6171_v20 = vsub.f32 %v6100_v58, %v2027_v55  ;;  %2075 = vadd.xlane.f32.xlu0 %v2057_v60  ;;  %2077 = vadd.xlane.f32.xlu1 %v2058_v8  ;;  %v2030_v4 = vmul.f32 0.0078125, %v2006_v15  ;;  %v2060_v29 = vmul.f32 %v6164_v51, %v6164_v51  ;;  %v4512_v55 = vld [vmem:[%s5160_s26 + $0x60] ss:$16 sps:$4 sm:$0xff]   ;;  %v4514_v60 = vld [vmem:[%s5160_s26 + $0x64] ss:$16 sps:$4 sm:$0xff]  }
 0x3ef   : > { %v2004_v43 = vpop.xlane.xlu0 %2003  ;;  %v4515_v15 = vld [vmem:[%s5160_s26 + $0x68] ss:$16 sps:$4 sm:$0xff]   ;;  %2441 = vmatprep.subr.bf16.mxu0 %v4514_v60 }
 0x3f0   : > { %v2029_v39 = vmul.f32 0.0078125, %v2004_v43  ;;  %v6176_v17 = vsub.f32 %v6104_v24, %v2030_v4  ;;  %v2059_v31 = vmul.f32 %v6171_v20, %v6171_v20  ;;  %v4517_v4 = vld [vmem:[%s5160_s26 + $0x6c] ss:$16 sps:$4 sm:$0xff]   ;;  %2442 = vmatpush1.bf16.msra.mxu0 %v4512_v55 }
 0x3f1   : > { %2554 = vmatprep.subr.bf16.mxu1 %v4517_v4 }
 0x3f2   : > { %v6181_v19 = vsub.f32 %v6107_v3, %v2029_v39  ;;  %2079 = vadd.xlane.f32.xlu0 %v2059_v31  ;;  %2081 = vadd.xlane.f32.xlu1 %v2060_v29  ;;  %v2062_v26 = vmul.f32 %v6176_v17, %v6176_v17 }
 0x3f3   : > { %2555 = vmatpush1.bf16.msra.mxu1 %v4515_v15 }
 0x3f4   : > { %v2061_v40 = vmul.f32 %v6181_v19, %v6181_v19 }
 0x3f6   : > { %2083 = vadd.xlane.f32.xlu0 %v2061_v40  ;;  %2085 = vadd.xlane.f32.xlu1 %v2062_v26  ;;  %v4518_v26 = vld [vmem:[%s5160_s26 + $0x40] ss:$16 sps:$4 sm:$0xff]   ;;  %v4520_v40 = vld [vmem:[%s5160_s26 + $0x44] ss:$16 sps:$4 sm:$0xff]  }
 0x3f7   : > { %v2008_v50 = vpop.xlane.xlu0 %2007  ;;  %2443 = vmatprep.subr.bf16.mxu0 %v4520_v40 }
 0x3f8   : > { %v2031_v6 = vmul.f32 0.0078125, %v2008_v50  ;;  %v4523_v50 = vld [vmem:[%s5160_s26 + $0x4c] ss:$16 sps:$4 sm:$0xff]   ;;  %2444 = vmatpush1.bf16.msra.mxu0 %v4518_v26 }
 0x3f9   : > { %2556 = vmatprep.subr.bf16.mxu1 %v4523_v50 }
 0x3fa   : > { %v6195_v7 = vsub.f32 %v6112_v62, %v2031_v6  ;;  %v4526_v6 = vld [vmem:[%s5160_s26 + $0x24] ss:$16 sps:$4 sm:$0xff]   ;;  %2557 = vmatpush1.bf16.msra.mxu1 %v4521_v47 }
 0x3fb   : > { %v2012_v42 = vpop.xlane.xlu0 %2011  ;;  %v2010_v11 = vpop.xlane.xlu1 %2009  ;;  %2445 = vmatprep.subr.bf16.mxu0 %v4526_v6  ;;  %2558 = vmatprep.subr.bf16.mxu1 %v4529_v35 }
 0x3fc   : > { %v2033_v1 = vmul.f32 0.0078125, %v2012_v42  ;;  %v2032_v30 = vmul.f32 0.0078125, %v2010_v11  ;;  %v2063_v59 = vmul.f32 %v6195_v7, %v6195_v7  ;;  %v4524_v42 = vld [vmem:[%s5160_s26 + $0x20] ss:$16 sps:$4 sm:$0xff]  }
 0x3fd   : > { %2446 = vmatpush1.bf16.msra.mxu0 %v4524_v42 }
 0x3fe   : > { %v6201_v53 = vsub.f32 %v6117_v61, %v2033_v1  ;;  %v6204_v54 = vsub.f32 %v6119_v12, %v2032_v30  ;;  %2087 = vadd.xlane.f32.xlu0 %v2063_v59  ;;  %v4527_v59 = vld [vmem:[%s5160_s26 + $0x28] ss:$16 sps:$4 sm:$0xff]   ;;  %2447 = vmatprep.subr.bf16.mxu0 %v4532_v57 }
 0x3ff   : > { %v2014_v10 = vpop.xlane.xlu1 %2013  ;;  %2559 = vmatpush1.bf16.msra.mxu1 %v4527_v59 }
 0x400   : > { %v2034_v63 = vmul.f32 0.0078125, %v2014_v10  ;;  %v2065_v9 = vmul.f32 %v6201_v53, %v6201_v53  ;;  %v2064_v49 = vmul.f32 %v6204_v54, %v6204_v54  ;;  %2560 = vmatprep.subr.bf16.mxu1 %v4535_v38 }
 0x401   : > { %v2016_v56 = vpop.xlane.xlu0 %2015  ;;  %2448 = vmatpush1.bf16.msra.mxu0 %v4530_v46 }
 0x402   : > { %v6215_v48 = vsub.f32 %v6124_v33, %v2034_v63  ;;  %2091 = vadd.xlane.f32.xlu0 %v2065_v9  ;;  %2089 = vadd.xlane.f32.xlu1 %v2064_v49  ;;  %v2035_v8 = vmul.f32 0.0078125, %v2016_v56  ;;  %v4533_v63 = vld [vmem:[%s5160_s26 + $0x8] ss:$16 sps:$4 sm:$0xff]   ;;  %s7267_s26 = scalar_lea.vmem %s7143_s7, %s5113_s29 }
 0x403   : > { %2561 = vmatpush1.bf16.msra.mxu1 %v4533_v63  ;;  %v4536_v9 = vld [vmem:[%s5170_s27 + $0x78] sm:$0xff]   ;;  %v6263_v38 = vld [vmem:[%s7267_s26] ss:$0 sm:$0xff] }
 0x404   : > { %v2066_v29 = vmul.f32 %v6215_v48, %v6215_v48  ;;  %v6224_v43 = vsub.f32 %v6128_v16, %v2035_v8  ;;  %v4537_v49 = vld [vmem:[%s5170_s27 + $0xf8] sm:$0xff]   ;;  %4290 = vmatprep.subr.bf16.mxu0 %v4536_v9 }
 0x405   : > { %v2020_v39 = vpop.xlane.xlu0 %2019  ;;  %v2018_v31 = vpop.xlane.xlu1 %2017  ;;  %4354 = vmatprep.subr.bf16.mxu1 %v4537_v49 }
 0x406   : > { %2093 = vadd.xlane.f32.xlu1 %v2066_v29  ;;  %v2037_v2 = vmul.f32 0.0078125, %v2020_v39  ;;  %v2036_v13 = vmul.f32 0.0078125, %v2018_v31  ;;  %v2067_v18 = vmul.f32 %v6224_v43, %v6224_v43 }
 0x408   : > { %v6235_v22 = vsub.f32 %v6133_v41, %v2037_v2  ;;  %v6238_v36 = vsub.f32 %v6135_v25, %v2036_v13  ;;  %2095 = vadd.xlane.f32.xlu0 %v2067_v18 }
 0x409   : > { %v2022_v28 = vpop.xlane.xlu1 %2021 }
 0x40a   : > { %v2038_v11 = vmul.f32 0.0078125, %v2022_v28  ;;  %v2069_v1 = vmul.f32 %v6235_v22, %v6235_v22  ;;  %v2068_v30 = vmul.f32 %v6238_v36, %v6238_v36 }
 0x40c   : > { %v6249_v10 = vsub.f32 %v6140_v34, %v2038_v11  ;;  %2099 = vadd.xlane.f32.xlu0 %v2069_v1  ;;  %2097 = vadd.xlane.f32.xlu1 %v2068_v30 }
 0x40e   : > { %v2070_v32 = vmul.f32 %v6249_v10, %v6249_v10 }
 0x410   : > { %2101 = vadd.xlane.f32.xlu1 %v2070_v32 }
 0x46f   : > { %v2072_v56 = vpop.xlane.xlu0 %2071 }
 0x470   : > { %v2103_v55 = vmul.f32 0.0078125, %v2072_v56 }
 0x472   : > { %v2119_v60 = vadd.f32 1e-06, %v2103_v55 }
 0x473   : > { %v2074_v8 = vpop.xlane.xlu1 %2073 }
 0x474   : > { %4728 = vrsqrt.f32 %v2119_v60  ;;  %v2104_v15 = vmul.f32 0.0078125, %v2074_v8 }
 0x476   : > { %v2120_v4 = vadd.f32 1e-06, %v2104_v15 }
 0x477   : > { %v2076_v29 = vpop.xlane.xlu0 %2075  ;;  %v2078_v39 = vpop.xlane.xlu1 %2077 }
 0x478   : > { %4730 = vrsqrt.f32 %v2120_v4  ;;  %v2105_v31 = vmul.f32 0.0078125, %v2076_v29  ;;  %v2106_v26 = vmul.f32 0.0078125, %v2078_v39 }
 0x47a   : > { %v2121_v40 = vadd.f32 1e-06, %v2105_v31  ;;  %v2122_v2 = vadd.f32 1e-06, %v2106_v26 }
 0x47b   : > { %v2080_v13 = vpop.xlane.xlu0 %2079  ;;  %v2082_v18 = vpop.xlane.xlu1 %2081 }
 0x47c   : > { %4732 = vrsqrt.f32 %v2121_v40  ;;  %v2107_v47 = vmul.f32 0.0078125, %v2080_v13  ;;  %v2108_v50 = vmul.f32 0.0078125, %v2082_v18  ;;  %v4538_v13 = vld [vmem:[%s5170_s27 + $0x38] sm:$0xff]  }
 0x47d   : > { %4734 = vrsqrt.f32 %v2122_v2  ;;  %v4539_v18 = vld [vmem:[%s5170_s27 + $0xb8] sm:$0xff]  }
 0x47e   : > { %v2123_v6 = vadd.f32 1e-06, %v2107_v47  ;;  %v2124_v35 = vadd.f32 1e-06, %v2108_v50 }
 0x47f   : > { %v2084_v28 = vpop.xlane.xlu0 %2083  ;;  %v2086_v42 = vpop.xlane.xlu1 %2085 }
 0x480   : > { %4736 = vrsqrt.f32 %v2123_v6  ;;  %v2109_v11 = vmul.f32 0.0078125, %v2084_v28  ;;  %v2110_v1 = vmul.f32 0.0078125, %v2086_v42  ;;  %v4541_v28 = vld [vmem:[%s5170_s27 + $0xf0] sm:$0xff]  }
 0x481   : > { %v4729_v30 = vpop.eup %4728  ;;  %4738 = vrsqrt.f32 %v2124_v35  ;;  %v4540_v35 = vld [vmem:[%s5170_s27 + $0x70] sm:$0xff]  }
 0x482   : > { %v2151_v59 = vmul.f32 %v4729_v30, %v6148_v5  ;;  %v2125_v57 = vadd.f32 1e-06, %v2109_v11  ;;  %v2126_v46 = vadd.f32 1e-06, %v2110_v1  ;;  %v6272_v5 = vld [vmem:[%s7268_s30] ss:$0 sm:$0xff] }
 0x484   : > { %v2173_v9 = vmul.f32 %v6263_v38, %v2151_v59  ;;  %4740 = vrsqrt.f32 %v2125_v57 }
 0x485   : > { %v4731_v32 = vpop.eup %4730  ;;  %4742 = vrsqrt.f32 %v2126_v46  ;;  %v4542_v46 = vld [vmem:[%s5170_s27 + $0x30] sm:$0xff]  }
 0x486   : > { %v2152_v63 = vmul.f32 %v4731_v32, %v6153_v37  ;;  %v2195_v37 = vadd.f32 %v6272_v5, %v2173_v9  ;;  %v4543_v32 = vld [vmem:[%s5170_s27 + $0xb0] sm:$0xff]  }
 0x487   : > { %v2088_v49 = vpop.xlane.xlu0 %2087 }
 0x488   : > { %v2111_v56 = vmul.f32 0.0078125, %v2088_v49  ;;  %v2174_v55 = vmul.f32 %v6263_v38, %v2152_v63 }
 0x489   : > { %v4733_v60 = vpop.eup %4732 }
 0x48a   : > { %v4735_v8 = vpop.eup %4734  ;;  %v2196_v15 = vadd.f32 %v6272_v5, %v2174_v55  ;;  %v2153_v29 = vmul.f32 %v4733_v60, %v6161_v52  ;;  %v2127_v39 = vadd.f32 1e-06, %v2111_v56 }
 0x48b   : > { %v2090_v4 = vpop.xlane.xlu1 %2089  ;;  %v2154_v26 = vmul.f32 %v4735_v8, %v6156_v23  ;;  %v2092_v11 = vpop.xlane.xlu0 %2091 }
 0x48c   : > { %v2112_v31 = vmul.f32 0.0078125, %v2090_v4  ;;  %v2211_v40 = vpack.c.bf16 %v2196_v15, %v2195_v37  ;;  %v2175_v2 = vmul.f32 %v6263_v38, %v2153_v29  ;;  %4744 = vrsqrt.f32 %v2127_v39 }
 0x48d   : > { %v4737_v47 = vpop.eup %4736  ;;  %v2176_v6 = vmul.f32 %v6263_v38, %v2154_v26  ;;  %v2113_v63 = vmul.f32 0.0078125, %v2092_v11 }
 0x48e   : > { %v2128_v50 = vadd.f32 1e-06, %v2112_v31  ;;  %v4739_v42 = vpop.eup %4738  ;;  %2466 = vmatmul.mubr.bf16.vlgmr.msra.gmra.mxu0 %v2211_v40  ;;  %2579 = vmatmul.mubr.bf16.vlgmr.msra.gmra.mxu1 %v2211_v40  ;;  %v2197_v23 = vadd.f32 %v6272_v5, %v2175_v2  ;;  %v2155_v1 = vmul.f32 %v4737_v47, %v6171_v20 }
 0x48f   : > { %v2094_v52 = vpop.xlane.xlu1 %2093  ;;  %2475 = vmatprep.mubr.bf16.mxu0 %v7250_v27  ;;  %2588 = vmatprep.mubr.bf16.mxu1 %v7250_v27  ;;  %v2198_v30 = vadd.f32 %v6272_v5, %v2176_v6  ;;  %v2156_v57 = vmul.f32 %v4739_v42, %v6164_v51  ;;  %v2129_v37 = vadd.f32 1e-06, %v2113_v63 }
 0x490   : > { %4746 = vrsqrt.f32 %v2128_v50  ;;  %v2114_v59 = vmul.f32 0.0078125, %v2094_v52  ;;  %4291 = vmatpush3.bf16.msra.mxu0 %v4538_v13  ;;  %4355 = vmatpush3.bf16.msra.mxu1 %v4539_v18  ;;  %v2177_v9 = vmul.f32 %v6263_v38, %v2155_v1 }
 0x491   : > { %4292 = vmatprep.subr.bf16.mxu0 %v4540_v35  ;;  %4356 = vmatprep.subr.bf16.mxu1 %v4541_v28  ;;  %v4741_v49 = vpop.eup %4740  ;;  %v2212_v56 = vpack.c.bf16 %v2198_v30, %v2197_v23  ;;  %v2178_v20 = vmul.f32 %v6263_v38, %v2156_v57  ;;  %v2096_v51 = vpop.xlane.xlu0 %2095 }
 0x492   : > { %v2130_v55 = vadd.f32 1e-06, %v2114_v59  ;;  %v4743_v60 = vpop.eup %4742  ;;  %v2199_v15 = vadd.f32 %v6272_v5, %v2177_v9  ;;  %v2157_v4 = vmul.f32 %v4741_v49, %v6181_v19  ;;  %v2115_v26 = vmul.f32 0.0078125, %v2096_v51 }
 0x493   : > { %v2200_v39 = vadd.f32 %v6272_v5, %v2178_v20  ;;  %v2158_v31 = vmul.f32 %v4743_v60, %v6176_v17 }
 0x494   : > { %4293 = vmatpush3.bf16.msra.mxu0 %v4542_v46  ;;  %4357 = vmatpush3.bf16.msra.mxu1 %v4543_v32  ;;  %4748 = vrsqrt.f32 %v2130_v55  ;;  %v2179_v40 = vmul.f32 %v6263_v38, %v2157_v4  ;;  %v2131_v35 = vadd.f32 1e-06, %v2115_v26 }
 0x495   : > { %v2098_v8 = vpop.xlane.xlu1 %2097  ;;  %4750 = vrsqrt.f32 %v2129_v37  ;;  %v2213_v18 = vpack.c.bf16 %v2200_v39, %v2199_v15  ;;  %v2180_v47 = vmul.f32 %v6263_v38, %v2158_v31  ;;  %v2100_v28 = vpop.xlane.xlu0 %2099 }
 0x496   : > { %2476 = vmatmul.mubr.bf16.gmra.mxu0 %v2212_v56  ;;  %2589 = vmatmul.mubr.bf16.gmra.mxu1 %v2212_v56  ;;  %v2116_v29 = vmul.f32 0.0078125, %v2098_v8  ;;  %v2201_v17 = vadd.f32 %v6272_v5, %v2179_v40  ;;  %v2117_v23 = vmul.f32 0.0078125, %v2100_v28  ;;  %v4551_v28 = vld [vmem:[%s5170_s27 + $0xa0] sm:$0xff]  }
 0x497   : > { %2485 = vmatprep.mubr.bf16.mxu0 %v7250_v27  ;;  %2598 = vmatprep.mubr.bf16.mxu1 %v7250_v27  ;;  %v2202_v52 = vadd.f32 %v6272_v5, %v2180_v47 }
 0x498   : > { %v2132_v13 = vadd.f32 1e-06, %v2116_v29  ;;  %v2133_v46 = vadd.f32 1e-06, %v2117_v23  ;;  %v4556_v23 = vld [vmem:[%s5170_s27 + $0x50] sm:$0xff]  }
 0x499   : > { %v4745_v2 = vpop.eup %4744  ;;  %v2102_v6 = vpop.xlane.xlu1 %2101  ;;  %v2214_v59 = vpack.c.bf16 %v2202_v52, %v2201_v17  ;;  %v4552_v17 = vld [vmem:[%s5170_s27 + $0x58] sm:$0xff]  }
 0x49a   : > { %4752 = vrsqrt.f32 %v2132_v13  ;;  %v2118_v42 = vmul.f32 0.0078125, %v2102_v6  ;;  %v2159_v11 = vmul.f32 %v4745_v2, %v6195_v7  ;;  %v4545_v6 = vld [vmem:[%s5170_s27 + $0xe8] sm:$0xff]   ;;  %v4554_v52 = vld [vmem:[%s5170_s27 + $0x18] sm:$0xff]  }
 0x49b   : > { %4754 = vrsqrt.f32 %v2131_v35  ;;  %v4547_v35 = vld [vmem:[%s5170_s27 + $0xa8] sm:$0xff]   ;;  %4358 = vmatprep.subr.bf16.mxu1 %v4545_v6 }
 0x49c   : > { %v2134_v30 = vadd.f32 1e-06, %v2118_v42  ;;  %4359 = vmatpush3.bf16.msra.mxu1 %v4547_v35  ;;  %v4553_v42 = vld [vmem:[%s5170_s27 + $0xd8] sm:$0xff]  }
 0x49d   : > { %v4747_v50 = vpop.eup %4746 }
 0x49e   : > { %2486 = vmatmul.mubr.bf16.gmra.mxu0 %v2213_v18  ;;  %2599 = vmatmul.mubr.bf16.gmra.mxu1 %v2213_v18  ;;  %v2160_v19 = vmul.f32 %v4747_v50, %v6204_v54  ;;  %v2181_v54 = vmul.f32 %v6263_v38, %v2159_v11  ;;  %4756 = vrsqrt.f32 %v2134_v30  ;;  %v4544_v50 = vld [vmem:[%s5170_s27 + $0x68] sm:$0xff]   ;;  %v4555_v11 = vld [vmem:[%s5170_s27 + $0x98] sm:$0xff]   ;;  %v4558_v30 = vld [vmem:[%s5170_s27 + $0x10] sm:$0xff]  }
 0x49f   : > { %2495 = vmatprep.mubr.bf16.mxu0 %v7250_v27  ;;  %2608 = vmatprep.mubr.bf16.mxu1 %v7250_v27  ;;  %4758 = vrsqrt.f32 %v2133_v46  ;;  %v4562_v46 = vld [vmem:[%s5170_s27 + $0x8] sm:$0xff]  }
 0x4a0   : > { %v2182_v1 = vmul.f32 %v6263_v38, %v2160_v19  ;;  %v2203_v7 = vadd.f32 %v6272_v5, %v2181_v54  ;;  %4294 = vmatprep.subr.bf16.mxu0 %v4544_v50  ;;  %v4549_v19 = vld [vmem:[%s5170_s27 + $0xe0] sm:$0xff]   ;;  %v4560_v54 = vld [vmem:[%s5170_s27 + $0x48] sm:$0xff]  }
 0x4a1   : > { %v4749_v57 = vpop.eup %4748  ;;  %4360 = vmatprep.subr.bf16.mxu1 %v4549_v19 }
 0x4a2   : > { %v2204_v32 = vadd.f32 %v6272_v5, %v2182_v1  ;;  %v4751_v63 = vpop.eup %4750  ;;  %v2162_v9 = vmul.f32 %v4749_v57, %v6215_v48  ;;  %4361 = vmatpush3.bf16.msra.mxu1 %v4551_v28  ;;  %v4557_v1 = vld [vmem:[%s5170_s27 + $0xd0] sm:$0xff]   ;;  %v4561_v57 = vld [vmem:[%s5170_s27 + $0xc8] sm:$0xff]  }
 0x4a3   : > { %v2161_v56 = vmul.f32 %v4751_v63, %v6201_v53  ;;  %4362 = vmatprep.subr.bf16.mxu1 %v4553_v42  ;;  %v4564_v63 = vld [vmem:[%s5170_s27 + $0x40] sm:$0xff]  }
 0x4a4   : > { %v2215_v49 = vpack.c.bf16 %v2204_v32, %v2203_v7  ;;  %v2184_v55 = vmul.f32 %v6263_v38, %v2162_v9  ;;  %v4563_v32 = vld [vmem:[%s5170_s27 + $0x88] sm:$0xff]   ;;  %v4565_v7 = vld [vmem:[%s5170_s27 + $0xc0] sm:$0xff]  }
 0x4a5   : > { %v2183_v60 = vmul.f32 %v6263_v38, %v2161_v56  ;;  %v4566_v9 = vld [vmem:[%s5170_s27] sm:$0xff]   ;;  %v2253_v56 = vlaneseq }
 0x4a6   : > { %2496 = vmatmul.mubr.bf16.gmra.mxu0 %v2214_v59  ;;  %2609 = vmatmul.mubr.bf16.gmra.mxu1 %v2214_v59  ;;  %v2206_v37 = vadd.f32 %v6272_v5, %v2184_v55  ;;  %v4559_v59 = vld [vmem:[%s5170_s27 + $0x90] sm:$0xff]  }
 0x4a7   : > { %2505 = vmatprep.mubr.bf16.mxu0 %v7250_v27  ;;  %2618 = vmatprep.mubr.bf16.mxu1 %v7250_v27  ;;  %v4753_v20 = vpop.eup %4752  ;;  %v2205_v51 = vadd.f32 %v6272_v5, %v2183_v60  ;;  %v2254_v55 = vshrl.u32 %v2253_v56, 7  ;;  %v2251_v60 = vld [vmem:[%s5165_s16] sm:$0xf] }
 0x4a8   : > { %v4755_v8 = vpop.eup %4754  ;;  %v2164_v48 = vmul.f32 %v4753_v20, %v6238_v36  ;;  %4363 = vmatpush3.bf16.msra.mxu1 %v4555_v11 }
 0x4a9   : > { %v2163_v53 = vmul.f32 %v4755_v8, %v6224_v43  ;;  %v2216_v15 = vpack.c.bf16 %v2206_v37, %v2205_v51  ;;  %4364 = vmatprep.subr.bf16.mxu1 %v4557_v1  ;;  %v2255_v20 = vsub.s32 0, %v2254_v55  ;;  %v2263_v8 = vsub.s32 2, %v2254_v55 }
 0x4aa   : > { %v2186_v4 = vmul.f32 %v6263_v38, %v2164_v48  ;;  %v2259_v37 = vsub.s32 1, %v2254_v55  ;;  %v2267_v51 = vsub.s32 3, %v2254_v55 }
 0x4ab   : > { %v4757_v29 = vpop.eup %4756  ;;  %v2185_v39 = vmul.f32 %v6263_v38, %v2163_v53  ;;  %v6364_v48 = vrot.slane %v2251_v60, %v2255_v20 }
 0x4ac   : > { %v4759_v31 = vpop.eup %4758  ;;  %v2208_v26 = vadd.f32 %v6272_v5, %v2186_v4  ;;  %v2166_v36 = vmul.f32 %v4757_v29, %v6249_v10  ;;  %4365 = vmatpush3.bf16.msra.mxu1 %v4559_v59  ;;  %v6368_v29 = vrot.slane %v2251_v60, %v2259_v37 }
 0x4ad   : > { %v2207_v43 = vadd.f32 %v6272_v5, %v2185_v39  ;;  %v2165_v40 = vmul.f32 %v4759_v31, %v6235_v22  ;;  %4366 = vmatprep.subr.bf16.mxu1 %v4561_v57 }
 0x4ae   : > { %2506 = vmatmul.mubr.bf16.gmra.mxu0 %v2215_v49  ;;  %2619 = vmatmul.mubr.bf16.gmra.mxu1 %v2215_v49  ;;  %v2188_v13 = vmul.f32 %v6263_v38, %v2166_v36  ;;  %v4567_v49 = vld [vmem:[%s5170_s27 + $0x80] sm:$0xff]   ;;  %v6371_v36 = vrot.slane %v2251_v60, %v2267_v51 }
 0x4af   : > { %2515 = vmatprep.mubr.bf16.mxu0 %v7250_v27  ;;  %2628 = vmatprep.mubr.bf16.mxu1 %v7250_v27  ;;  %v2217_v2 = vpack.c.bf16 %v2208_v26, %v2207_v43  ;;  %v2187_v18 = vmul.f32 %v6263_v38, %v2165_v40  ;;  %v4546_v38 = vld [vmem:[%s5170_s27 + $0x28] sm:$0xff]  }
 0x4b0   : > { %v2210_v10 = vadd.f32 %v6272_v5, %v2188_v13  ;;  %4295 = vmatpush3.bf16.msra.mxu0 %v4546_v38  ;;  %4367 = vmatpush3.bf16.msra.mxu1 %v4563_v32 }
 0x4b1   : > { %v2209_v22 = vadd.f32 %v6272_v5, %v2187_v18  ;;  %v4550_v5 = vld [vmem:[%s5170_s27 + $0x20] sm:$0xff]   ;;  %4368 = vmatprep.subr.bf16.mxu1 %v4565_v7 }
 0x4b3   : > { %v2218_v47 = vpack.c.bf16 %v2210_v10, %v2209_v22 }
 0x4b4   : > { %4369 = vmatpush3.bf16.msra.mxu1 %v4567_v49 }
 0x4b6   : > { %2516 = vmatmul.mubr.bf16.gmra.mxu0 %v2216_v15  ;;  %2629 = vmatmul.mubr.bf16.gmra.mxu1 %v2216_v15  ;;  %v6366_v15 = vrot.slane %v2251_v60, %v2263_v8 }
 0x4b7   : > { %2525 = vmatprep.mubr.bf16.mxu0 %v7250_v27  ;;  %2638 = vmatprep.mubr.bf16.mxu1 %v7250_v27 }
 0x4be   : > { %2526 = vmatmul.mubr.bf16.gmra.mxu0 %v2217_v2  ;;  %2639 = vmatmul.mubr.bf16.gmra.mxu1 %v2217_v2 }
 0x4bf   : > { %2535 = vmatprep.mubr.bf16.mxu0 %v7250_v27  ;;  %2648 = vmatprep.mubr.bf16.mxu1 %v7250_v27  ;;  %v4548_v27 = vld [vmem:[%s5170_s27 + $0x60] sm:$0xff]  }
 0x4c0   : > { %4296 = vmatprep.subr.bf16.mxu0 %v4548_v27 }
 0x4c1   : > { %4297 = vmatpush3.bf16.msra.mxu0 %v4550_v5 }
 0x4c2   : > { %4298 = vmatprep.subr.bf16.mxu0 %v4552_v17 }
 0x4c5   : > { %4299 = vmatpush3.bf16.msra.mxu0 %v4554_v52 }
 0x4c6   : > { %2536 = vmatmul.mubr.bf16.gmra.mxu0 %v2218_v47  ;;  %2649 = vmatmul.mubr.bf16.gmra.mxu1 %v2218_v47 }
 0x4c7   : > { %4300 = vmatprep.subr.bf16.mxu0 %v4556_v23 }
 0x4c9   : > { %4301 = vmatpush3.bf16.msra.mxu0 %v4558_v30 }
 0x4ca   : > { %4302 = vmatprep.subr.bf16.mxu0 %v4560_v54 }
 0x4cd   : > { %4303 = vmatpush3.bf16.msra.mxu0 %v4562_v46 }
 0x4ce   : > { %4304 = vmatprep.subr.bf16.mxu0 %v4564_v63 }
 0x4d1   : > { %4305 = vmatpush3.bf16.msra.mxu0 %v4566_v9 }
 0x54e   : > { %v2467_v53 = vpop.f32.mrf.mxu0  ;;  %v2580_v4 = vpop.f32.mrf.mxu1 }
 0x54f   : > { %v2468_v26 = vadd.f32 %v2467_v53, %v6364_v48  ;;  %v2581_v43 = vadd.f32 %v2580_v4, %v6366_v15 }
 0x550   : > { %v2469_v39 = vpop.f32.mrf.mxu0  ;;  %v2582_v31 = vpop.f32.mrf.mxu1 }
 0x551   : > { %v2470_v13 = vadd.f32 %v2469_v39, %v6368_v29  ;;  %v2723_v47 = vmul.f32 0.70710677, %v2468_v26  ;;  %v2583_v50 = vadd.f32 %v2582_v31, %v6371_v36  ;;  %v2725_v6 = vmul.f32 0.70710677, %v2581_v43 }
 0x552   : > { %v2471_v40 = vpop.f32.mrf.mxu0  ;;  %v2584_v2 = vpop.f32.mrf.mxu1 }
 0x553   : > { %v2472_v18 = vadd.f32 %v2471_v40, %v6364_v48  ;;  %v2585_v38 = vadd.f32 %v2584_v2, %v6366_v15  ;;  %v2724_v19 = vmul.f32 0.70710677, %v2470_v13  ;;  %4760 = verf.f32 %v2723_v47 }
 0x554   : > { %v2473_v10 = vpop.f32.mrf.mxu0  ;;  %v2586_v22 = vpop.f32.mrf.mxu1  ;;  %v2726_v52 = vmul.f32 0.70710677, %v2583_v50  ;;  %4762 = verf.f32 %v2725_v6  ;;  %v2659_v2 = vmul.f32 0.5, %v2468_v26 }
 0x555   : > { %v2727_v5 = vmul.f32 0.70710677, %v2472_v18  ;;  %v2474_v28 = vadd.f32 %v2473_v10, %v6368_v29  ;;  %v2587_v11 = vadd.f32 %v2586_v22, %v6371_v36  ;;  %v2729_v23 = vmul.f32 0.70710677, %v2585_v38 }
 0x556   : > { %v2477_v35 = vpop.f32.mrf.mxu0  ;;  %v2590_v27 = vpop.f32.mrf.mxu1  ;;  %4764 = verf.f32 %v2724_v19  ;;  %v6389_v10 = vmul.f32 0.5, %v2581_v43  ;;  %v2663_v26 = vmul.f32 0.5, %v2472_v18  ;;  %v6401_v43 = vmul.f32 0.5, %v2585_v38 }
 0x557   : > { %v2478_v1 = vadd.f32 %v2477_v35, %v6364_v48  ;;  %v2591_v54 = vadd.f32 %v2590_v27, %v6366_v15  ;;  %4766 = verf.f32 %v2727_v5  ;;  %v2728_v57 = vmul.f32 0.70710677, %v2474_v28 }
 0x558   : > { %v2479_v17 = vpop.f32.mrf.mxu0  ;;  %v2592_v42 = vpop.f32.mrf.mxu1  ;;  %4768 = verf.f32 %v2726_v52  ;;  %v2730_v7 = vmul.f32 0.70710677, %v2587_v11  ;;  %v6396_v27 = vmul.f32 0.5, %v2470_v13  ;;  %v6409_v13 = vmul.f32 0.5, %v2587_v11 }
 0x559   : > { %v2480_v46 = vadd.f32 %v2479_v17, %v6368_v29  ;;  %v2593_v9 = vadd.f32 %v2592_v42, %v6371_v36  ;;  %4770 = verf.f32 %v2729_v23  ;;  %v2731_v49 = vmul.f32 0.70710677, %v2478_v1 }
 0x55a   : > { %v2481_v30 = vpop.f32.mrf.mxu0  ;;  %v2594_v59 = vpop.f32.mrf.mxu1  ;;  %v2733_v20 = vmul.f32 0.70710677, %v2591_v54  ;;  %4772 = verf.f32 %v2728_v57  ;;  %v6399_v42 = vmul.f32 0.5, %v2583_v50  ;;  %v6407_v57 = vmul.f32 0.5, %v2474_v28 }
 0x55b   : > { %v2732_v60 = vmul.f32 0.70710677, %v2480_v46  ;;  %v2482_v8 = vadd.f32 %v2481_v30, %v6364_v48  ;;  %4774 = verf.f32 %v2730_v7  ;;  %v2734_v53 = vmul.f32 0.70710677, %v2593_v9 }
 0x55c   : > { %v2483_v32 = vpop.f32.mrf.mxu0  ;;  %v2596_v63 = vpop.f32.mrf.mxu1  ;;  %v2595_v4 = vadd.f32 %v2594_v59, %v6366_v15  ;;  %4776 = verf.f32 %v2731_v49  ;;  %v6414_v50 = vmul.f32 0.5, %v2591_v54  ;;  %v6421_v28 = vmul.f32 0.5, %v2480_v46 }
 0x55d   : > { %v2484_v39 = vadd.f32 %v2483_v32, %v6368_v29  ;;  %4778 = verf.f32 %v2733_v20  ;;  %v2735_v22 = vmul.f32 0.70710677, %v2482_v8  ;;  %v2597_v47 = vadd.f32 %v2596_v63, %v6371_v36 }
 0x55e   : > { %v2487_v56 = vpop.f32.mrf.mxu0  ;;  %v2600_v55 = vpop.f32.mrf.mxu1  ;;  %4780 = verf.f32 %v2732_v60  ;;  %v2737_v19 = vmul.f32 0.70710677, %v2595_v4  ;;  %v6411_v32 = vmul.f32 0.5, %v2478_v1  ;;  %v6423_v11 = vmul.f32 0.5, %v2593_v9 }
 0x55f   : > { %4782 = verf.f32 %v2734_v53  ;;  %v2488_v5 = vadd.f32 %v2487_v56, %v6364_v48  ;;  %v2736_v52 = vmul.f32 0.70710677, %v2484_v39  ;;  %v2601_v63 = vadd.f32 %v2600_v55, %v6366_v15 }
 0x560   : > { %v2489_v37 = vpop.f32.mrf.mxu0  ;;  %v2602_v51 = vpop.f32.mrf.mxu1  ;;  %4784 = verf.f32 %v2735_v22  ;;  %v2738_v18 = vmul.f32 0.70710677, %v2597_v47  ;;  %v6425_v53 = vmul.f32 0.5, %v2482_v8  ;;  %v6432_v25 = vmul.f32 0.5, %v2595_v4 }
 0x561   : > { %v4761_v17 = vpop.eup %4760  ;;  %v2490_v38 = vadd.f32 %v2489_v37, %v6368_v29  ;;  %4786 = verf.f32 %v2737_v19  ;;  %v2739_v1 = vmul.f32 0.70710677, %v2488_v5  ;;  %v2603_v54 = vadd.f32 %v2602_v51, %v6371_v36 }
 0x562   : > { %v2491_v31 = vpop.f32.mrf.mxu0  ;;  %v6387_v40 = vpop.f32.mrf.mxu1  ;;  %v2851_v55 = vadd.f32 1.0, %v4761_v17  ;;  %4788 = verf.f32 %v2736_v52  ;;  %v6434_v46 = vmul.f32 0.5, %v2484_v39  ;;  %v2741_v9 = vmul.f32 0.70710677, %v2601_v63 }
 0x563   : > { %v4763_v59 = vpop.eup %4762  ;;  %4790 = verf.f32 %v2738_v18  ;;  %v2740_v17 = vmul.f32 0.70710677, %v2490_v38  ;;  %v6440_v61 = vmul.f32 0.5, %v2597_v47  ;;  %v6445_v62 = vmul.f32 0.5, %v2488_v5 }
 0x564   : > { %v6392_v6 = vpop.f32.mrf.mxu0  ;;  %v6394_v35 = vpop.f32.mrf.mxu1  ;;  %v2853_v41 = vadd.f32 1.0, %v4763_v59  ;;  %4792 = verf.f32 %v2739_v1  ;;  %v2492_v59 = vadd.f32 %v2491_v31, %v6364_v48  ;;  %v6443_v12 = vmul.f32 %v2851_v55, %v2659_v2 }
 0x565   : > { %v4765_v7 = vpop.eup %4764  ;;  %v6454_v47 = vmul.f32 0.5, %v2601_v63  ;;  %4794 = verf.f32 %v2741_v9  ;;  %v2605_v31 = vadd.f32 %v6387_v40, %v6366_v15  ;;  %v2494_v1 = vadd.f32 %v6392_v6, %v6368_v29 }
 0x566   : > { %v6403_v23 = vpop.f32.mrf.mxu0  ;;  %v6405_v30 = vpop.f32.mrf.mxu1  ;;  %v2852_v19 = vadd.f32 1.0, %v4765_v7  ;;  %v2742_v7 = vmul.f32 0.70710677, %v2603_v54  ;;  %v6452_v3 = vmul.f32 %v2853_v41, %v6389_v10  ;;  %4796 = verf.f32 %v2740_v17 }
 0x567   : > { %v4767_v20 = vpop.eup %4766  ;;  %v6468_v63 = vmul.f32 0.5, %v2490_v38  ;;  %v2743_v55 = vmul.f32 0.70710677, %v2492_v59  ;;  %v2498_v38 = vadd.f32 %v6403_v23, %v6364_v48 }
 0x568   : > { %v6417_v49 = vpop.f32.mrf.mxu0  ;;  %v6419_v56 = vpop.f32.mrf.mxu1  ;;  %v2855_v16 = vadd.f32 1.0, %v4767_v20  ;;  %4798 = verf.f32 %v2742_v7 }
 0x569   : > { %v4769_v60 = vpop.eup %4768  ;;  %4800 = verf.f32 %v2743_v55 }
 0x56a   : > { %v6428_v22 = vpop.f32.mrf.mxu0  ;;  %v6430_v37 = vpop.f32.mrf.mxu1  ;;  %v2854_v33 = vadd.f32 1.0, %v4769_v60  ;;  %v6461_v5 = vmul.f32 %v2855_v16, %v2663_v26  ;;  %v2607_v26 = vadd.f32 %v6394_v35, %v6371_v36 }
 0x56b   : > { %v4771_v34 = vpop.eup %4770 }
 0x56c   : > { %v6436_v8 = vpop.f32.mrf.mxu0  ;;  %v6438_v52 = vpop.f32.mrf.mxu1  ;;  %v2857_v39 = vadd.f32 1.0, %v4771_v34  ;;  %v6459_v34 = vmul.f32 %v2852_v19, %v6396_v27  ;;  %v6466_v41 = vmul.f32 %v2854_v33, %v6399_v42  ;;  %v6479_v33 = vmul.f32 0.5, %v2603_v54 }
 0x56d   : > { %v4773_v51 = vpop.eup %4772  ;;  %v2745_v42 = vmul.f32 0.70710677, %v2605_v31  ;;  %v2979_v17 = vpack.c.bf16 %v6461_v5, %v6443_v12 }
 0x56e   : > { %v4775_v4 = vpop.eup %4774  ;;  %v6447_v18 = vpop.f32.mrf.mxu0  ;;  %v2856_v10 = vadd.f32 1.0, %v4773_v51  ;;  %v6473_v27 = vmul.f32 %v2857_v39, %v6401_v43  ;;  %v6485_v43 = vmul.f32 0.5, %v2492_v59 }
 0x56f   : > { %v6449_v20 = vpop.f32.mrf.mxu1  ;;  %v4777_v24 = vpop.eup %4776  ;;  %v2858_v16 = vadd.f32 1.0, %v4775_v4  ;;  %v2744_v4 = vmul.f32 0.70710677, %v2494_v1  ;;  %4802 = verf.f32 %v2745_v42 }
 0x570   : > { %v4779_v2 = vpop.eup %4778  ;;  %v6470_v9 = vpop.f32.mrf.mxu0  ;;  %v2859_v19 = vadd.f32 1.0, %v4777_v24  ;;  %v6489_v24 = vadd.f32 %v6405_v30, %v6366_v15  ;;  %v2981_v23 = vpack.c.bf16 %v6473_v27, %v6452_v3  ;;  %v2920_v12 = vmul.f32 %v2856_v10, %v6407_v57 }
 0x571   : > { %v4781_v60 = vpop.eup %4780  ;;  %v6477_v6 = vpop.f32.mrf.mxu1  ;;  %v2861_v51 = vadd.f32 1.0, %v4779_v2  ;;  %v2922_v59 = vmul.f32 %v2858_v16, %v6409_v13  ;;  %v2746_v2 = vmul.f32 0.70710677, %v2607_v26  ;;  %v2747_v30 = vmul.f32 0.70710677, %v2498_v38 }
 0x572   : > { %v4783_v40 = vpop.eup %4782  ;;  %v2860_v7 = vadd.f32 1.0, %v4781_v60  ;;  %v6491_v35 = vpop.f32.mrf.mxu0  ;;  %v6500_v55 = vmul.f32 %v2859_v19, %v6411_v32  ;;  %4804 = verf.f32 %v2744_v4  ;;  %v6509_v57 = vadd.f32 %v6419_v56, %v6371_v36 }
 0x573   : > { %v4785_v39 = vpop.eup %4784  ;;  %v2862_v45 = vadd.f32 1.0, %v4783_v40  ;;  %v6497_v5 = vpop.f32.mrf.mxu1  ;;  %v2500_v40 = vadd.f32 %v6417_v49, %v6368_v29  ;;  %v6505_v58 = vmul.f32 %v2861_v51, %v6414_v50  ;;  %v6517_v27 = vmul.f32 0.5, %v2605_v31 }
 0x574   : > { %v4787_v54 = vpop.eup %4786  ;;  %v2863_v3 = vadd.f32 1.0, %v4785_v39  ;;  %v6512_v10 = vmul.f32 %v2860_v7, %v6421_v28  ;;  %v2749_v49 = vmul.f32 0.70710677, %v6489_v24  ;;  %v6520_v16 = vpop.f32.mrf.mxu0  ;;  %4806 = verf.f32 %v2746_v2 }
 0x575   : > { %v4789_v60 = vpop.eup %4788  ;;  %v6515_v32 = vmul.f32 %v2862_v45, %v6423_v11  ;;  %v2865_v19 = vadd.f32 1.0, %v4787_v54  ;;  %v2502_v56 = vadd.f32 %v6428_v22, %v6364_v48  ;;  %v6524_v51 = vpop.f32.mrf.mxu1  ;;  %v6526_v28 = vmul.f32 0.5, %v2494_v1 }
 0x576   : > { %v4791_v13 = vpop.eup %4790  ;;  %v2864_v42 = vadd.f32 1.0, %v4789_v60  ;;  %4808 = verf.f32 %v2747_v30  ;;  %v2748_v45 = vmul.f32 0.70710677, %v2500_v40  ;;  %v2980_v11 = vpack.c.bf16 %v2920_v12, %v6459_v34  ;;  %v6538_v30 = vpop.f32.mrf.mxu0 }
 0x577   : > { %v4793_v50 = vpop.eup %4792  ;;  %v6530_v4 = vmul.f32 %v2863_v3, %v6425_v53  ;;  %v2866_v39 = vadd.f32 1.0, %v4791_v13  ;;  %v2750_v7 = vmul.f32 0.70710677, %v6509_v57  ;;  %v2982_v54 = vpack.c.bf16 %v2922_v59, %v6466_v41 }
 0x578   : > { %v4795_v31 = vpop.eup %4794  ;;  %v2867_v60 = vadd.f32 1.0, %v4793_v50  ;;  %v6534_v22 = vmul.f32 0.5, %v2607_v26  ;;  %4810 = verf.f32 %v2749_v49  ;;  %v2615_v1 = vadd.f32 %v6430_v37, %v6366_v15  ;;  %3299 = vmatprep.mubr.bf16.mxu0 %v2980_v11  ;;  %v6546_v26 = vpop.f32.mrf.mxu1 }
 0x579   : > { %v4797_v2 = vpop.eup %4796  ;;  %v6541_v34 = vmul.f32 %v2865_v19, %v6432_v25  ;;  %v2928_v53 = vmul.f32 %v2864_v42, %v6434_v46  ;;  %v2751_v12 = vmul.f32 0.70710677, %v2502_v56  ;;  %v2504_v41 = vadd.f32 %v6436_v8, %v6368_v29  ;;  %3396 = vmatprep.mubr.bf16.mxu1 %v2982_v54  ;;  %3300 = vmatmul.mubr.bf16.vlgmr.msra.gmra.mxu0 %v2979_v17  ;;  %v6563_v19 = vpop.f32.mrf.mxu0 }
 0x57a   : > { %v4799_v59 = vpop.eup %4798  ;;  %v2869_v3 = vadd.f32 1.0, %v4795_v31  ;;  %v6548_v13 = vmul.f32 0.5, %v2498_v38  ;;  %4812 = verf.f32 %v2748_v45  ;;  %v2617_v37 = vadd.f32 %v6438_v52, %v6371_v36  ;;  %3397 = vmatmul.mubr.bf16.vlgmr.msra.gmra.mxu1 %v2981_v23 }
 0x57b   : > { %v2930_v25 = vmul.f32 %v2866_v39, %v6440_v61  ;;  %v2868_v46 = vadd.f32 1.0, %v4797_v2  ;;  %4814 = verf.f32 %v2750_v7  ;;  %v2508_v8 = vadd.f32 %v6447_v18, %v6364_v48  ;;  %v4801_v52 = vpop.eup %4800  ;;  %v6567_v18 = vpop.f32.mrf.mxu1 }
 0x57c   : > { %v6556_v17 = vmul.f32 %v2867_v60, %v6445_v62  ;;  %v6559_v49 = vmul.f32 0.5, %v6489_v24  ;;  %v2753_v38 = vmul.f32 0.70710677, %v2615_v1  ;;  %v2621_v50 = vadd.f32 %v6449_v20, %v6366_v15  ;;  %v4803_v11 = vpop.eup %4802  ;;  %v6586_v60 = vpop.f32.mrf.mxu0 }
 0x57d   : > { %v2870_v23 = vadd.f32 1.0, %v4799_v59  ;;  %4816 = verf.f32 %v2751_v12  ;;  %v2752_v61 = vmul.f32 0.70710677, %v2504_v41  ;;  %v2510_v42 = vadd.f32 %v6470_v9, %v6368_v29 }
 0x57e   : > { %v6570_v62 = vmul.f32 %v2869_v3, %v6454_v47  ;;  %v6572_v24 = vmul.f32 0.5, %v2500_v40  ;;  %v2754_v45 = vmul.f32 0.70710677, %v2617_v37  ;;  %v2623_v20 = vadd.f32 %v6477_v6, %v6371_v36 }
 0x57f   : > { %v6577_v31 = vmul.f32 %v2868_v46, %v6468_v63  ;;  %v6580_v39 = vmul.f32 0.5, %v6509_v57  ;;  %v6582_v7 = vmul.f32 0.5, %v2502_v56  ;;  %v2755_v9 = vmul.f32 0.70710677, %v2508_v8  ;;  %v4805_v54 = vpop.eup %4804  ;;  %v6593_v57 = vpop.f32.mrf.mxu1 }
 0x580   : > { %v2871_v2 = vadd.f32 1.0, %v4801_v52  ;;  %v6584_v47 = vmul.f32 0.5, %v2615_v1  ;;  %4818 = verf.f32 %v2753_v38  ;;  %v2757_v40 = vmul.f32 0.70710677, %v2621_v50 }
 0x581   : > { %v6589_v6 = vmul.f32 %v2870_v23, %v6479_v33  ;;  %v6591_v12 = vmul.f32 0.5, %v2504_v41  ;;  %4820 = verf.f32 %v2752_v61  ;;  %v2756_v63 = vmul.f32 0.70710677, %v2510_v42  ;;  %v4807_v56 = vpop.eup %4806 }
 0x582   : > { %v2873_v59 = vadd.f32 1.0, %v4803_v11  ;;  %4822 = verf.f32 %v2754_v45  ;;  %v2758_v3 = vmul.f32 0.70710677, %v2623_v20  ;;  %v2984_v1 = vpack.c.bf16 %v2928_v53, %v6512_v10  ;;  %v2523_v45 = vpop.f32.mrf.mxu0 }
 0x583   : > { %v4809_v46 = vpop.eup %4808  ;;  %v2872_v38 = vadd.f32 1.0, %v4805_v54  ;;  %4824 = verf.f32 %v2755_v9  ;;  %v2512_v52 = vadd.f32 %v6491_v35, %v6364_v48  ;;  %v2986_v33 = vpack.c.bf16 %v2930_v25, %v6515_v32  ;;  %v2636_v32 = vpop.f32.mrf.mxu1 }
 0x584   : > { %v6600_v41 = vmul.f32 %v2871_v2, %v6485_v43  ;;  %v6602_v23 = vmul.f32 0.5, %v2617_v37  ;;  %4826 = verf.f32 %v2757_v40  ;;  %v2625_v61 = vadd.f32 %v6497_v5, %v6366_v15  ;;  %3307 = vmatprep.mubr.bf16.mxu0 %v2984_v1 }
 0x585   : > { %v4811_v10 = vpop.eup %4810  ;;  %v2874_v53 = vadd.f32 1.0, %v4807_v56  ;;  %v6606_v11 = vmul.f32 0.5, %v2508_v8  ;;  %4828 = verf.f32 %v2756_v63  ;;  %v2514_v35 = vadd.f32 %v6520_v16, %v6368_v29  ;;  %3404 = vmatprep.mubr.bf16.mxu1 %v2986_v33  ;;  %v6624_v56 = vpop.f32.mrf.mxu0 }
 0x586   : > { %v6611_v43 = vmul.f32 %v2873_v59, %v6517_v27  ;;  %v2875_v37 = vadd.f32 1.0, %v4809_v46  ;;  %v6613_v25 = vmul.f32 0.5, %v2621_v50  ;;  %4830 = verf.f32 %v2758_v3 }
 0x587   : > { %v4813_v5 = vpop.eup %4812  ;;  %v2936_v9 = vmul.f32 %v2872_v38, %v6526_v28  ;;  %v6616_v54 = vmul.f32 0.5, %v2510_v42  ;;  %v2759_v8 = vmul.f32 0.70710677, %v2512_v52  ;;  %v2983_v2 = vpack.c.bf16 %v6530_v4, %v6500_v55  ;;  %v6635_v4 = vpop.f32.mrf.mxu1 }
 0x588   : > { %v4815_v40 = vpop.eup %4814  ;;  %v2877_v16 = vadd.f32 1.0, %v4811_v10  ;;  %v2761_v63 = vmul.f32 0.70710677, %v2625_v61  ;;  %v2627_v27 = vadd.f32 %v6524_v51, %v6371_v36  ;;  %v2985_v50 = vpack.c.bf16 %v6541_v34, %v6505_v58 }
 0x589   : > { %v6627_v59 = vmul.f32 %v2874_v53, %v6534_v22  ;;  %v6629_v28 = vmul.f32 0.5, %v2623_v20  ;;  %v2760_v42 = vmul.f32 0.70710677, %v2514_v35  ;;  %v6633_v55 = vadd.f32 %v6538_v30, %v6364_v48  ;;  %3308 = vmatmul.mubr.bf16.gmra.mxu0 %v2983_v2  ;;  %v2642_v53 = vpop.f32.mrf.mxu1 }
 0x58a   : > { %v4817_v3 = vpop.eup %4816  ;;  %v6638_v51 = vmul.f32 %v2875_v37, %v6548_v13  ;;  %v2876_v58 = vadd.f32 1.0, %v4813_v5  ;;  %v6640_v34 = vmul.f32 0.5, %v2512_v52  ;;  %v6644_v22 = vadd.f32 %v6546_v26, %v6366_v15  ;;  %3405 = vmatmul.mubr.bf16.gmra.mxu1 %v2985_v50  ;;  %v2529_v52 = vpop.f32.mrf.mxu0 }
 0x58b   : > { %v2878_v20 = vadd.f32 1.0, %v4815_v40  ;;  %4832 = verf.f32 %v2759_v8  ;;  %v6646_v1 = vmul.f32 0.5, %v2625_v61  ;;  %v6650_v30 = vadd.f32 %v6563_v19, %v6368_v29 }
 0x58c   : > { %v6653_v46 = vmul.f32 %v2877_v16, %v6559_v49  ;;  %4834 = verf.f32 %v2761_v63  ;;  %v6655_v13 = vmul.f32 0.5, %v2514_v35  ;;  %v2762_v38 = vmul.f32 0.70710677, %v2627_v27 }
 0x58d   : > { %v4819_v33 = vpop.eup %4818  ;;  %v2879_v26 = vadd.f32 1.0, %v4817_v3  ;;  %4836 = verf.f32 %v2760_v42  ;;  %v2763_v10 = vmul.f32 0.70710677, %v6633_v55  ;;  %v6659_v61 = vadd.f32 %v2523_v45, %v6368_v29  ;;  %v2644_v42 = vpop.f32.mrf.mxu1 }
 0x58e   : > { %v4821_v37 = vpop.eup %4820  ;;  %v2765_v19 = vmul.f32 0.70710677, %v6644_v22  ;;  %v2633_v49 = vadd.f32 %v6567_v18, %v6371_v36  ;;  %v6665_v35 = vadd.f32 %v2636_v32, %v6371_v36  ;;  %v2988_v5 = vpack.c.bf16 %v2936_v9, %v6577_v31  ;;  %v2531_v31 = vpop.f32.mrf.mxu0 }
 0x58f   : > { %v4823_v8 = vpop.eup %4822  ;;  %v6669_v2 = vmul.f32 %v2876_v58, %v6572_v24  ;;  %v6672_v40 = vmul.f32 %v2878_v20, %v6580_v39  ;;  %v6674_v45 = vmul.f32 0.5, %v2627_v27  ;;  %v2764_v16 = vmul.f32 0.70710677, %v6650_v30 }
 0x590   : > { %v4825_v63 = vpop.eup %4824  ;;  %v2881_v50 = vadd.f32 1.0, %v4819_v33  ;;  %4838 = verf.f32 %v2762_v38  ;;  %v2522_v18 = vadd.f32 %v6586_v60, %v6364_v48  ;;  %v2768_v32 = vmul.f32 0.70710677, %v6659_v61  ;;  %3315 = vmatprep.mubr.bf16.mxu0 %v2988_v5 }
 0x591   : > { %v4827_v9 = vpop.eup %4826  ;;  %v6681_v24 = vmul.f32 %v2879_v26, %v6582_v7  ;;  %v2880_v39 = vadd.f32 1.0, %v4821_v37  ;;  %4840 = verf.f32 %v2763_v10  ;;  %v2770_v27 = vmul.f32 0.70710677, %v6665_v35 }
 0x592   : > { %v4829_v3 = vpop.eup %4828  ;;  %v2882_v58 = vadd.f32 1.0, %v4823_v8  ;;  %4842 = verf.f32 %v2765_v19  ;;  %v2766_v20 = vmul.f32 0.70710677, %v2633_v49  ;;  %v2990_v60 = vpack.c.bf16 %v6627_v59, %v6589_v6  ;;  %v2533_v19 = vpop.f32.mrf.mxu0 }
 0x593   : > { %v4831_v38 = vpop.eup %4830  ;;  %v2883_v33 = vadd.f32 1.0, %v4825_v63  ;;  %4844 = verf.f32 %v2764_v16  ;;  %v2635_v5 = vadd.f32 %v6593_v57, %v6366_v15  ;;  %v2987_v7 = vpack.c.bf16 %v6600_v41, %v6556_v17  ;;  %v2646_v57 = vpop.f32.mrf.mxu1 }
 0x594   : > { %v6691_v26 = vmul.f32 %v2881_v50, %v6584_v47  ;;  %v2767_v10 = vmul.f32 0.70710677, %v2522_v18  ;;  %4846 = verf.f32 %v2768_v32  ;;  %3412 = vmatprep.mubr.bf16.mxu1 %v2990_v60  ;;  %v2989_v37 = vpack.c.bf16 %v6611_v43, %v6570_v62 }
 0x595   : > { %v2885_v6 = vadd.f32 1.0, %v4827_v9  ;;  %v2884_v59 = vadd.f32 1.0, %v4829_v3  ;;  %4848 = verf.f32 %v2770_v27  ;;  %3316 = vmatmul.mubr.bf16.gmra.mxu0 %v2987_v7  ;;  %v6696_v8 = vadd.f32 %v2529_v52, %v6368_v29  ;;  %v2537_v9 = vpop.f32.mrf.mxu0 }
 0x596   : > { %v2944_v17 = vmul.f32 %v2880_v39, %v6591_v12  ;;  %v2886_v41 = vadd.f32 1.0, %v4831_v38  ;;  %4850 = verf.f32 %v2766_v20  ;;  %3413 = vmatmul.mubr.bf16.gmra.mxu1 %v2989_v37  ;;  %v6700_v47 = vadd.f32 %v2642_v53, %v6371_v36 }
 0x597   : > { %v2946_v16 = vmul.f32 %v2882_v58, %v6602_v23  ;;  %v6704_v62 = vmul.f32 %v2883_v33, %v6606_v11  ;;  %v6707_v43 = vmul.f32 0.5, %v6650_v30  ;;  %v2769_v63 = vmul.f32 0.70710677, %v2635_v5 }
 0x598   : > { %v4833_v52 = vpop.eup %4832  ;;  %v6709_v50 = vmul.f32 0.5, %v2633_v49  ;;  %v6711_v32 = vmul.f32 0.5, %v2522_v18  ;;  %4852 = verf.f32 %v2767_v10  ;;  %v2772_v12 = vmul.f32 0.70710677, %v6696_v8  ;;  %v6724_v49 = vpop.f32.mrf.mxu1 }
 0x599   : > { %v4835_v53 = vpop.eup %4834  ;;  %v6715_v39 = vmul.f32 %v2885_v6, %v6613_v25  ;;  %v6718_v23 = vmul.f32 %v2884_v59, %v6616_v54  ;;  %v2774_v11 = vmul.f32 0.70710677, %v6700_v47  ;;  %v6722_v30 = vadd.f32 %v2533_v19, %v6368_v29 }
 0x59a   : > { %v4837_v18 = vpop.eup %4836  ;;  %v6727_v27 = vmul.f32 %v2886_v41, %v6629_v28  ;;  %v6730_v3 = vadd.f32 %v2531_v31, %v6364_v48  ;;  %v6733_v25 = vadd.f32 %v2646_v57, %v6371_v36  ;;  %v2992_v54 = vpack.c.bf16 %v2944_v17, %v6669_v2  ;;  %v2539_v31 = vpop.f32.mrf.mxu0 }
 0x59b   : > { %v2887_v58 = vadd.f32 1.0, %v4833_v52  ;;  %v6736_v20 = vmul.f32 0.5, %v2635_v5  ;;  %4854 = verf.f32 %v2769_v63  ;;  %v6739_v60 = vadd.f32 %v2644_v42, %v6366_v15  ;;  %v2652_v10 = vpop.f32.mrf.mxu1 }
 0x59c   : > { %v2889_v38 = vadd.f32 1.0, %v4835_v53  ;;  %v6742_v33 = vmul.f32 0.5, %v6659_v61  ;;  %v6746_v28 = vadd.f32 %v6624_v56, %v6364_v48  ;;  %4856 = verf.f32 %v2772_v12  ;;  %3323 = vmatprep.mubr.bf16.mxu0 %v2992_v54 }
 0x59d   : > { %v4839_v7 = vpop.eup %4838  ;;  %v2888_v2 = vadd.f32 1.0, %v4837_v18  ;;  %v6750_v5 = vadd.f32 %v6635_v4, %v6366_v15  ;;  %4858 = verf.f32 %v2774_v11  ;;  %v2776_v42 = vmul.f32 0.70710677, %v6722_v30 }
 0x59e   : > { %v4841_v37 = vpop.eup %4840  ;;  %v2775_v61 = vmul.f32 0.70710677, %v6730_v3  ;;  %v2778_v19 = vmul.f32 0.70710677, %v6733_v25  ;;  %v2994_v56 = vpack.c.bf16 %v2946_v16, %v6672_v40  ;;  %v6757_v6 = vadd.f32 %v2537_v9, %v6364_v48  ;;  %v2541_v16 = vpop.f32.mrf.mxu0 }
 0x59f   : > { %v6759_v59 = vpop.eup %4842  ;;  %v2706_v57 = vmul.f32 0.5, %v6665_v35  ;;  %v2777_v4 = vmul.f32 0.70710677, %v6739_v60  ;;  %4860 = verf.f32 %v2776_v42  ;;  %v2991_v17 = vpack.c.bf16 %v6681_v24, %v6638_v51  ;;  %v2654_v24 = vpop.f32.mrf.mxu1 }
 0x5a0   : > { %v4845_v41 = vpop.eup %4844  ;;  %v6766_v63 = vmul.f32 %v2887_v58, %v6640_v34  ;;  %v2890_v52 = vadd.f32 1.0, %v4839_v7  ;;  %v2771_v40 = vmul.f32 0.70710677, %v6746_v28  ;;  %4862 = verf.f32 %v2778_v19  ;;  %3420 = vmatprep.mubr.bf16.mxu1 %v2994_v56 }
 0x5a1   : > { %v4847_v12 = vpop.eup %4846  ;;  %v6770_v9 = vmul.f32 %v2889_v38, %v6646_v1  ;;  %v2952_v35 = vmul.f32 %v2888_v2, %v6655_v13  ;;  %v6773_v53 = vadd.f32 1.0, %v4841_v37  ;;  %v2773_v51 = vmul.f32 0.70710677, %v6750_v5  ;;  %3324 = vmatmul.mubr.bf16.gmra.mxu0 %v2991_v17 }
 0x5a2   : > { %v4849_v34 = vpop.eup %4848  ;;  %4864 = verf.f32 %v2775_v61  ;;  %v2779_v11 = vmul.f32 0.70710677, %v6757_v6  ;;  %v2993_v18 = vpack.c.bf16 %v6691_v26, %v6653_v46  ;;  %v6780_v54 = vadd.f32 %v2539_v31, %v6368_v29  ;;  %v2543_v26 = vpop.f32.mrf.mxu0 }
 0x5a3   : > { %v4851_v1 = vpop.eup %4850  ;;  %v2892_v58 = vadd.f32 1.0, %v4845_v41  ;;  %4866 = verf.f32 %v2777_v4  ;;  %v6783_v13 = vadd.f32 %v2652_v10, %v6371_v36  ;;  %v6786_v38 = vadd.f32 %v2541_v16, %v6364_v48  ;;  %v2656_v61 = vpop.f32.mrf.mxu1 }
 0x5a4   : > { %v2954_v7 = vmul.f32 %v2890_v52, %v6674_v45  ;;  %4868 = verf.f32 %v2771_v40  ;;  %3421 = vmatmul.mubr.bf16.gmra.mxu1 %v2993_v18  ;;  %v2780_v2 = vmul.f32 0.70710677, %v6780_v54  ;;  %v6791_v46 = vadd.f32 %v2654_v24, %v6366_v15 }
 0x5a5   : > { %v4853_v31 = vpop.eup %4852  ;;  %v2896_v42 = vadd.f32 1.0, %v4847_v12  ;;  %v2898_v37 = vadd.f32 1.0, %v4849_v34  ;;  %4870 = verf.f32 %v2773_v51  ;;  %v2782_v10 = vmul.f32 0.70710677, %v6783_v13 }
 0x5a6   : > { %v2894_v19 = vadd.f32 1.0, %v4851_v1  ;;  %4872 = verf.f32 %v2779_v11  ;;  %v6796_v48 = vadd.f32 %v6724_v49, %v6366_v15  ;;  %v2783_v45 = vmul.f32 0.70710677, %v6786_v38 }
 0x5a7   : > { %v2956_v56 = vmul.f32 %v2892_v58, %v6707_v43  ;;  %4874 = verf.f32 %v2780_v2  ;;  %v2785_v4 = vmul.f32 0.70710677, %v6791_v46  ;;  %v6802_v17 = vadd.f32 %v2543_v26, %v6368_v29 }
 0x5a8   : > { %v4855_v41 = vpop.eup %4854  ;;  %v2895_v52 = vadd.f32 1.0, %v4853_v31  ;;  %4876 = verf.f32 %v2782_v10  ;;  %v6805_v40 = vadd.f32 %v2656_v61, %v6371_v36  ;;  %v2996_v16 = vpack.c.bf16 %v2952_v35, %v6718_v23 }
 0x5a9   : > { %v4857_v15 = vpop.eup %4856  ;;  %v2960_v49 = vmul.f32 %v2896_v42, %v6742_v33  ;;  %v2962_v12 = vmul.f32 %v2898_v37, %v2706_v57  ;;  %4878 = verf.f32 %v2783_v45  ;;  %v2784_v43 = vmul.f32 0.70710677, %v6802_v17 }
 0x5aa   : > { %v4859_v51 = vpop.eup %4858  ;;  %v2712_v24 = vmul.f32 0.5, %v6722_v30  ;;  %v2781_v29 = vmul.f32 0.70710677, %v6796_v48  ;;  %4880 = verf.f32 %v2785_v4  ;;  %v2786_v34 = vmul.f32 0.70710677, %v6805_v40  ;;  %3331 = vmatprep.mubr.bf16.mxu0 %v2996_v16 }
 0x5ab   : > { %v2958_v36 = vmul.f32 %v2894_v19, %v6709_v50  ;;  %v2897_v11 = vadd.f32 1.0, %v4855_v41  ;;  %4882 = verf.f32 %v2784_v43  ;;  %v2998_v23 = vpack.c.bf16 %v2954_v7, %v6727_v27 }
 0x5ac   : > { %v4861_v33 = vpop.eup %4860  ;;  %v2900_v57 = vadd.f32 1.0, %v4857_v15  ;;  %4884 = verf.f32 %v2786_v34  ;;  %v2995_v35 = vpack.c.bf16 %v6766_v63, %v6704_v62  ;;  %v2997_v30 = vpack.c.bf16 %v6770_v9, %v6715_v39 }
 0x5ad   : > { %v4863_v18 = vpop.eup %4862  ;;  %v2902_v1 = vadd.f32 1.0, %v4859_v51  ;;  %v2904_v58 = vadd.f32 1.0, %v4861_v33  ;;  %3428 = vmatprep.mubr.bf16.mxu1 %v2998_v23  ;;  %v3000_v2 = vpack.c.bf16 %v2960_v49, %v2956_v56  ;;  %v3002_v26 = vpack.c.bf16 %v2962_v12, %v2958_v36 }
 0x5ae   : > { %v2893_v50 = vadd.f32 1.0, %v6759_v59  ;;  %v2714_v31 = vmul.f32 0.5, %v6733_v25  ;;  %v2906_v27 = vadd.f32 1.0, %v4863_v18  ;;  %4886 = verf.f32 %v2781_v29  ;;  %3332 = vmatmul.mubr.bf16.gmra.mxu0 %v2995_v35  ;;  %3429 = vmatmul.mubr.bf16.gmra.mxu1 %v2997_v30 }
 0x5af   : > { %v4865_v7 = vpop.eup %4864  ;;  %v2699_v62 = vmul.f32 0.5, %v6633_v55  ;;  %v2708_v63 = vmul.f32 0.5, %v6696_v8  ;;  %v2710_v39 = vmul.f32 0.5, %v6700_v47  ;;  %v2968_v9 = vmul.f32 %v2904_v58, %v2712_v24  ;;  %3339 = vmatprep.mubr.bf16.mxu0 %v3000_v2  ;;  %3436 = vmatprep.mubr.bf16.mxu1 %v3002_v26 }
 0x5b0   : > { %v4867_v42 = vpop.eup %4866  ;;  %v2701_v37 = vmul.f32 0.5, %v6644_v22  ;;  %v2959_v59 = vmul.f32 %v2895_v52, %v6711_v32  ;;  %v2961_v25 = vmul.f32 %v2897_v11, %v6736_v20  ;;  %v2970_v10 = vmul.f32 %v2906_v27, %v2714_v31 }
 0x5b1   : > { %v4869_v61 = vpop.eup %4868  ;;  %v2964_v19 = vmul.f32 %v2900_v57, %v2708_v63  ;;  %v2966_v45 = vmul.f32 %v2902_v1, %v2710_v39  ;;  %v2955_v55 = vmul.f32 %v6773_v53, %v2699_v62  ;;  %v2903_v47 = vadd.f32 1.0, %v4865_v7 }
 0x5b2   : > { %v4871_v56 = vpop.eup %4870  ;;  %v2957_v8 = vmul.f32 %v2893_v50, %v2701_v37  ;;  %v2905_v41 = vadd.f32 1.0, %v4867_v42  ;;  %v2899_v32 = vadd.f32 1.0, %v4869_v61  ;;  %v2711_v20 = vmul.f32 0.5, %v6730_v3 }
 0x5b3   : > { %v4873_v4 = vpop.eup %4872  ;;  %v3004_v16 = vpack.c.bf16 %v2968_v9, %v2964_v19  ;;  %v3006_v15 = vpack.c.bf16 %v2970_v10, %v2966_v45  ;;  %v2999_v12 = vpack.c.bf16 %v2959_v59, %v2955_v55  ;;  %v2901_v52 = vadd.f32 1.0, %v4871_v56 }
 0x5b4   : > { %v4875_v49 = vpop.eup %4874  ;;  %v3001_v22 = vpack.c.bf16 %v2961_v25, %v2957_v8  ;;  %v2713_v51 = vmul.f32 0.5, %v6739_v60  ;;  %v2707_v29 = vmul.f32 0.5, %v6746_v28  ;;  %v2709_v34 = vmul.f32 0.5, %v6750_v5 }
 0x5b5   : > { %v4877_v43 = vpop.eup %4876  ;;  %v2967_v36 = vmul.f32 %v2903_v47, %v2711_v20  ;;  %v2908_v23 = vadd.f32 1.0, %v4875_v49  ;;  %v2716_v57 = vmul.f32 0.5, %v6780_v54  ;;  %v2720_v18 = vmul.f32 0.5, %v6802_v17 }
 0x5b6   : > { %v4879_v24 = vpop.eup %4878  ;;  %3340 = vmatmul.mubr.bf16.gmra.mxu0 %v2999_v12  ;;  %3437 = vmatmul.mubr.bf16.gmra.mxu1 %v3001_v22  ;;  %v2969_v11 = vmul.f32 %v2905_v41, %v2713_v51  ;;  %v2910_v35 = vadd.f32 1.0, %v4877_v43  ;;  %v2963_v30 = vmul.f32 %v2899_v32, %v2707_v29  ;;  %v2965_v60 = vmul.f32 %v2901_v52, %v2709_v34 }
 0x5b7   : > { %v4881_v53 = vpop.eup %4880  ;;  %3347 = vmatprep.mubr.bf16.mxu0 %v3004_v16  ;;  %3444 = vmatprep.mubr.bf16.mxu1 %v3006_v15  ;;  %v2718_v1 = vmul.f32 0.5, %v6783_v13  ;;  %v2722_v58 = vmul.f32 0.5, %v6805_v40  ;;  %v2972_v26 = vmul.f32 %v2908_v23, %v2716_v57  ;;  %v2911_v62 = vadd.f32 1.0, %v4879_v24  ;;  %v6845_v15 = vld [vmem:[%s760_s25] ss:$0 sm:$0xff] }
 0x5b8   : > { %v4883_v33 = vpop.eup %4882  ;;  %v3003_v31 = vpack.c.bf16 %v2967_v36, %v2963_v30  ;;  %v3005_v27 = vpack.c.bf16 %v2969_v11, %v2965_v60  ;;  %v2913_v54 = vadd.f32 1.0, %v4881_v53  ;;  %v2719_v39 = vmul.f32 0.5, %v6786_v38 }
 0x5b9   : > { %v4885_v3 = vpop.eup %4884  ;;  %v2912_v28 = vadd.f32 1.0, %v4883_v33  ;;  %v2974_v7 = vmul.f32 %v2910_v35, %v2718_v1  ;;  %v2907_v42 = vadd.f32 1.0, %v4873_v4  ;;  %v2721_v37 = vmul.f32 0.5, %v6791_v46 }
 0x5ba   : > { %v2914_v5 = vadd.f32 1.0, %v4885_v3  ;;  %v2715_v40 = vmul.f32 0.5, %v6757_v6  ;;  %v2717_v59 = vmul.f32 0.5, %v6796_v48  ;;  %v2975_v25 = vmul.f32 %v2911_v62, %v2719_v39  ;;  %v7269_v39 = vld [vmem:[#allocation12_spill] sm:$0xff] }
 0x5bb   : > { %v4887_v2 = vpop.eup %4886  ;;  %v2976_v50 = vmul.f32 %v2912_v28, %v2720_v18  ;;  %v2977_v10 = vmul.f32 %v2913_v54, %v2721_v37  ;;  %v7270_v37 = vld [vmem:[#allocation17_spill] sm:$0xff] }
 0x5bc   : > { %v2978_v63 = vmul.f32 %v2914_v5, %v2722_v58  ;;  %v2909_v17 = vadd.f32 1.0, %v4887_v2  ;;  %v2971_v61 = vmul.f32 %v2907_v42, %v2715_v40 }
 0x5bd   : > { %v3008_v9 = vpack.c.bf16 %v2976_v50, %v2972_v26 }
 0x5be   : > { %3348 = vmatmul.mubr.bf16.gmra.mxu0 %v3003_v31  ;;  %3445 = vmatmul.mubr.bf16.gmra.mxu1 %v3005_v27  ;;  %v3010_v13 = vpack.c.bf16 %v2978_v63, %v2974_v7  ;;  %v2973_v19 = vmul.f32 %v2909_v17, %v2717_v59  ;;  %v3007_v38 = vpack.c.bf16 %v2975_v25, %v2971_v61 }
 0x5bf   : > { %3355 = vmatprep.mubr.bf16.mxu0 %v3008_v9 }
 0x5c0   : > { %3452 = vmatprep.mubr.bf16.mxu1 %v3010_v13  ;;  %v3009_v45 = vpack.c.bf16 %v2977_v10, %v2973_v19 }
 0x5c6   : > { %3356 = vmatmul.mubr.bf16.gmra.mxu0 %v3007_v38  ;;  %3453 = vmatmul.mubr.bf16.gmra.mxu1 %v3009_v45 }
 0x639   : > { %v4306_v56 = vpop.f32.mrf.mxu0 }
 0x63a   : > { %v4370_v46 = vpop.f32.mrf.mxu1 }
 0x63b   : > { %v4307_v55 = vpop.f32.mrf.mxu0 }
 0x63c   : > { %v4308_v8 = vadd.f32 %v4307_v55, %v4306_v56  ;;  %v4371_v4 = vpop.f32.mrf.mxu1 }
 0x63d   : > { %v4372_v47 = vadd.f32 %v4371_v4, %v4370_v46  ;;  %v4309_v41 = vpop.f32.mrf.mxu0 }
 0x63e   : > { %v4373_v6 = vpop.f32.mrf.mxu1 }
 0x63f   : > { %v3399_v16 = vadd.f32 %v4372_v47, %v4308_v8  ;;  %v4310_v48 = vpop.f32.mrf.mxu0  ;;  %v7271_v47 = vld [vmem:[#allocation18_spill] sm:$0xff] }
 0x640   : > { %v4311_v49 = vadd.f32 %v4310_v48, %v4309_v41  ;;  %v4374_v12 = vpop.f32.mrf.mxu1 }
 0x641   : > { %v3461_v22 = vadd.f32 %v3399_v16, %v6080_v44  ;;  %v4375_v43 = vadd.f32 %v4374_v12, %v4373_v6 }
 0x643   : > { %v6849_v32 = vadd.f32 %v6845_v15, %v3461_v22  ;;  %v3402_v52 = vadd.f32 %v4375_v43, %v4311_v49  ;;  %v7272_v22 = vld [vmem:[#allocation9_spill] sm:$0xff] }
 0x645   : > { %v3462_v20 = vadd.f32 %v3402_v52, %v6085_v21 }
 0x647   : > { %v6853_v51 = vadd.f32 %v6845_v15, %v3462_v20 }
 0x649   : > { %v4312_v24 = vpop.f32.mrf.mxu0 }
 0x64a   : > { %v4376_v29 = vpop.f32.mrf.mxu1 }
 0x64b   : > { %v4313_v53 = vpop.f32.mrf.mxu0 }
 0x64c   : > { %v4314_v34 = vadd.f32 %v4313_v53, %v4312_v24  ;;  %v4377_v36 = vpop.f32.mrf.mxu1 }
 0x64d   : > { %v4378_v11 = vadd.f32 %v4377_v36, %v4376_v29  ;;  %v4315_v23 = vpop.f32.mrf.mxu0 }
 0x64e   : > { %v4379_v33 = vpop.f32.mrf.mxu1 }
 0x64f   : > { %v3407_v57 = vadd.f32 %v4378_v11, %v4314_v34  ;;  %v4316_v44 = vpop.f32.mrf.mxu0 }
 0x650   : > { %v4317_v35 = vadd.f32 %v4316_v44, %v4315_v23  ;;  %v4380_v3 = vpop.f32.mrf.mxu1 }
 0x651   : > { %v3463_v30 = vadd.f32 %v3407_v57, %v6092_v14  ;;  %v4381_v60 = vadd.f32 %v4380_v3, %v4379_v33  ;;  %v7273_v57 = vld [vmem:[#allocation20_spill] sm:$0xff] }
 0x653   : > { %v6857_v21 = vadd.f32 %v6845_v15, %v3463_v30  ;;  %v3410_v18 = vadd.f32 %v4381_v60, %v4317_v35 }
 0x655   : > { %v3464_v28 = vadd.f32 %v3410_v18, %v6088_v0  ;;  %v4318_v1 = vpop.f32.mrf.mxu0 }
 0x656   : > { %v4382_v58 = vpop.f32.mrf.mxu1 }
 0x657   : > { %v6861_v5 = vadd.f32 %v6845_v15, %v3464_v28  ;;  %v4319_v2 = vpop.f32.mrf.mxu0 }
 0x658   : > { %v4320_v26 = vadd.f32 %v4319_v2, %v4318_v1  ;;  %v4383_v50 = vpop.f32.mrf.mxu1  ;;  %v7274_v2 = vld [vmem:[#allocation16_spill] sm:$0xff] }
 0x659   : > { %v4384_v31 = vadd.f32 %v4383_v50, %v4382_v58  ;;  %v4321_v27 = vpop.f32.mrf.mxu0 }
 0x65a   : > { %v4385_v7 = vpop.f32.mrf.mxu1 }
 0x65b   : > { %v3415_v62 = vadd.f32 %v4384_v31, %v4320_v26  ;;  %v4322_v14 = vpop.f32.mrf.mxu0 }
 0x65c   : > { %v4323_v54 = vadd.f32 %v4322_v14, %v4321_v27  ;;  %v4386_v63 = vpop.f32.mrf.mxu1 }
 0x65d   : > { %v3465_v9 = vadd.f32 %v3415_v62, %v7269_v39  ;;  %v4387_v42 = vadd.f32 %v4386_v63, %v4385_v7  ;;  %v7275_v39 = vld [vmem:[#allocation14_spill] sm:$0xff] }
 0x65f   : > { %v6865_v0 = vadd.f32 %v6845_v15, %v3465_v9  ;;  %v3418_v17 = vadd.f32 %v4387_v42, %v4323_v54 }
 0x661   : > { %v3466_v13 = vadd.f32 %v3418_v17, %v7270_v37  ;;  %v4324_v40 = vpop.f32.mrf.mxu0 }
 0x663   : > { %v6869_v59 = vadd.f32 %v6845_v15, %v3466_v13  ;;  %v4325_v25 = vpop.f32.mrf.mxu0 }
 0x664   : > { %v4388_v10 = vpop.f32.mrf.mxu1  ;;  %v4326_v61 = vadd.f32 %v4325_v25, %v4324_v40 }
 0x665   : > { %v4327_v19 = vpop.f32.mrf.mxu0 }
 0x666   : > { %v4389_v38 = vpop.f32.mrf.mxu1 }
 0x667   : > { %v4390_v45 = vadd.f32 %v4389_v38, %v4388_v10  ;;  %v4328_v56 = vpop.f32.mrf.mxu0 }
 0x668   : > { %v4391_v46 = vpop.f32.mrf.mxu1  ;;  %v4329_v8 = vadd.f32 %v4328_v56, %v4327_v19  ;;  %v7276_v19 = vld [vmem:[#allocation11_spill] sm:$0xff] }
 0x669   : > { %v3423_v55 = vadd.f32 %v4390_v45, %v4326_v61 }
 0x66a   : > { %v4392_v4 = vpop.f32.mrf.mxu1 }
 0x66b   : > { %v3467_v41 = vadd.f32 %v3423_v55, %v7271_v47  ;;  %v4393_v6 = vadd.f32 %v4392_v4, %v4391_v46 }
 0x66d   : > { %v6873_v16 = vadd.f32 %v6845_v15, %v3467_v41  ;;  %v3426_v48 = vadd.f32 %v4393_v6, %v4329_v8  ;;  %v7277_v6 = vld [vmem:[#allocation13_spill] sm:$0xff] }
 0x66e   : > { %v4330_v49 = vpop.f32.mrf.mxu0  ;;  %v4394_v12 = vpop.f32.mrf.mxu1 }
 0x66f   : > { %v3468_v43 = vadd.f32 %v3426_v48, %v7272_v22 }
 0x670   : > { %v4331_v52 = vpop.f32.mrf.mxu0  ;;  %v4395_v20 = vpop.f32.mrf.mxu1 }
 0x671   : > { %v6877_v24 = vadd.f32 %v6845_v15, %v3468_v43  ;;  %v4332_v29 = vadd.f32 %v4331_v52, %v4330_v49  ;;  %v4396_v53 = vadd.f32 %v4395_v20, %v4394_v12 }
 0x672   : > { %v4333_v34 = vpop.f32.mrf.mxu0  ;;  %v4397_v36 = vpop.f32.mrf.mxu1 }
 0x673   : > { %v3431_v11 = vadd.f32 %v4396_v53, %v4332_v29 }
 0x674   : > { %v4334_v23 = vpop.f32.mrf.mxu0  ;;  %v4398_v33 = vpop.f32.mrf.mxu1 }
 0x675   : > { %v3469_v44 = vadd.f32 %v3431_v11, %v7273_v57  ;;  %v4335_v35 = vadd.f32 %v4334_v23, %v4333_v34  ;;  %v4399_v3 = vadd.f32 %v4398_v33, %v4397_v36  ;;  %v7278_v34 = vld [vmem:[#allocation22_spill] sm:$0xff] }
 0x676   : > { %v4336_v30 = vpop.f32.mrf.mxu0  ;;  %v4400_v60 = vpop.f32.mrf.mxu1 }
 0x677   : > { %v6881_v18 = vadd.f32 %v6845_v15, %v3469_v44  ;;  %v3434_v28 = vadd.f32 %v4399_v3, %v4335_v35 }
 0x678   : > { %v4337_v1 = vpop.f32.mrf.mxu0  ;;  %v4401_v58 = vpop.f32.mrf.mxu1 }
 0x679   : > { %v3470_v26 = vadd.f32 %v3434_v28, %v7274_v2  ;;  %v4338_v50 = vadd.f32 %v4337_v1, %v4336_v30  ;;  %v4402_v31 = vadd.f32 %v4401_v58, %v4400_v60  ;;  %v7279_v60 = vld [vmem:[#allocation19_spill] sm:$0xff] }
 0x67a   : > { %v4339_v27 = vpop.f32.mrf.mxu0  ;;  %v4403_v7 = vpop.f32.mrf.mxu1 }
 0x67b   : > { %v6885_v62 = vadd.f32 %v6845_v15, %v3470_v26  ;;  %v3439_v14 = vadd.f32 %v4402_v31, %v4338_v50  ;;  %v7280_v50 = vld [vmem:[#allocation24_spill] sm:$0xff] }
 0x67c   : > { %v4340_v54 = vpop.f32.mrf.mxu0  ;;  %v4404_v63 = vpop.f32.mrf.mxu1 }
 0x67d   : > { %v3471_v9 = vadd.f32 %v3439_v14, %v7275_v39  ;;  %v4341_v42 = vadd.f32 %v4340_v54, %v4339_v27  ;;  %v4405_v17 = vadd.f32 %v4404_v63, %v4403_v7 }
 0x67e   : > { %v4342_v37 = vpop.f32.mrf.mxu0  ;;  %v4406_v13 = vpop.f32.mrf.mxu1 }
 0x67f   : > { %v6889_v40 = vadd.f32 %v6845_v15, %v3471_v9  ;;  %v3442_v25 = vadd.f32 %v4405_v17, %v4341_v42 }
 0x680   : > { %v4343_v10 = vpop.f32.mrf.mxu0  ;;  %v4407_v61 = vpop.f32.mrf.mxu1 }
 0x681   : > { %v3472_v38 = vadd.f32 %v3442_v25, %v7276_v19  ;;  %v4344_v45 = vadd.f32 %v4343_v10, %v4342_v37  ;;  %v4408_v56 = vadd.f32 %v4407_v61, %v4406_v13 }
 0x682   : > { %v4345_v46 = vpop.f32.mrf.mxu0  ;;  %v4409_v55 = vpop.f32.mrf.mxu1 }
 0x683   : > { %v6893_v8 = vadd.f32 %v6845_v15, %v3472_v38  ;;  %v3447_v4 = vadd.f32 %v4408_v56, %v4344_v45 }
 0x684   : > { %v4346_v47 = vpop.f32.mrf.mxu0  ;;  %v4410_v41 = vpop.f32.mrf.mxu1 }
 0x685   : > { %v3473_v48 = vadd.f32 %v3447_v4, %v7277_v6  ;;  %v4347_v49 = vadd.f32 %v4346_v47, %v4345_v46  ;;  %v4411_v12 = vadd.f32 %v4410_v41, %v4409_v55 }
 0x686   : > { %v4348_v22 = vpop.f32.mrf.mxu0  ;;  %v4412_v43 = vpop.f32.mrf.mxu1 }
 0x687   : > { %v6897_v52 = vadd.f32 %v6845_v15, %v3473_v48  ;;  %v3450_v20 = vadd.f32 %v4411_v12, %v4347_v49 }
 0x688   : > { %v4349_v29 = vpop.f32.mrf.mxu0  ;;  %v4413_v53 = vpop.f32.mrf.mxu1 }
 0x689   : > { %v3474_v36 = vadd.f32 %v3450_v20, %v7278_v34  ;;  %v4350_v11 = vadd.f32 %v4349_v29, %v4348_v22  ;;  %v4414_v23 = vadd.f32 %v4413_v53, %v4412_v43 }
 0x68a   : > { %v4351_v33 = vpop.f32.mrf.mxu0  ;;  %v4415_v57 = vpop.f32.mrf.mxu1 }
 0x68b   : > { %v6901_v44 = vadd.f32 %v6845_v15, %v3474_v36  ;;  %v3455_v35 = vadd.f32 %v4414_v23, %v4350_v11 }
 0x68c   : > { %v4352_v3 = vpop.f32.mrf.mxu0  ;;  %v4416_v30 = vpop.f32.mrf.mxu1 }
 0x68d   : > { %v3475_v28 = vadd.f32 %v3455_v35, %v7279_v60  ;;  %v4353_v1 = vadd.f32 %v4352_v3, %v4351_v33  ;;  %v4417_v58 = vadd.f32 %v4416_v30, %v4415_v57 }
 0x68f   : > { %v6905_v2 = vadd.f32 %v6845_v15, %v3475_v28  ;;  %v3458_v26 = vadd.f32 %v4417_v58, %v4353_v1  ;;  %3503 = sbr.rel (%p4267_p6) target bundleno = 1692 (0x69c), region = 96 }
 0x691   : > { %v3476_v31 = vadd.f32 %v3458_v26, %v7280_v50 }
 0x693   : > { %v6909_v27 = vadd.f32 %v6845_v15, %v3476_v31 }
 0x694   : > { %3504 = vst [vmem:[#allocation2 + $0x30] sm:$0xff] %v6849_v32  ;;  %3505 = vst [vmem:[#allocation2] sm:$0xff] %v6853_v51 }
 0x695   : > { %3506 = vst [vmem:[#allocation2 + $0x58] sm:$0xff] %v6857_v21  ;;  %3507 = vst [vmem:[#allocation2 + $0x18] sm:$0xff] %v6861_v5 }
 0x696   : > { %3508 = vst [vmem:[#allocation2 + $0x50] sm:$0xff] %v6865_v0  ;;  %3509 = vst [vmem:[#allocation2 + $0x68] sm:$0xff] %v6869_v59 }
 0x697   : > { %3510 = vst [vmem:[#allocation2 + $0x8] sm:$0xff] %v6873_v16  ;;  %3511 = vst [vmem:[#allocation2 + $0x48] sm:$0xff] %v6877_v24 }
 0x698   : > { %3512 = vst [vmem:[#allocation2 + $0x40] sm:$0xff] %v6881_v18  ;;  %3513 = vst [vmem:[#allocation2 + $0x20] sm:$0xff] %v6885_v62 }
 0x699   : > { %3514 = vst [vmem:[#allocation2 + $0x10] sm:$0xff] %v6889_v40  ;;  %3515 = vst [vmem:[#allocation2 + $0x38] sm:$0xff] %v6893_v8 }
 0x69a   : > { %3516 = vst [vmem:[#allocation2 + $0x60] sm:$0xff] %v6897_v52  ;;  %3517 = vst [vmem:[#allocation2 + $0x70] sm:$0xff] %v6901_v44 }
 0x69b   : > { %3518 = vst [vmem:[#allocation2 + $0x78] sm:$0xff] %v6905_v2  ;;  %3519 = vst [vmem:[#allocation2 + $0x28] sm:$0xff] %v6909_v27 }
 0x69c PF: > { %p4268_p7 = scmp.ne.s32.totalorder %s4986_s24, 1 }
 0x69d   : > { %s7281_s25 = sld [smem:[#allocation36_spill]] (!%p4268_p7) }
 0x69e   : > { %3523 = sbr.rel (%p4268_p7) target bundleno = 2259 (0x8d3), region = 100  ;;  %s7283_s27 = sld [smem:[#allocation34_spill]] (!%p4268_p7) }
 0x69f   : > { %s7285_s14 = sld [smem:[#allocation37_spill]] (!%p4268_p7) }
 0x6a3   : > { %3526 = vadd.xlane.f32.xlu0 %v6849_v32  ;;  %3530 = vadd.xlane.f32.xlu1 %v6857_v21  ;;  %s7282_s21 = smov %s7281_s25  ;;  %vm4998_vm2 = vmmov 0   ;;  %vm3858_vm3 = vcmask 1041409   ;;  %vm3860_vm4 = vcmask 1042434   ;;  %vm3862_vm5 = vcmask 1043459  }
 0x6a4   : > { %vm3864_vm6 = vcmask 1044484   ;;  %vm3866_vm7 = vcmask 1045509   ;;  %vm3868_vm8 = vcmask 1046534   ;;  %vm3870_vm9 = vcmask 1047559  }
 0x6a7   : > { %3528 = vadd.xlane.f32.xlu0 %v6853_v51  ;;  %3532 = vadd.xlane.f32.xlu1 %v6861_v5 }
 0x6ab   : > { %3534 = vadd.xlane.f32.xlu0 %v6865_v0  ;;  %3536 = vadd.xlane.f32.xlu1 %v6869_v59 }
 0x6af   : > { %3538 = vadd.xlane.f32.xlu0 %v6873_v16  ;;  %3540 = vadd.xlane.f32.xlu1 %v6877_v24 }
 0x6b3   : > { %3542 = vadd.xlane.f32.xlu0 %v6881_v18  ;;  %3544 = vadd.xlane.f32.xlu1 %v6885_v62 }
 0x6b7   : > { %3546 = vadd.xlane.f32.xlu0 %v6889_v40  ;;  %3548 = vadd.xlane.f32.xlu1 %v6893_v8 }
 0x6bb   : > { %3550 = vadd.xlane.f32.xlu0 %v6897_v52  ;;  %3552 = vadd.xlane.f32.xlu1 %v6901_v44 }
 0x6bf   : > { %3554 = vadd.xlane.f32.xlu0 %v6905_v2  ;;  %3556 = vadd.xlane.f32.xlu1 %v6909_v27 }
 0x72c   : > { %v3527_v15 = vpop.xlane.xlu0 %3526  ;;  %v3531_v7 = vpop.xlane.xlu1 %3530 }
 0x72d   : > { %v3558_v14 = vmul.f32 0.0078125, %v3527_v15  ;;  %v3560_v54 = vmul.f32 0.0078125, %v3531_v7 }
 0x72f   : > { %v6946_v63 = vsub.f32 %v6849_v32, %v3558_v14  ;;  %v6949_v39 = vsub.f32 %v6857_v21, %v3560_v54  ;;  %v4997_v14 = vmov 0.0   ;;  %v4906_v54 = vld [vmem:[%s7282_s21 + $0x28] sm:$0xff]  }
 0x730   : > { %v3529_v9 = vpop.xlane.xlu0 %3528  ;;  %v3533_v42 = vpop.xlane.xlu1 %3532  ;;  %4427 = vmatprep.subr.bf16.mxu0 %v4997_v14  ;;  %4443 = vmatprep.mubr.msk.bf16.mxu0 %vm4998_vm2, %v4997_v14 }
 0x731   : > { %v3559_v17 = vmul.f32 0.0078125, %v3529_v9  ;;  %v3590_v37 = vmul.f32 %v6946_v63, %v6946_v63  ;;  %v3561_v13 = vmul.f32 0.0078125, %v3533_v42  ;;  %v3592_v32 = vmul.f32 %v6949_v39, %v6949_v39  ;;  %v4907_v9 = vld [vmem:[%s7282_s21 + $0x20] sm:$0xff]   ;;  %v4908_v42 = vld [vmem:[%s7282_s21 + $0x18] sm:$0xff]  }
 0x733   : > { %v6954_v25 = vsub.f32 %v6853_v51, %v3559_v17  ;;  %3606 = vadd.xlane.f32.xlu0 %v3590_v37  ;;  %v6957_v10 = vsub.f32 %v6861_v5, %v3561_v13  ;;  %v4909_v17 = vld [vmem:[%s7282_s21 + $0x10] sm:$0xff]   ;;  %v4910_v37 = vld [vmem:[%s7282_s21 + $0x8] sm:$0xff]   ;;  %v4911_v13 = vld [vmem:[%s7282_s21] sm:$0xff]  }
 0x734   : > { %v3535_v61 = vpop.xlane.xlu0 %3534  ;;  %v3537_v21 = vpop.xlane.xlu1 %3536 }
 0x735   : > { %v3562_v19 = vmul.f32 0.0078125, %v3535_v61  ;;  %v3591_v38 = vmul.f32 %v6954_v25, %v6954_v25  ;;  %v3563_v45 = vmul.f32 0.0078125, %v3537_v21  ;;  %v3593_v5 = vmul.f32 %v6957_v10, %v6957_v10 }
 0x737   : > { %v6964_v56 = vsub.f32 %v6865_v0, %v3562_v19  ;;  %3610 = vadd.xlane.f32.xlu0 %v3592_v32  ;;  %3608 = vadd.xlane.f32.xlu1 %v3591_v38  ;;  %v6967_v51 = vsub.f32 %v6869_v59, %v3563_v45 }
 0x738   : > { %v3539_v46 = vpop.xlane.xlu0 %3538  ;;  %v3541_v55 = vpop.xlane.xlu1 %3540 }
 0x739   : > { %v3564_v4 = vmul.f32 0.0078125, %v3539_v46  ;;  %v3594_v47 = vmul.f32 %v6964_v56, %v6964_v56  ;;  %v3565_v41 = vmul.f32 0.0078125, %v3541_v55  ;;  %v3595_v59 = vmul.f32 %v6967_v51, %v6967_v51 }
 0x73b   : > { %v6974_v6 = vsub.f32 %v6873_v16, %v3564_v4  ;;  %3612 = vadd.xlane.f32.xlu1 %v3593_v5  ;;  %3614 = vadd.xlane.f32.xlu0 %v3594_v47  ;;  %v6977_v0 = vsub.f32 %v6877_v24, %v3565_v41 }
 0x73c   : > { %v3543_v48 = vpop.xlane.xlu0 %3542  ;;  %v3545_v49 = vpop.xlane.xlu1 %3544 }
 0x73d   : > { %v3566_v12 = vmul.f32 0.0078125, %v3543_v48  ;;  %v3596_v22 = vmul.f32 %v6974_v6, %v6974_v6  ;;  %v3567_v43 = vmul.f32 0.0078125, %v3545_v49  ;;  %v3597_v24 = vmul.f32 %v6977_v0, %v6977_v0 }
 0x73f   : > { %v6984_v20 = vsub.f32 %v6881_v18, %v3566_v12  ;;  %3616 = vadd.xlane.f32.xlu1 %v3595_v59  ;;  %3618 = vadd.xlane.f32.xlu0 %v3596_v22  ;;  %v6987_v16 = vsub.f32 %v6885_v62, %v3567_v43 }
 0x740   : > { %v3547_v29 = vpop.xlane.xlu0 %3546  ;;  %v3549_v53 = vpop.xlane.xlu1 %3548 }
 0x741   : > { %v3568_v34 = vmul.f32 0.0078125, %v3547_v29  ;;  %v3598_v36 = vmul.f32 %v6984_v20, %v6984_v20  ;;  %v3569_v11 = vmul.f32 0.0078125, %v3549_v53  ;;  %v3599_v62 = vmul.f32 %v6987_v16, %v6987_v16 }
 0x743   : > { %v6994_v23 = vsub.f32 %v6889_v40, %v3568_v34  ;;  %3620 = vadd.xlane.f32.xlu1 %v3597_v24  ;;  %3622 = vadd.xlane.f32.xlu0 %v3598_v36  ;;  %v6997_v18 = vsub.f32 %v6893_v8, %v3569_v11 }
 0x744   : > { %v3551_v33 = vpop.xlane.xlu0 %3550  ;;  %v3553_v57 = vpop.xlane.xlu1 %3552 }
 0x745   : > { %v3570_v35 = vmul.f32 0.0078125, %v3551_v33  ;;  %v3600_v3 = vmul.f32 %v6994_v23, %v6994_v23  ;;  %v3571_v30 = vmul.f32 0.0078125, %v3553_v57  ;;  %v3601_v8 = vmul.f32 %v6997_v18, %v6997_v18 }
 0x747   : > { %v7004_v60 = vsub.f32 %v6897_v52, %v3570_v35  ;;  %3624 = vadd.xlane.f32.xlu1 %v3599_v62  ;;  %3626 = vadd.xlane.f32.xlu0 %v3600_v3  ;;  %v7007_v40 = vsub.f32 %v6901_v44, %v3571_v30 }
 0x748   : > { %v3555_v28 = vpop.xlane.xlu0 %3554  ;;  %v3557_v1 = vpop.xlane.xlu1 %3556 }
 0x749   : > { %v3572_v58 = vmul.f32 0.0078125, %v3555_v28  ;;  %v3602_v26 = vmul.f32 %v7004_v60, %v7004_v60  ;;  %v3573_v50 = vmul.f32 0.0078125, %v3557_v1  ;;  %v3603_v44 = vmul.f32 %v7007_v40, %v7007_v40 }
 0x74b   : > { %v7014_v31 = vsub.f32 %v6905_v2, %v3572_v58  ;;  %3628 = vadd.xlane.f32.xlu1 %v3601_v8  ;;  %3630 = vadd.xlane.f32.xlu0 %v3602_v26  ;;  %v7017_v52 = vsub.f32 %v6909_v27, %v3573_v50  ;;  %v4904_v2 = vld [vmem:[%s7281_s25 + $0x38] sm:$0xff]   ;;  %v4905_v27 = vld [vmem:[%s7282_s21 + $0x30] sm:$0xff]   ;;  %s7284_s25 = sld [smem:[#allocation35_spill]] }
 0x74c   : > { %4428 = vmatpush3.bf16.msra.mxu0 %v4904_v2 }
 0x74d   : > { %v3604_v15 = vmul.f32 %v7014_v31, %v7014_v31  ;;  %v3605_v7 = vmul.f32 %v7017_v52, %v7017_v52  ;;  %4429 = vmatprep.subr.bf16.mxu0 %v4997_v14 }
 0x74f   : > { %3632 = vadd.xlane.f32.xlu1 %v3603_v44  ;;  %3634 = vadd.xlane.f32.xlu0 %v3604_v15 }
 0x750   : > { %4430 = vmatpush3.bf16.msra.mxu0 %v4905_v27  ;;  %v7055_v27 = vld [vmem:[%s7283_s27] ss:$0 sm:$0xff] }
 0x751   : > { %4431 = vmatprep.subr.bf16.mxu0 %v4997_v14 }
 0x753   : > { %3636 = vadd.xlane.f32.xlu1 %v3605_v7 }
 0x754   : > { %4432 = vmatpush3.bf16.msra.mxu0 %v4906_v54 }
 0x755   : > { %4433 = vmatprep.subr.bf16.mxu0 %v4997_v14 }
 0x758   : > { %4434 = vmatpush3.bf16.msra.mxu0 %v4907_v9 }
 0x759   : > { %4435 = vmatprep.subr.bf16.mxu0 %v4997_v14 }
 0x75c   : > { %4436 = vmatpush3.bf16.msra.mxu0 %v4908_v42 }
 0x75d   : > { %4437 = vmatprep.subr.bf16.mxu0 %v4997_v14 }
 0x760   : > { %4438 = vmatpush3.bf16.msra.mxu0 %v4909_v17 }
 0x761   : > { %4439 = vmatprep.subr.bf16.mxu0 %v4997_v14 }
 0x764   : > { %4440 = vmatpush3.bf16.msra.mxu0 %v4910_v37 }
 0x765   : > { %4441 = vmatprep.subr.bf16.mxu0 %v4997_v14 }
 0x768   : > { %4442 = vmatpush3.bf16.msra.mxu0 %v4911_v13 }
 0x7bc   : > { %v3607_v32 = vpop.xlane.xlu0 %3606 }
 0x7bd   : > { %v3638_v61 = vmul.f32 0.0078125, %v3607_v32 }
 0x7bf   : > { %v3654_v21 = vadd.f32 1e-06, %v3638_v61 }
 0x7c0   : > { %v3609_v19 = vpop.xlane.xlu1 %3608  ;;  %v3611_v38 = vpop.xlane.xlu0 %3610 }
 0x7c1   : > { %v3639_v45 = vmul.f32 0.0078125, %v3609_v19  ;;  %v3640_v5 = vmul.f32 0.0078125, %v3611_v38  ;;  %4912 = vrsqrt.f32 %v3654_v21  ;;  %v7065_v38 = vld [vmem:[%s7284_s25] ss:$0 sm:$0xff] }
 0x7c3   : > { %v3655_v46 = vadd.f32 1e-06, %v3639_v45  ;;  %v3656_v55 = vadd.f32 1e-06, %v3640_v5 }
 0x7c4   : > { %v3613_v4 = vpop.xlane.xlu1 %3612  ;;  %v3615_v47 = vpop.xlane.xlu0 %3614 }
 0x7c5   : > { %4914 = vrsqrt.f32 %v3655_v46  ;;  %v3641_v41 = vmul.f32 0.0078125, %v3613_v4  ;;  %v3642_v59 = vmul.f32 0.0078125, %v3615_v47 }
 0x7c6   : > { %4916 = vrsqrt.f32 %v3656_v55 }
 0x7c7   : > { %v3657_v48 = vadd.f32 1e-06, %v3641_v41  ;;  %v3658_v49 = vadd.f32 1e-06, %v3642_v59 }
 0x7c8   : > { %v3617_v12 = vpop.xlane.xlu1 %3616  ;;  %v3619_v22 = vpop.xlane.xlu0 %3618 }
 0x7c9   : > { %4918 = vrsqrt.f32 %v3657_v48  ;;  %v3643_v43 = vmul.f32 0.0078125, %v3617_v12  ;;  %v3644_v24 = vmul.f32 0.0078125, %v3619_v22 }
 0x7ca   : > { %4920 = vrsqrt.f32 %v3658_v49 }
 0x7cb   : > { %v3659_v29 = vadd.f32 1e-06, %v3643_v43  ;;  %v3660_v53 = vadd.f32 1e-06, %v3644_v24 }
 0x7cc   : > { %v3621_v34 = vpop.xlane.xlu1 %3620  ;;  %v3623_v36 = vpop.xlane.xlu0 %3622 }
 0x7cd   : > { %4922 = vrsqrt.f32 %v3659_v29  ;;  %v3645_v11 = vmul.f32 0.0078125, %v3621_v34  ;;  %v3646_v62 = vmul.f32 0.0078125, %v3623_v36 }
 0x7ce   : > { %4924 = vrsqrt.f32 %v3660_v53  ;;  %v4913_v30 = vpop.eup %4912 }
 0x7cf   : > { %v3661_v33 = vadd.f32 1e-06, %v3645_v11  ;;  %v3662_v57 = vadd.f32 1e-06, %v3646_v62  ;;  %v3686_v15 = vmul.f32 %v4913_v30, %v6946_v63 }
 0x7d0   : > { %v3625_v35 = vpop.xlane.xlu1 %3624  ;;  %v3627_v3 = vpop.xlane.xlu0 %3626 }
 0x7d1   : > { %4926 = vrsqrt.f32 %v3661_v33  ;;  %v3647_v8 = vmul.f32 0.0078125, %v3625_v35  ;;  %v3648_v28 = vmul.f32 0.0078125, %v3627_v3  ;;  %v3708_v32 = vmul.f32 %v7055_v27, %v3686_v15 }
 0x7d2   : > { %v4915_v1 = vpop.eup %4914  ;;  %4928 = vrsqrt.f32 %v3662_v57 }
 0x7d3   : > { %v4917_v58 = vpop.eup %4916  ;;  %v3687_v26 = vmul.f32 %v4915_v1, %v6954_v25  ;;  %v3663_v50 = vadd.f32 1e-06, %v3647_v8  ;;  %v3664_v44 = vadd.f32 1e-06, %v3648_v28  ;;  %v3730_v49 = vadd.f32 %v7065_v38, %v3708_v32 }
 0x7d4   : > { %v3688_v7 = vmul.f32 %v4917_v58, %v6949_v39  ;;  %v3629_v2 = vpop.xlane.xlu1 %3628  ;;  %v3631_v14 = vpop.xlane.xlu0 %3630 }
 0x7d5   : > { %4930 = vrsqrt.f32 %v3663_v50  ;;  %v3649_v54 = vmul.f32 0.0078125, %v3629_v2  ;;  %v3650_v9 = vmul.f32 0.0078125, %v3631_v14  ;;  %v3709_v17 = vmul.f32 %v7055_v27, %v3687_v26 }
 0x7d6   : > { %v4919_v42 = vpop.eup %4918  ;;  %v3710_v25 = vmul.f32 %v7055_v27, %v3688_v7  ;;  %4932 = vrsqrt.f32 %v3664_v44 }
 0x7d7   : > { %v4921_v37 = vpop.eup %4920  ;;  %v3689_v63 = vmul.f32 %v4919_v42, %v6957_v10  ;;  %v3665_v39 = vadd.f32 1e-06, %v3649_v54  ;;  %v3666_v13 = vadd.f32 1e-06, %v3650_v9  ;;  %v3731_v10 = vadd.f32 %v7065_v38, %v3709_v17 }
 0x7d8   : > { %v3690_v61 = vmul.f32 %v4921_v37, %v6964_v56  ;;  %v3633_v21 = vpop.xlane.xlu1 %3632  ;;  %v3635_v19 = vpop.xlane.xlu0 %3634  ;;  %v3732_v55 = vadd.f32 %v7065_v38, %v3710_v25 }
 0x7d9   : > { %v3711_v45 = vmul.f32 %v7055_v27, %v3689_v63  ;;  %4934 = vrsqrt.f32 %v3665_v39  ;;  %v3651_v5 = vmul.f32 0.0078125, %v3633_v21  ;;  %v3652_v4 = vmul.f32 0.0078125, %v3635_v19 }
 0x7da   : > { %v4923_v46 = vpop.eup %4922  ;;  %4936 = vrsqrt.f32 %v3666_v13  ;;  %v3712_v41 = vmul.f32 %v7055_v27, %v3690_v61  ;;  %v3746_v34 = vadd.f32 %v3731_v10, %v3730_v49 }
 0x7db   : > { %v4925_v47 = vpop.eup %4924  ;;  %v3733_v56 = vadd.f32 %v7065_v38, %v3711_v45  ;;  %v3691_v59 = vmul.f32 %v4923_v46, %v6967_v51  ;;  %v3667_v48 = vadd.f32 1e-06, %v3651_v5  ;;  %v3668_v22 = vadd.f32 1e-06, %v3652_v4 }
 0x7dc   : > { %v3692_v12 = vmul.f32 %v4925_v47, %v6974_v6  ;;  %v3637_v43 = vpop.xlane.xlu1 %3636  ;;  %v3734_v51 = vadd.f32 %v7065_v38, %v3712_v41  ;;  %v3747_v1 = vrot.slane %v3746_v34, 4 }
 0x7dd   : > { %v3753_v24 = vadd.f32 %v3733_v56, %v3732_v55  ;;  %v3713_v29 = vmul.f32 %v7055_v27, %v3691_v59  ;;  %4938 = vrsqrt.f32 %v3667_v48  ;;  %v3653_v11 = vmul.f32 0.0078125, %v3637_v43 }
 0x7de   : > { %v4927_v53 = vpop.eup %4926  ;;  %v3714_v36 = vmul.f32 %v7055_v27, %v3692_v12  ;;  %4940 = vrsqrt.f32 %v3668_v22  ;;  %v3748_v42 = vadd.f32 %v3747_v1, %v3746_v34 }
 0x7df   : > { %v4929_v62 = vpop.eup %4928  ;;  %v3735_v33 = vadd.f32 %v7065_v38, %v3713_v29  ;;  %v3693_v57 = vmul.f32 %v4927_v53, %v6977_v0  ;;  %v3754_v6 = vrot.slane %v3753_v24, 4  ;;  %v3669_v3 = vadd.f32 1e-06, %v3653_v11 }
 0x7e0   : > { %v3694_v35 = vmul.f32 %v4929_v62, %v6984_v20  ;;  %v3736_v58 = vadd.f32 %v7065_v38, %v3714_v36  ;;  %v3749_v5 = vrot.slane %v3748_v42, 2 }
 0x7e1   : > { %v3760_v30 = vadd.f32 %v3735_v33, %v3734_v51  ;;  %v3715_v8 = vmul.f32 %v7055_v27, %v3693_v57  ;;  %4942 = vrsqrt.f32 %v3669_v3  ;;  %v3755_v7 = vadd.f32 %v3754_v6, %v3753_v24 }
 0x7e2   : > { %v4931_v28 = vpop.eup %4930  ;;  %v3716_v15 = vmul.f32 %v7055_v27, %v3694_v35  ;;  %v3750_v22 = vadd.f32 %v3749_v5, %v3748_v42 }
 0x7e3   : > { %v4933_v26 = vpop.eup %4932  ;;  %v3761_v50 = vrot.slane %v3760_v30, 4  ;;  %v3737_v44 = vadd.f32 %v7065_v38, %v3715_v8  ;;  %v3695_v0 = vmul.f32 %v4931_v28, %v6987_v16  ;;  %v3756_v16 = vrot.slane %v3755_v7, 2 }
 0x7e4   : > { %v3696_v20 = vmul.f32 %v4933_v26, %v6994_v23  ;;  %v3738_v63 = vadd.f32 %v7065_v38, %v3716_v15  ;;  %v3751_v35 = vrot.slane %v3750_v22, 1 }
 0x7e5   : > { %v3762_v2 = vadd.f32 %v3761_v50, %v3760_v30  ;;  %v3767_v14 = vadd.f32 %v3737_v44, %v3736_v58  ;;  %v3717_v54 = vmul.f32 %v7055_v27, %v3695_v0  ;;  %v3757_v41 = vadd.f32 %v3756_v16, %v3755_v7 }
 0x7e6   : > { %v4935_v9 = vpop.eup %4934  ;;  %v3718_v17 = vmul.f32 %v7055_v27, %v3696_v20  ;;  %v3752_v15 = vadd.f32 %v3751_v35, %v3750_v22 }
 0x7e7   : > { %v4937_v25 = vpop.eup %4936  ;;  %v3768_v37 = vrot.slane %v3767_v14, 4  ;;  %v3739_v39 = vadd.f32 %v7065_v38, %v3717_v54  ;;  %v3697_v13 = vmul.f32 %v4935_v9, %v6997_v18  ;;  %v3763_v21 = vrot.slane %v3762_v2, 2 }
 0x7e8   : > { %v3698_v32 = vmul.f32 %v4937_v25, %v7004_v60  ;;  %v3740_v46 = vadd.f32 %v7065_v38, %v3718_v17  ;;  %v3758_v62 = vrot.slane %v3757_v41, 1 }
 0x7e9   : > { %v3774_v23 = vadd.f32 %v3739_v39, %v3738_v63  ;;  %v3719_v61 = vmul.f32 %v7055_v27, %v3697_v13  ;;  %v3769_v19 = vadd.f32 %v3768_v37, %v3767_v14  ;;  %v3764_v48 = vadd.f32 %v3763_v21, %v3762_v2 }
 0x7ea   : > { %v4939_v45 = vpop.eup %4938  ;;  %v3720_v10 = vmul.f32 %v7055_v27, %v3698_v32  ;;  %v3759_v26 = vadd.f32 %v3758_v62, %v3757_v41  ;;  %v3803_v37 = vmul.f32 0.0625, %v3752_v15 }
 0x7eb   : > { %v4941_v55 = vpop.eup %4940  ;;  %v3741_v4 = vadd.f32 %v7065_v38, %v3719_v61  ;;  %v3699_v47 = vmul.f32 %v4939_v45, %v7007_v40  ;;  %v3770_v18 = vrot.slane %v3769_v19, 2  ;;  %v3775_v56 = vrot.slane %v3774_v23, 4 }
 0x7ec   : > { %v3700_v60 = vmul.f32 %v4941_v55, %v7014_v31  ;;  %v3742_v29 = vadd.f32 %v7065_v38, %v3720_v10  ;;  %v3765_v31 = vrot.slane %v3764_v48, 1  ;;  %v3804_v54 = vmul.f32 0.0625, %v3759_v26 }
 0x7ed   : > { %v3721_v59 = vmul.f32 %v7055_v27, %v3699_v47  ;;  %v3776_v49 = vadd.f32 %v3775_v56, %v3774_v23  ;;  %v3781_v12 = vadd.f32 %v3741_v4, %v3740_v46  ;;  %v3771_v43 = vadd.f32 %v3770_v18, %v3769_v19 }
 0x7ee   : > { %v4943_v24 = vpop.eup %4942  ;;  %v3722_v40 = vmul.f32 %v7055_v27, %v3700_v60  ;;  %v3766_v50 = vadd.f32 %v3765_v31, %v3764_v48  ;;  %v3812_v32 = vpack.c.bf16 %v3804_v54, %v3804_v54  ;;  %v3811_v19 = vpack.c.bf16 %v3803_v37, %v3803_v37  ;;  %v4271_v31 = vld [vmem:[%s7285_s14] ss:$0 sm:$0xff] }
 0x7ef   : > { %v3743_v53 = vadd.f32 %v7065_v38, %v3721_v59  ;;  %v3777_v34 = vrot.slane %v3776_v49, 2  ;;  %v3782_v36 = vrot.slane %v3781_v12, 4  ;;  %v3701_v11 = vmul.f32 %v4943_v24, %v7017_v52 }
 0x7f0   : > { %v3772_v3 = vrot.slane %v3771_v43, 1  ;;  %v3744_v1 = vadd.f32 %v7065_v38, %v3722_v40  ;;  %v3805_v17 = vmul.f32 0.0625, %v3766_v50  ;;  %v3851_v4 = vunpack.c.l.b16 %v3812_v32 }
 0x7f1   : > { %v3778_v51 = vadd.f32 %v3777_v34, %v3776_v49  ;;  %v3783_v33 = vadd.f32 %v3782_v36, %v3781_v12  ;;  %v3788_v57 = vadd.f32 %v3743_v53, %v3742_v29  ;;  %v3723_v6 = vmul.f32 %v7055_v27, %v3701_v11 }
 0x7f2   : > { %v3773_v0 = vadd.f32 %v3772_v3, %v3771_v43  ;;  %v3813_v61 = vpack.c.bf16 %v3805_v17, %v3805_v17  ;;  %v3850_v41 = vunpack.c.l.b16 %v3811_v19 }
 0x7f3   : > { %v3779_v30 = vrot.slane %v3778_v51, 1  ;;  %v3784_v8 = vrot.slane %v3783_v33, 2  ;;  %v3789_v28 = vrot.slane %v3788_v57, 4  ;;  %v3745_v58 = vadd.f32 %v7065_v38, %v3723_v6 }
 0x7f4   : > { %v3806_v63 = vmul.f32 0.0625, %v3773_v0  ;;  %v3852_v18 = vunpack.c.l.b16 %v3813_v61  ;;  %v3859_v12 = vsel %vm3858_vm3, %v3851_v4, %v3850_v41 }
 0x7f5   : > { %v3785_v44 = vadd.f32 %v3784_v8, %v3783_v33  ;;  %v3790_v52 = vadd.f32 %v3789_v28, %v3788_v57  ;;  %v3795_v7 = vadd.f32 %v3745_v58, %v3744_v1  ;;  %v3780_v20 = vadd.f32 %v3779_v30, %v3778_v51 }
 0x7f6   : > { %v3814_v45 = vpack.c.bf16 %v3806_v63, %v3806_v63  ;;  %v3861_v43 = vsel %vm3860_vm4, %v3852_v18, %v3859_v12 }
 0x7f7   : > { %v3786_v2 = vrot.slane %v3785_v44, 1  ;;  %v3791_v14 = vrot.slane %v3790_v52, 2  ;;  %v3796_v27 = vrot.slane %v3795_v7, 4  ;;  %v3807_v38 = vmul.f32 0.0625, %v3780_v20 }
 0x7f8   : > { %v3853_v60 = vunpack.c.l.b16 %v3814_v45 }
 0x7f9   : > { %v3787_v9 = vadd.f32 %v3786_v2, %v3785_v44  ;;  %v3792_v42 = vadd.f32 %v3791_v14, %v3790_v52  ;;  %v3797_v25 = vadd.f32 %v3796_v27, %v3795_v7  ;;  %v3815_v46 = vpack.c.bf16 %v3807_v38, %v3807_v38 }
 0x7fa   : > { %v3863_v29 = vsel %vm3862_vm5, %v3853_v60, %v3861_v43 }
 0x7fb   : > { %v3793_v39 = vrot.slane %v3792_v42, 1  ;;  %v3798_v13 = vrot.slane %v3797_v25, 2  ;;  %v3808_v16 = vmul.f32 0.0625, %v3787_v9  ;;  %v3854_v59 = vunpack.c.l.b16 %v3815_v46 }
 0x7fd   : > { %v3794_v23 = vadd.f32 %v3793_v39, %v3792_v42  ;;  %v3799_v21 = vadd.f32 %v3798_v13, %v3797_v25  ;;  %v3816_v55 = vpack.c.bf16 %v3808_v16, %v3808_v16  ;;  %v3865_v53 = vsel %vm3864_vm6, %v3854_v59, %v3863_v29 }
 0x7ff   : > { %v3809_v5 = vmul.f32 0.0625, %v3794_v23  ;;  %v3800_v10 = vrot.slane %v3799_v21, 1  ;;  %v3855_v49 = vunpack.c.l.b16 %v3816_v55 }
 0x801   : > { %v3817_v47 = vpack.c.bf16 %v3809_v5, %v3809_v5  ;;  %v3801_v56 = vadd.f32 %v3800_v10, %v3799_v21  ;;  %v3867_v36 = vsel %vm3866_vm7, %v3855_v49, %v3865_v53 }
 0x803   : > { %v3810_v48 = vmul.f32 0.0625, %v3801_v56  ;;  %v3856_v22 = vunpack.c.l.b16 %v3817_v47 }
 0x805   : > { %v3818_v24 = vpack.c.bf16 %v3810_v48, %v3810_v48  ;;  %v3869_v40 = vsel %vm3868_vm8, %v3856_v22, %v3867_v36 }
 0x807   : > { %v3857_v34 = vunpack.c.l.b16 %v3818_v24 }
 0x809   : > { %v3871_v11 = vsel %vm3870_vm9, %v3857_v34, %v3869_v40 }
 0x80a   : > { %v3872_v62 = vpack.c.b16 %v3871_v11, %v3871_v11 }
 0x80c   : > { %4444 = vmatmul.mubr.bf16.vlgmr.msra.gmra.mxu0 %v3872_v62 }
 0x8cc   : > { %v3956_v51 = vpop.f32.mrf.mxu0 }
 0x8cd   : > { %v3957_v33 = vadd.f32 %v4271_v31, %v3956_v51 }
 0x8ce   : > { %v4445_v57 = vpop.f32.mrf.mxu0 }
 0x8cf   : > { %3962 = vst [vmem:[#allocation3] sm:$0xff] %v3957_v33 }
 0x8d0   : > { %v3959_v6 = vpop.f32.mrf.mxu0 }
 0x8d2   : > { %v4446_v35 = vpop.f32.mrf.mxu0 }
 0x8d3 PF: > { %s7286_s17 = sld [smem:[#allocation7_spill]]  ;;  %s4999_s22 = smov [#allocation3]  }
 0x8d4   : > { %s3972_s15 = sshll.u32 %s4999_s22, 4  ;;  %s3973_s15 = int_to_ptr.vmem [resolvable:$true] %s3972_s15 }
 0x8d5   : > { %s4944_s19 = scalar_lea.vmem %s3973_s15, 128  ;;  %p4951_p12 = scmp.lt.s32.totalorder %s3973_s15, %s3973_s15 }
 0x8d6   : > { %p4945_p9 = scmp.ne.s32.totalorder %s3973_s15, %s4944_s19  ;;  %p4952_p13 = scmp.lt.s32.totalorder %s4944_s19, %s4944_s19 }
 0x8d8   : > { %p4953_p0 = por %p4952_p13, %p4951_p12 }
 0x8d9   : > { %s7287_s3 = sadd.s32 4294967295, %s7286_s17  }
 0x8da   : > { %p7112_p8 = scmp.eq.s32.totalorder %s7287_s3, 1 }
 0x8dc   : > { %p4946_p10 = pnand %p4945_p9, %p7112_p8 }
 0x8de   : > { %p4947_p11 = pneg %p4946_p10 }
 0x8e0   : > { %p4954_p1 = pnand %p4953_p0, %p4947_p11 }
 0x8e2   : > { %4957 = shalt.err (!%p4954_p1)
}
 0x8e3   : > { %s7289_s26 = sld [smem:[#allocation38_spill]] }
 0x8e9   : > { %4448 = dma.vmem_to_hbm [thread:$0]  (%p7112_p8), %s3973_s15, 128, %s7289_s26, [#allocation4]  }
 0x8ea   : > { %4981 = dma.done.wait (%p7112_p8), [#allocation4], 128  }
 0x8eb   : > { %4983 = vsyncadd (%p7112_p8), [#allocation4], 4294967168 }
 0x8ec PF: > { %s7290_s4 = sld [smem:[#allocation7_spill]] }
 0x8ed   : > { %s7291_s24 = sld [smem:[#allocation6_spill]] }
 0x8ee   : > { %s7292_s25 = sld [smem:[#allocation8_spill]] }
 0x8f2   : > { %s28_s26 = sadd.s32 1, %s7290_s4  }
 0x8f3   : > { %p25_p2 = scmp.ge.s32.totalorder %s28_s26, 4  }
 0x8f5   :  { %27 = sbr.rel (!%p25_p2) target bundleno = 12 (0xc), region = 164 }
 0x8fa   :  { %3985 = vsyncpa [#allocation4], 1 }
 0x8fb   :  { %3987 = vsyncpa [#allocation4 + $0x1], 1 }

</bundles_post_ra>
